<compile_context>
chip_gen: v6e
topology: v6e:2x2x1
jax: 0.10.0
libtpu: 0.0.40
codegen_flags: <defaults>
</compile_context>

<pallas_src>
import math

import jax
import jax.numpy as jnp
from jax import lax
from jax.experimental import pallas as pl
from jax.experimental.pallas import tpu as pltpu

# --- small synthetic model dims ---
VOCAB = 64
HIDDEN = 128
NUM_HEADS = 4
HEAD_DIM = HIDDEN // NUM_HEADS   # 32
MAX_SEQ = 16
NUM_SLOTS = 8


def _decoder_step_kernel(pos_ref, ci_ref, off_ref,                       # SMEM scalar prefetch
                         ids_ref, emb_ref, wqkv_ref, wo_ref, g_ref, gt_ref,  # VMEM inputs
                         kc_in_hbm, vc_in_hbm,                           # HBM cache inputs (aliased)
                         out_ref, kc_hbm, vc_hbm,                        # outputs (caches in HBM)
                         kbuf, vbuf, pbuf, ctx_buf, rsem, wsem):         # scratch
    del kc_in_hbm, vc_in_hbm  # aliased to kc_hbm / vc_hbm; use the out refs for read+write
    B = out_ref.shape[0]

    # ---- 1) kick off per-slot K/V slab reads (HBM -> VMEM staging) -------------
    # Only the B active slot slabs move, never the whole cache.
    for b in range(B):
        slot = ci_ref[b]
        pltpu.make_async_copy(kc_hbm.at[pl.ds(slot, 1)], kbuf.at[pl.ds(b, 1)],
                              rsem.at[0, b]).start()
        pltpu.make_async_copy(vc_hbm.at[pl.ds(slot, 1)], vbuf.at[pl.ds(b, 1)],
                              rsem.at[1, b]).start()

    # ---- 2) embedding gather: ONE one-hot (B,VOCAB)x(VOCAB,HIDDEN) MXU pass -----
    vocab_iota = lax.broadcasted_iota(jnp.int32, (B, VOCAB), 1)
    onehot = (vocab_iota == ids_ref[...]).astype(jnp.float32)            # (B, VOCAB)
    x = jnp.dot(onehot, emb_ref[...], preferred_element_type=jnp.float32)  # (B, HIDDEN)

    # ---- 3) fused QKV projection: ONE (B,128)x(128,384) MXU pass ----------------
    qkv = jnp.dot(x, wqkv_ref[...], preferred_element_type=jnp.float32)  # (B, 3*HIDDEN)
    q = qkv[:, :HIDDEN]
    k_new = qkv[:, HIDDEN:2 * HIDDEN]
    v_new = qkv[:, 2 * HIDDEN:]

    # ---- 4) land slabs, insert the new row, write ONLY that row back to HBM -----
    for b in range(B):
        slot = ci_ref[b]
        wpos = pos_ref[b]
        pltpu.make_async_copy(kc_hbm.at[pl.ds(slot, 1)], kbuf.at[pl.ds(b, 1)],
                              rsem.at[0, b]).wait()
        pltpu.make_async_copy(vc_hbm.at[pl.ds(slot, 1)], vbuf.at[pl.ds(b, 1)],
                              rsem.at[1, b]).wait()
        # single-row dynamic-slice store into the staging slab (no blend / no copy)
        kbuf[b, pl.ds(wpos, 1), :] = k_new[b:b + 1, :]
        vbuf[b, pl.ds(wpos, 1), :] = v_new[b:b + 1, :]
        # row-only cache writeback (overlapped with the attention math below)
        pltpu.make_async_copy(kbuf.at[pl.ds(b, 1), pl.ds(wpos, 1), :],
                              kc_hbm.at[pl.ds(slot, 1), pl.ds(wpos, 1), :],
                              wsem.at[0, b]).start()
        pltpu.make_async_copy(vbuf.at[pl.ds(b, 1), pl.ds(wpos, 1), :],
                              vc_hbm.at[pl.ds(slot, 1), pl.ds(wpos, 1), :],
                              wsem.at[1, b]).start()

    # ---- 5) batched scores: ONE (B*S,128)x(128,H) MXU pass ----------------------
    k_all = kbuf[...]                                                    # (B, S, HIDDEN)
    prod = k_all * q[:, None, :]                                         # (B, S, HIDDEN)
    s3 = jnp.dot(prod.reshape(B * MAX_SEQ, HIDDEN), g_ref[...],          # g has 1/sqrt(d) folded in
                 preferred_element_type=jnp.float32).reshape(B, MAX_SEQ, NUM_HEADS)

    # ---- 6) per-sequence masked softmax (tiny (S,H) VPU/XLU tiles) --------------
    seq2d = lax.broadcasted_iota(jnp.int32, (MAX_SEQ, 1), 0)             # (S, 1)
    for b in range(B):
        off = off_ref[b]                      # requires off >= 1 (see wrapper doc)
        s_b = jnp.where(seq2d < off, s3[b], jnp.float32(-1e30))          # (S, H)
        m = jnp.max(s_b, axis=0, keepdims=True)                          # (1, H)
        p_b = jnp.exp(s_b - m)
        l = jnp.sum(p_b, axis=0, keepdims=True)                          # (1, H)
        pbuf[pl.ds(b * MAX_SEQ, MAX_SEQ), :] = p_b / l                   # exact reciprocal

    # ---- 7) batched head-broadcast: ONE (B*S,H)x(H,128) MXU pass ----------------
    p_full = jnp.dot(pbuf[...], gt_ref[...],
                     preferred_element_type=jnp.float32).reshape(B, MAX_SEQ, HIDDEN)

    # ---- 8) weighted V reduce into a (B,HIDDEN) VMEM scratch --------------------
    for b in range(B):
        ctx_buf[pl.ds(b, 1), :] = jnp.sum(p_full[b] * vbuf[b], axis=0, keepdims=True)

    # ---- 9) output projection: one (B,128)x(128,128) MXU pass -------------------
    out_ref[...] = jnp.dot(ctx_buf[...], wo_ref[...],
                           preferred_element_type=jnp.float32).astype(out_ref.dtype)

    # ---- 10) drain the row-writeback DMAs (were overlapped with compute) --------
    for b in range(B):
        slot = ci_ref[b]
        wpos = pos_ref[b]
        pltpu.make_async_copy(kbuf.at[pl.ds(b, 1), pl.ds(wpos, 1), :],
                              kc_hbm.at[pl.ds(slot, 1), pl.ds(wpos, 1), :],
                              wsem.at[0, b]).wait()
        pltpu.make_async_copy(vbuf.at[pl.ds(b, 1), pl.ds(wpos, 1), :],
                              vc_hbm.at[pl.ds(slot, 1), pl.ds(wpos, 1), :],
                              wsem.at[1, b]).wait()


def decoder_forward(params, input_ids, positions, k_cache, v_cache, offsets,
                    cache_indices, prompt_init=True, new_cache_indices=None):
    """JAX/Pallas equivalent of Decoder.forward (single decode step).

    Requires offsets >= 1 and distinct cache_indices across the batch.
    k_cache / v_cache are updated in place (aliased) and returned.
    Returns (hidden_states (B, HIDDEN), updated k_cache, updated v_cache).
    """
    del prompt_init, new_cache_indices  # TODO(synk): unused in the reference stub
    B = input_ids.shape[0]

    # Constants / weight packing hoisted out of the kernel.  In a real decode
    # loop these would be prepared once, not per call.
    wqkv = jnp.concatenate([params["wq"], params["wk"], params["wv"]], axis=1)
    lanes = jnp.arange(HIDDEN, dtype=jnp.int32)
    heads = jnp.arange(NUM_HEADS, dtype=jnp.int32)
    scale = 1.0 / math.sqrt(HEAD_DIM)
    g = (lanes[:, None] // HEAD_DIM == heads[None, :]).astype(jnp.float32) * scale
    g_t = (lanes[None, :] // HEAD_DIM == heads[:, None]).astype(jnp.float32)

    def _im2(i, pos, ci, off):
        return (0, 0)

    grid_spec = pltpu.PrefetchScalarGridSpec(
        num_scalar_prefetch=3,                 # positions, cache_indices, offsets -> SMEM
        grid=(1,),                             # batched single step; math fused across B
        in_specs=[
            pl.BlockSpec((B, 1), _im2),                      # token ids (one-hot gather)
            pl.BlockSpec((VOCAB, HIDDEN), _im2),             # embedding table
            pl.BlockSpec((HIDDEN, 3 * HIDDEN), _im2),        # fused Wqkv
            pl.BlockSpec((HIDDEN, HIDDEN), _im2),            # Wo
            pl.BlockSpec((HIDDEN, NUM_HEADS), _im2),         # head-sum one-hot (pre-scaled)
            pl.BlockSpec((NUM_HEADS, HIDDEN), _im2),         # head-broadcast one-hot
            pl.BlockSpec(memory_space=pl.ANY),               # k cache (HBM resident)
            pl.BlockSpec(memory_space=pl.ANY),               # v cache (HBM resident)
        ],
        out_specs=(
            pl.BlockSpec((B, HIDDEN), _im2),                 # hidden states
            pl.BlockSpec(memory_space=pl.ANY),               # k cache out (aliased)
            pl.BlockSpec(memory_space=pl.ANY),               # v cache out (aliased)
        ),
        scratch_shapes=[
            pltpu.VMEM((B, MAX_SEQ, HIDDEN), jnp.float32),   # K slab staging
            pltpu.VMEM((B, MAX_SEQ, HIDDEN), jnp.float32),   # V slab staging
            pltpu.VMEM((B * MAX_SEQ, NUM_HEADS), jnp.float32),  # softmax probs
            pltpu.VMEM((B, HIDDEN), jnp.float32),            # ctx accumulator
            pltpu.SemaphoreType.DMA((2, B)),                 # slab-read sems
            pltpu.SemaphoreType.DMA((2, B)),                 # row-writeback sems
        ],
    )

    out_shape = (
        jax.ShapeDtypeStruct((B, HIDDEN), jnp.float32),
        jax.ShapeDtypeStruct(k_cache.shape, k_cache.dtype),
        jax.ShapeDtypeStruct(v_cache.shape, v_cache.dtype),
    )

    out, kc_new, vc_new = pl.pallas_call(
        _decoder_step_kernel,
        grid_spec=grid_spec,
        out_shape=out_shape,
        # cache inputs alias the cache outputs (indices count the 3 scalar-prefetch args)
        input_output_aliases={9: 1, 10: 2},
        compiler_params=pltpu.CompilerParams(dimension_semantics=("arbitrary",)),
    )(positions.astype(jnp.int32), cache_indices.astype(jnp.int32),
      offsets.astype(jnp.int32),
      input_ids.astype(jnp.int32).reshape(B, 1),
      params["emb"], wqkv, params["wo"], g, g_t,
      k_cache, v_cache)

    return out, kc_new, vc_new


def _reference(params, input_ids, positions, k_cache, v_cache, offsets, cache_indices):
    """Pure-jnp reference of the same decode step (for correctness check)."""
    B = input_ids.shape[0]
    x = params["emb"][input_ids]
    q = (x @ params["wq"]).reshape(B, NUM_HEADS, HEAD_DIM)
    k_new = x @ params["wk"]
    v_new = x @ params["wv"]
    kc = k_cache.at[cache_indices, positions, :].set(k_new)
    vc = v_cache.at[cache_indices, positions, :].set(v_new)

    outs = []
    for b in range(B):
        slot = int(cache_indices[b])
        L = int(offsets[b])
        kk = kc[slot, :L, :].reshape(L, NUM_HEADS, HEAD_DIM)
        vv = vc[slot, :L, :].reshape(L, NUM_HEADS, HEAD_DIM)
        s = jnp.einsum("hd,lhd->hl", q[b], kk) / math.sqrt(HEAD_DIM)
        p = jax.nn.softmax(s, axis=-1)
        ctx = jnp.einsum("hl,lhd->hd", p, vv).reshape(HIDDEN)
        outs.append(ctx @ params["wo"])
    return jnp.stack(outs), kc, vc


def _init_params(key):
    ks = jax.random.split(key, 5)
    scale = 0.02
    return {
        "emb": scale * jax.random.normal(ks[0], (VOCAB, HIDDEN), jnp.float32),
        "wq": scale * jax.random.normal(ks[1], (HIDDEN, HIDDEN), jnp.float32),
        "wk": scale * jax.random.normal(ks[2], (HIDDEN, HIDDEN), jnp.float32),
        "wv": scale * jax.random.normal(ks[3], (HIDDEN, HIDDEN), jnp.float32),
        "wo": scale * jax.random.normal(ks[4], (HIDDEN, HIDDEN), jnp.float32),
    }


if __name__ == "__main__":
    key = jax.random.PRNGKey(0)
    k_param, k_ids, k_kc, k_vc = jax.random.split(key, 4)

    params = _init_params(k_param)

    B = 8
    input_ids = jax.random.randint(k_ids, (B,), 0, VOCAB, dtype=jnp.int32)
    offsets = jnp.array([6, 10, 1, 16, 3, 9, 12, 5], dtype=jnp.int32)    # valid length incl. new token
    positions = offsets - 1                                              # write position of the new token
    cache_indices = jnp.array([2, 0, 5, 7, 1, 3, 6, 4], dtype=jnp.int32)  # distinct slots per sequence
    assert int(offsets.min()) >= 1, "decoder_forward requires offsets >= 1"

    # Lane-dense cache layout: (slot, seq, HIDDEN) with heads packed along lanes.
    k_cache = 0.1 * jax.random.normal(k_kc, (NUM_SLOTS, MAX_SEQ, HIDDEN), jnp.float32)
    v_cache = 0.1 * jax.random.normal(k_vc, (NUM_SLOTS, MAX_SEQ, HIDDEN), jnp.float32)

    # Reference computed before the kernel (cache buffers are donated/aliased in place).
    ref_out, ref_kc, ref_vc = _reference(params, input_ids, positions,
                                         k_cache, v_cache, offsets, cache_indices)

    out, kc_new, vc_new = decoder_forward(
        params, input_ids, positions, k_cache, v_cache, offsets, cache_indices,
        prompt_init=False, new_cache_indices=None)
    jax.block_until_ready((out, kc_new, vc_new))

    assert out.shape == (B, HIDDEN)
    assert jnp.allclose(out, ref_out, atol=1e-3, rtol=1e-3), "output mismatch"
    assert jnp.allclose(kc_new, ref_kc, atol=1e-3, rtol=1e-3), "k_cache mismatch"
    assert jnp.allclose(vc_new, ref_vc, atol=1e-3, rtol=1e-3), "v_cache mismatch"

    print("KERNEL_OK")
</pallas_src>

<mosaic_0001>
module attributes {stable_mosaic.version = 11 : i64} {
  func.func @_decoder_step_kernel(%arg0: i32, %arg1: memref<8xi32, #tpu.memory_space<smem>>, %arg2: memref<8xi32, #tpu.memory_space<smem>>, %arg3: memref<8xi32, #tpu.memory_space<smem>>, %arg4: memref<8x1xi32, #tpu.memory_space<vmem>>, %arg5: memref<64x128xf32, #tpu.memory_space<vmem>>, %arg6: memref<128x384xf32, #tpu.memory_space<vmem>>, %arg7: memref<128x128xf32, #tpu.memory_space<vmem>>, %arg8: memref<128x4xf32, #tpu.memory_space<vmem>>, %arg9: memref<4x128xf32, #tpu.memory_space<vmem>>, %arg10: memref<8x16x128xf32, #tpu.memory_space<any>>, %arg11: memref<8x16x128xf32, #tpu.memory_space<any>>, %arg12: memref<8x128xf32, #tpu.memory_space<vmem>>, %arg13: memref<8x16x128xf32, #tpu.memory_space<any>>, %arg14: memref<8x16x128xf32, #tpu.memory_space<any>>, %arg15: memref<8x16x128xf32, #tpu.memory_space<vmem>>, %arg16: memref<8x16x128xf32, #tpu.memory_space<vmem>>, %arg17: memref<128x4xf32, #tpu.memory_space<vmem>>, %arg18: memref<8x128xf32, #tpu.memory_space<vmem>>, %arg19: memref<2x8x!tpu.dma_semaphore, #tpu.memory_space<semaphore_mem>>, %arg20: memref<2x8x!tpu.dma_semaphore, #tpu.memory_space<semaphore_mem>>) attributes {dimension_semantics = [#tpu.dimension_semantics<arbitrary>], iteration_bounds = array<i64: 1>, scalar_prefetch = 3 : i64, scratch_operands = 6 : i64, tpu.core_type = #tpu.core_type<tc>, window_params = [{pipeline_mode = #tpu.pipeline_mode<synchronous>, transform_indices = @transform_0, window_bounds = array<i64: 8, 1>}, {pipeline_mode = #tpu.pipeline_mode<synchronous>, transform_indices = @transform_1, window_bounds = array<i64: 64, 128>}, {pipeline_mode = #tpu.pipeline_mode<synchronous>, transform_indices = @transform_2, window_bounds = array<i64: 128, 384>}, {pipeline_mode = #tpu.pipeline_mode<synchronous>, transform_indices = @transform_3, window_bounds = array<i64: 128, 128>}, {pipeline_mode = #tpu.pipeline_mode<synchronous>, transform_indices = @transform_4, window_bounds = array<i64: 128, 4>}, {pipeline_mode = #tpu.pipeline_mode<synchronous>, transform_indices = @transform_5, window_bounds = array<i64: 4, 128>}, {}, {}, {pipeline_mode = #tpu.pipeline_mode<synchronous>, transform_indices = @transform_8, window_bounds = array<i64: 8, 128>}, {}, {}]} {
    %c0 = arith.constant 0 : index
    %0 = memref.load %arg2[%c0] : memref<8xi32, #tpu.memory_space<smem>>
    %c0_i32 = arith.constant 0 : i32
    %c0_i32_0 = arith.constant 0 : i32
    %c0_i32_1 = arith.constant 0 : i32
    %c0_i32_2 = arith.constant 0 : i32
    %1 = tpu.memref_slice %arg13[%0, %c0_i32_1, %c0_i32_2] : memref<8x16x128xf32, #tpu.memory_space<any>> -> memref<1x16x128xf32, #tpu.memory_space<any>>
    %c0_i32_3 = arith.constant 0 : i32
    %c0_i32_4 = arith.constant 0 : i32
    %c0_i32_5 = arith.constant 0 : i32
    %2 = tpu.memref_slice %arg15[%c0_i32_3, %c0_i32_4, %c0_i32_5] : memref<8x16x128xf32, #tpu.memory_space<vmem>> -> memref<1x16x128xf32, #tpu.memory_space<vmem>>
    %3 = tpu.memref_slice %arg19[%c0_i32, %c0_i32_0] : memref<2x8x!tpu.dma_semaphore, #tpu.memory_space<semaphore_mem>> -> memref<1x1x!tpu.dma_semaphore, #tpu.memory_space<semaphore_mem>>
    %4 = tpu.memref_squeeze %3 : memref<1x1x!tpu.dma_semaphore, #tpu.memory_space<semaphore_mem>> -> memref<!tpu.dma_semaphore, #tpu.memory_space<semaphore_mem>>
    tpu.enqueue_dma source(%1 : memref<1x16x128xf32, #tpu.memory_space<any>>) target(%2 : memref<1x16x128xf32, #tpu.memory_space<vmem>>) target_semaphore(%4 : memref<!tpu.dma_semaphore, #tpu.memory_space<semaphore_mem>>)
    %c1_i32 = arith.constant 1 : i32
    %c0_i32_6 = arith.constant 0 : i32
    %c0_i32_7 = arith.constant 0 : i32
    %c0_i32_8 = arith.constant 0 : i32
    %5 = tpu.memref_slice %arg14[%0, %c0_i32_7, %c0_i32_8] : memref<8x16x128xf32, #tpu.memory_space<any>> -> memref<1x16x128xf32, #tpu.memory_space<any>>
    %c0_i32_9 = arith.constant 0 : i32
    %c0_i32_10 = arith.constant 0 : i32
    %c0_i32_11 = arith.constant 0 : i32
    %6 = tpu.memref_slice %arg16[%c0_i32_9, %c0_i32_10, %c0_i32_11] : memref<8x16x128xf32, #tpu.memory_space<vmem>> -> memref<1x16x128xf32, #tpu.memory_space<vmem>>
    %7 = tpu.memref_slice %arg19[%c1_i32, %c0_i32_6] : memref<2x8x!tpu.dma_semaphore, #tpu.memory_space<semaphore_mem>> -> memref<1x1x!tpu.dma_semaphore, #tpu.memory_space<semaphore_mem>>
    %8 = tpu.memref_squeeze %7 : memref<1x1x!tpu.dma_semaphore, #tpu.memory_space<semaphore_mem>> -> memref<!tpu.dma_semaphore, #tpu.memory_space<semaphore_mem>>
    tpu.enqueue_dma source(%5 : memref<1x16x128xf32, #tpu.memory_space<any>>) target(%6 : memref<1x16x128xf32, #tpu.memory_space<vmem>>) target_semaphore(%8 : memref<!tpu.dma_semaphore, #tpu.memory_space<semaphore_mem>>)
    %c1 = arith.constant 1 : index
    %9 = memref.load %arg2[%c1] : memref<8xi32, #tpu.memory_space<smem>>
    %c0_i32_12 = arith.constant 0 : i32
    %c1_i32_13 = arith.constant 1 : i32
    %c0_i32_14 = arith.constant 0 : i32
    %c0_i32_15 = arith.constant 0 : i32
    %10 = tpu.memref_slice %arg13[%9, %c0_i32_14, %c0_i32_15] : memref<8x16x128xf32, #tpu.memory_space<any>> -> memref<1x16x128xf32, #tpu.memory_space<any>>
    %c1_i32_16 = arith.constant 1 : i32
    %c0_i32_17 = arith.constant 0 : i32
    %c0_i32_18 = arith.constant 0 : i32
    %11 = tpu.memref_slice %arg15[%c1_i32_16, %c0_i32_17, %c0_i32_18] : memref<8x16x128xf32, #tpu.memory_space<vmem>> -> memref<1x16x128xf32, #tpu.memory_space<vmem>>
    %12 = tpu.memref_slice %arg19[%c0_i32_12, %c1_i32_13] : memref<2x8x!tpu.dma_semaphore, #tpu.memory_space<semaphore_mem>> -> memref<1x1x!tpu.dma_semaphore, #tpu.memory_space<semaphore_mem>>
    %13 = tpu.memref_squeeze %12 : memref<1x1x!tpu.dma_semaphore, #tpu.memory_space<semaphore_mem>> -> memref<!tpu.dma_semaphore, #tpu.memory_space<semaphore_mem>>
    tpu.enqueue_dma source(%10 : memref<1x16x128xf32, #tpu.memory_space<any>>) target(%11 : memref<1x16x128xf32, #tpu.memory_space<vmem>>) target_semaphore(%13 : memref<!tpu.dma_semaphore, #tpu.memory_space<semaphore_mem>>)
    %c1_i32_19 = arith.constant 1 : i32
    %c1_i32_20 = arith.constant 1 : i32
    %c0_i32_21 = arith.constant 0 : i32
    %c0_i32_22 = arith.constant 0 : i32
    %14 = tpu.memref_slice %arg14[%9, %c0_i32_21, %c0_i32_22] : memref<8x16x128xf32, #tpu.memory_space<any>> -> memref<1x16x128xf32, #tpu.memory_space<any>>
    %c1_i32_23 = arith.constant 1 : i32
    %c0_i32_24 = arith.constant 0 : i32
    %c0_i32_25 = arith.constant 0 : i32
    %15 = tpu.memref_slice %arg16[%c1_i32_23, %c0_i32_24, %c0_i32_25] : memref<8x16x128xf32, #tpu.memory_space<vmem>> -> memref<1x16x128xf32, #tpu.memory_space<vmem>>
    %16 = tpu.memref_slice %arg19[%c1_i32_19, %c1_i32_20] : memref<2x8x!tpu.dma_semaphore, #tpu.memory_space<semaphore_mem>> -> memref<1x1x!tpu.dma_semaphore, #tpu.memory_space<semaphore_mem>>
    %17 = tpu.memref_squeeze %16 : memref<1x1x!tpu.dma_semaphore, #tpu.memory_space<semaphore_mem>> -> memref<!tpu.dma_semaphore, #tpu.memory_space<semaphore_mem>>
    tpu.enqueue_dma source(%14 : memref<1x16x128xf32, #tpu.memory_space<any>>) target(%15 : memref<1x16x128xf32, #tpu.memory_space<vmem>>) target_semaphore(%17 : memref<!tpu.dma_semaphore, #tpu.memory_space<semaphore_mem>>)
    %c2 = arith.constant 2 : index
    %18 = memref.load %arg2[%c2] : memref<8xi32, #tpu.memory_space<smem>>
    %c0_i32_26 = arith.constant 0 : i32
    %c2_i32 = arith.constant 2 : i32
    %c0_i32_27 = arith.constant 0 : i32
    %c0_i32_28 = arith.constant 0 : i32
    %19 = tpu.memref_slice %arg13[%18, %c0_i32_27, %c0_i32_28] : memref<8x16x128xf32, #tpu.memory_space<any>> -> memref<1x16x128xf32, #tpu.memory_space<any>>
    %c2_i32_29 = arith.constant 2 : i32
    %c0_i32_30 = arith.constant 0 : i32
    %c0_i32_31 = arith.constant 0 : i32
    %20 = tpu.memref_slice %arg15[%c2_i32_29, %c0_i32_30, %c0_i32_31] : memref<8x16x128xf32, #tpu.memory_space<vmem>> -> memref<1x16x128xf32, #tpu.memory_space<vmem>>
    %21 = tpu.memref_slice %arg19[%c0_i32_26, %c2_i32] : memref<2x8x!tpu.dma_semaphore, #tpu.memory_space<semaphore_mem>> -> memref<1x1x!tpu.dma_semaphore, #tpu.memory_space<semaphore_mem>>
    %22 = tpu.memref_squeeze %21 : memref<1x1x!tpu.dma_semaphore, #tpu.memory_space<semaphore_mem>> -> memref<!tpu.dma_semaphore, #tpu.memory_space<semaphore_mem>>
    tpu.enqueue_dma source(%19 : memref<1x16x128xf32, #tpu.memory_space<any>>) target(%20 : memref<1x16x128xf32, #tpu.memory_space<vmem>>) target_semaphore(%22 : memref<!tpu.dma_semaphore, #tpu.memory_space<semaphore_mem>>)
    %c1_i32_32 = arith.constant 1 : i32
    %c2_i32_33 = arith.constant 2 : i32
    %c0_i32_34 = arith.constant 0 : i32
    %c0_i32_35 = arith.constant 0 : i32
    %23 = tpu.memref_slice %arg14[%18, %c0_i32_34, %c0_i32_35] : memref<8x16x128xf32, #tpu.memory_space<any>> -> memref<1x16x128xf32, #tpu.memory_space<any>>
    %c2_i32_36 = arith.constant 2 : i32
    %c0_i32_37 = arith.constant 0 : i32
    %c0_i32_38 = arith.constant 0 : i32
    %24 = tpu.memref_slice %arg16[%c2_i32_36, %c0_i32_37, %c0_i32_38] : memref<8x16x128xf32, #tpu.memory_space<vmem>> -> memref<1x16x128xf32, #tpu.memory_space<vmem>>
    %25 = tpu.memref_slice %arg19[%c1_i32_32, %c2_i32_33] : memref<2x8x!tpu.dma_semaphore, #tpu.memory_space<semaphore_mem>> -> memref<1x1x!tpu.dma_semaphore, #tpu.memory_space<semaphore_mem>>
    %26 = tpu.memref_squeeze %25 : memref<1x1x!tpu.dma_semaphore, #tpu.memory_space<semaphore_mem>> -> memref<!tpu.dma_semaphore, #tpu.memory_space<semaphore_mem>>
    tpu.enqueue_dma source(%23 : memref<1x16x128xf32, #tpu.memory_space<any>>) target(%24 : memref<1x16x128xf32, #tpu.memory_space<vmem>>) target_semaphore(%26 : memref<!tpu.dma_semaphore, #tpu.memory_space<semaphore_mem>>)
    %c3 = arith.constant 3 : index
    %27 = memref.load %arg2[%c3] : memref<8xi32, #tpu.memory_space<smem>>
    %c0_i32_39 = arith.constant 0 : i32
    %c3_i32 = arith.constant 3 : i32
    %c0_i32_40 = arith.constant 0 : i32
    %c0_i32_41 = arith.constant 0 : i32
    %28 = tpu.memref_slice %arg13[%27, %c0_i32_40, %c0_i32_41] : memref<8x16x128xf32, #tpu.memory_space<any>> -> memref<1x16x128xf32, #tpu.memory_space<any>>
    %c3_i32_42 = arith.constant 3 : i32
    %c0_i32_43 = arith.constant 0 : i32
    %c0_i32_44 = arith.constant 0 : i32
    %29 = tpu.memref_slice %arg15[%c3_i32_42, %c0_i32_43, %c0_i32_44] : memref<8x16x128xf32, #tpu.memory_space<vmem>> -> memref<1x16x128xf32, #tpu.memory_space<vmem>>
    %30 = tpu.memref_slice %arg19[%c0_i32_39, %c3_i32] : memref<2x8x!tpu.dma_semaphore, #tpu.memory_space<semaphore_mem>> -> memref<1x1x!tpu.dma_semaphore, #tpu.memory_space<semaphore_mem>>
    %31 = tpu.memref_squeeze %30 : memref<1x1x!tpu.dma_semaphore, #tpu.memory_space<semaphore_mem>> -> memref<!tpu.dma_semaphore, #tpu.memory_space<semaphore_mem>>
    tpu.enqueue_dma source(%28 : memref<1x16x128xf32, #tpu.memory_space<any>>) target(%29 : memref<1x16x128xf32, #tpu.memory_space<vmem>>) target_semaphore(%31 : memref<!tpu.dma_semaphore, #tpu.memory_space<semaphore_mem>>)
    %c1_i32_45 = arith.constant 1 : i32
    %c3_i32_46 = arith.constant 3 : i32
    %c0_i32_47 = arith.constant 0 : i32
    %c0_i32_48 = arith.constant 0 : i32
    %32 = tpu.memref_slice %arg14[%27, %c0_i32_47, %c0_i32_48] : memref<8x16x128xf32, #tpu.memory_space<any>> -> memref<1x16x128xf32, #tpu.memory_space<any>>
    %c3_i32_49 = arith.constant 3 : i32
    %c0_i32_50 = arith.constant 0 : i32
    %c0_i32_51 = arith.constant 0 : i32
    %33 = tpu.memref_slice %arg16[%c3_i32_49, %c0_i32_50, %c0_i32_51] : memref<8x16x128xf32, #tpu.memory_space<vmem>> -> memref<1x16x128xf32, #tpu.memory_space<vmem>>
    %34 = tpu.memref_slice %arg19[%c1_i32_45, %c3_i32_46] : memref<2x8x!tpu.dma_semaphore, #tpu.memory_space<semaphore_mem>> -> memref<1x1x!tpu.dma_semaphore, #tpu.memory_space<semaphore_mem>>
    %35 = tpu.memref_squeeze %34 : memref<1x1x!tpu.dma_semaphore, #tpu.memory_space<semaphore_mem>> -> memref<!tpu.dma_semaphore, #tpu.memory_space<semaphore_mem>>
    tpu.enqueue_dma source(%32 : memref<1x16x128xf32, #tpu.memory_space<any>>) target(%33 : memref<1x16x128xf32, #tpu.memory_space<vmem>>) target_semaphore(%35 : memref<!tpu.dma_semaphore, #tpu.memory_space<semaphore_mem>>)
    %c4 = arith.constant 4 : index
    %36 = memref.load %arg2[%c4] : memref<8xi32, #tpu.memory_space<smem>>
    %c0_i32_52 = arith.constant 0 : i32
    %c4_i32 = arith.constant 4 : i32
    %c0_i32_53 = arith.constant 0 : i32
    %c0_i32_54 = arith.constant 0 : i32
    %37 = tpu.memref_slice %arg13[%36, %c0_i32_53, %c0_i32_54] : memref<8x16x128xf32, #tpu.memory_space<any>> -> memref<1x16x128xf32, #tpu.memory_space<any>>
    %c4_i32_55 = arith.constant 4 : i32
    %c0_i32_56 = arith.constant 0 : i32
    %c0_i32_57 = arith.constant 0 : i32
    %38 = tpu.memref_slice %arg15[%c4_i32_55, %c0_i32_56, %c0_i32_57] : memref<8x16x128xf32, #tpu.memory_space<vmem>> -> memref<1x16x128xf32, #tpu.memory_space<vmem>>
    %39 = tpu.memref_slice %arg19[%c0_i32_52, %c4_i32] : memref<2x8x!tpu.dma_semaphore, #tpu.memory_space<semaphore_mem>> -> memref<1x1x!tpu.dma_semaphore, #tpu.memory_space<semaphore_mem>>
    %40 = tpu.memref_squeeze %39 : memref<1x1x!tpu.dma_semaphore, #tpu.memory_space<semaphore_mem>> -> memref<!tpu.dma_semaphore, #tpu.memory_space<semaphore_mem>>
    tpu.enqueue_dma source(%37 : memref<1x16x128xf32, #tpu.memory_space<any>>) target(%38 : memref<1x16x128xf32, #tpu.memory_space<vmem>>) target_semaphore(%40 : memref<!tpu.dma_semaphore, #tpu.memory_space<semaphore_mem>>)
    %c1_i32_58 = arith.constant 1 : i32
    %c4_i32_59 = arith.constant 4 : i32
    %c0_i32_60 = arith.constant 0 : i32
    %c0_i32_61 = arith.constant 0 : i32
    %41 = tpu.memref_slice %arg14[%36, %c0_i32_60, %c0_i32_61] : memref<8x16x128xf32, #tpu.memory_space<any>> -> memref<1x16x128xf32, #tpu.memory_space<any>>
    %c4_i32_62 = arith.constant 4 : i32
    %c0_i32_63 = arith.constant 0 : i32
    %c0_i32_64 = arith.constant 0 : i32
    %42 = tpu.memref_slice %arg16[%c4_i32_62, %c0_i32_63, %c0_i32_64] : memref<8x16x128xf32, #tpu.memory_space<vmem>> -> memref<1x16x128xf32, #tpu.memory_space<vmem>>
    %43 = tpu.memref_slice %arg19[%c1_i32_58, %c4_i32_59] : memref<2x8x!tpu.dma_semaphore, #tpu.memory_space<semaphore_mem>> -> memref<1x1x!tpu.dma_semaphore, #tpu.memory_space<semaphore_mem>>
    %44 = tpu.memref_squeeze %43 : memref<1x1x!tpu.dma_semaphore, #tpu.memory_space<semaphore_mem>> -> memref<!tpu.dma_semaphore, #tpu.memory_space<semaphore_mem>>
    tpu.enqueue_dma source(%41 : memref<1x16x128xf32, #tpu.memory_space<any>>) target(%42 : memref<1x16x128xf32, #tpu.memory_space<vmem>>) target_semaphore(%44 : memref<!tpu.dma_semaphore, #tpu.memory_space<semaphore_mem>>)
    %c5 = arith.constant 5 : index
    %45 = memref.load %arg2[%c5] : memref<8xi32, #tpu.memory_space<smem>>
    %c0_i32_65 = arith.constant 0 : i32
    %c5_i32 = arith.constant 5 : i32
    %c0_i32_66 = arith.constant 0 : i32
    %c0_i32_67 = arith.constant 0 : i32
    %46 = tpu.memref_slice %arg13[%45, %c0_i32_66, %c0_i32_67] : memref<8x16x128xf32, #tpu.memory_space<any>> -> memref<1x16x128xf32, #tpu.memory_space<any>>
    %c5_i32_68 = arith.constant 5 : i32
    %c0_i32_69 = arith.constant 0 : i32
    %c0_i32_70 = arith.constant 0 : i32
    %47 = tpu.memref_slice %arg15[%c5_i32_68, %c0_i32_69, %c0_i32_70] : memref<8x16x128xf32, #tpu.memory_space<vmem>> -> memref<1x16x128xf32, #tpu.memory_space<vmem>>
    %48 = tpu.memref_slice %arg19[%c0_i32_65, %c5_i32] : memref<2x8x!tpu.dma_semaphore, #tpu.memory_space<semaphore_mem>> -> memref<1x1x!tpu.dma_semaphore, #tpu.memory_space<semaphore_mem>>
    %49 = tpu.memref_squeeze %48 : memref<1x1x!tpu.dma_semaphore, #tpu.memory_space<semaphore_mem>> -> memref<!tpu.dma_semaphore, #tpu.memory_space<semaphore_mem>>
    tpu.enqueue_dma source(%46 : memref<1x16x128xf32, #tpu.memory_space<any>>) target(%47 : memref<1x16x128xf32, #tpu.memory_space<vmem>>) target_semaphore(%49 : memref<!tpu.dma_semaphore, #tpu.memory_space<semaphore_mem>>)
    %c1_i32_71 = arith.constant 1 : i32
    %c5_i32_72 = arith.constant 5 : i32
    %c0_i32_73 = arith.constant 0 : i32
    %c0_i32_74 = arith.constant 0 : i32
    %50 = tpu.memref_slice %arg14[%45, %c0_i32_73, %c0_i32_74] : memref<8x16x128xf32, #tpu.memory_space<any>> -> memref<1x16x128xf32, #tpu.memory_space<any>>
    %c5_i32_75 = arith.constant 5 : i32
    %c0_i32_76 = arith.constant 0 : i32
    %c0_i32_77 = arith.constant 0 : i32
    %51 = tpu.memref_slice %arg16[%c5_i32_75, %c0_i32_76, %c0_i32_77] : memref<8x16x128xf32, #tpu.memory_space<vmem>> -> memref<1x16x128xf32, #tpu.memory_space<vmem>>
    %52 = tpu.memref_slice %arg19[%c1_i32_71, %c5_i32_72] : memref<2x8x!tpu.dma_semaphore, #tpu.memory_space<semaphore_mem>> -> memref<1x1x!tpu.dma_semaphore, #tpu.memory_space<semaphore_mem>>
    %53 = tpu.memref_squeeze %52 : memref<1x1x!tpu.dma_semaphore, #tpu.memory_space<semaphore_mem>> -> memref<!tpu.dma_semaphore, #tpu.memory_space<semaphore_mem>>
    tpu.enqueue_dma source(%50 : memref<1x16x128xf32, #tpu.memory_space<any>>) target(%51 : memref<1x16x128xf32, #tpu.memory_space<vmem>>) target_semaphore(%53 : memref<!tpu.dma_semaphore, #tpu.memory_space<semaphore_mem>>)
    %c6 = arith.constant 6 : index
    %54 = memref.load %arg2[%c6] : memref<8xi32, #tpu.memory_space<smem>>
    %c0_i32_78 = arith.constant 0 : i32
    %c6_i32 = arith.constant 6 : i32
    %c0_i32_79 = arith.constant 0 : i32
    %c0_i32_80 = arith.constant 0 : i32
    %55 = tpu.memref_slice %arg13[%54, %c0_i32_79, %c0_i32_80] : memref<8x16x128xf32, #tpu.memory_space<any>> -> memref<1x16x128xf32, #tpu.memory_space<any>>
    %c6_i32_81 = arith.constant 6 : i32
    %c0_i32_82 = arith.constant 0 : i32
    %c0_i32_83 = arith.constant 0 : i32
    %56 = tpu.memref_slice %arg15[%c6_i32_81, %c0_i32_82, %c0_i32_83] : memref<8x16x128xf32, #tpu.memory_space<vmem>> -> memref<1x16x128xf32, #tpu.memory_space<vmem>>
    %57 = tpu.memref_slice %arg19[%c0_i32_78, %c6_i32] : memref<2x8x!tpu.dma_semaphore, #tpu.memory_space<semaphore_mem>> -> memref<1x1x!tpu.dma_semaphore, #tpu.memory_space<semaphore_mem>>
    %58 = tpu.memref_squeeze %57 : memref<1x1x!tpu.dma_semaphore, #tpu.memory_space<semaphore_mem>> -> memref<!tpu.dma_semaphore, #tpu.memory_space<semaphore_mem>>
    tpu.enqueue_dma source(%55 : memref<1x16x128xf32, #tpu.memory_space<any>>) target(%56 : memref<1x16x128xf32, #tpu.memory_space<vmem>>) target_semaphore(%58 : memref<!tpu.dma_semaphore, #tpu.memory_space<semaphore_mem>>)
    %c1_i32_84 = arith.constant 1 : i32
    %c6_i32_85 = arith.constant 6 : i32
    %c0_i32_86 = arith.constant 0 : i32
    %c0_i32_87 = arith.constant 0 : i32
    %59 = tpu.memref_slice %arg14[%54, %c0_i32_86, %c0_i32_87] : memref<8x16x128xf32, #tpu.memory_space<any>> -> memref<1x16x128xf32, #tpu.memory_space<any>>
    %c6_i32_88 = arith.constant 6 : i32
    %c0_i32_89 = arith.constant 0 : i32
    %c0_i32_90 = arith.constant 0 : i32
    %60 = tpu.memref_slice %arg16[%c6_i32_88, %c0_i32_89, %c0_i32_90] : memref<8x16x128xf32, #tpu.memory_space<vmem>> -> memref<1x16x128xf32, #tpu.memory_space<vmem>>
    %61 = tpu.memref_slice %arg19[%c1_i32_84, %c6_i32_85] : memref<2x8x!tpu.dma_semaphore, #tpu.memory_space<semaphore_mem>> -> memref<1x1x!tpu.dma_semaphore, #tpu.memory_space<semaphore_mem>>
    %62 = tpu.memref_squeeze %61 : memref<1x1x!tpu.dma_semaphore, #tpu.memory_space<semaphore_mem>> -> memref<!tpu.dma_semaphore, #tpu.memory_space<semaphore_mem>>
    tpu.enqueue_dma source(%59 : memref<1x16x128xf32, #tpu.memory_space<any>>) target(%60 : memref<1x16x128xf32, #tpu.memory_space<vmem>>) target_semaphore(%62 : memref<!tpu.dma_semaphore, #tpu.memory_space<semaphore_mem>>)
    %c7 = arith.constant 7 : index
    %63 = memref.load %arg2[%c7] : memref<8xi32, #tpu.memory_space<smem>>
    %c0_i32_91 = arith.constant 0 : i32
    %c7_i32 = arith.constant 7 : i32
    %c0_i32_92 = arith.constant 0 : i32
    %c0_i32_93 = arith.constant 0 : i32
    %64 = tpu.memref_slice %arg13[%63, %c0_i32_92, %c0_i32_93] : memref<8x16x128xf32, #tpu.memory_space<any>> -> memref<1x16x128xf32, #tpu.memory_space<any>>
    %c7_i32_94 = arith.constant 7 : i32
    %c0_i32_95 = arith.constant 0 : i32
    %c0_i32_96 = arith.constant 0 : i32
    %65 = tpu.memref_slice %arg15[%c7_i32_94, %c0_i32_95, %c0_i32_96] : memref<8x16x128xf32, #tpu.memory_space<vmem>> -> memref<1x16x128xf32, #tpu.memory_space<vmem>>
    %66 = tpu.memref_slice %arg19[%c0_i32_91, %c7_i32] : memref<2x8x!tpu.dma_semaphore, #tpu.memory_space<semaphore_mem>> -> memref<1x1x!tpu.dma_semaphore, #tpu.memory_space<semaphore_mem>>
    %67 = tpu.memref_squeeze %66 : memref<1x1x!tpu.dma_semaphore, #tpu.memory_space<semaphore_mem>> -> memref<!tpu.dma_semaphore, #tpu.memory_space<semaphore_mem>>
    tpu.enqueue_dma source(%64 : memref<1x16x128xf32, #tpu.memory_space<any>>) target(%65 : memref<1x16x128xf32, #tpu.memory_space<vmem>>) target_semaphore(%67 : memref<!tpu.dma_semaphore, #tpu.memory_space<semaphore_mem>>)
    %c1_i32_97 = arith.constant 1 : i32
    %c7_i32_98 = arith.constant 7 : i32
    %c0_i32_99 = arith.constant 0 : i32
    %c0_i32_100 = arith.constant 0 : i32
    %68 = tpu.memref_slice %arg14[%63, %c0_i32_99, %c0_i32_100] : memref<8x16x128xf32, #tpu.memory_space<any>> -> memref<1x16x128xf32, #tpu.memory_space<any>>
    %c7_i32_101 = arith.constant 7 : i32
    %c0_i32_102 = arith.constant 0 : i32
    %c0_i32_103 = arith.constant 0 : i32
    %69 = tpu.memref_slice %arg16[%c7_i32_101, %c0_i32_102, %c0_i32_103] : memref<8x16x128xf32, #tpu.memory_space<vmem>> -> memref<1x16x128xf32, #tpu.memory_space<vmem>>
    %70 = tpu.memref_slice %arg19[%c1_i32_97, %c7_i32_98] : memref<2x8x!tpu.dma_semaphore, #tpu.memory_space<semaphore_mem>> -> memref<1x1x!tpu.dma_semaphore, #tpu.memory_space<semaphore_mem>>
    %71 = tpu.memref_squeeze %70 : memref<1x1x!tpu.dma_semaphore, #tpu.memory_space<semaphore_mem>> -> memref<!tpu.dma_semaphore, #tpu.memory_space<semaphore_mem>>
    tpu.enqueue_dma source(%68 : memref<1x16x128xf32, #tpu.memory_space<any>>) target(%69 : memref<1x16x128xf32, #tpu.memory_space<vmem>>) target_semaphore(%71 : memref<!tpu.dma_semaphore, #tpu.memory_space<semaphore_mem>>)
    %72 = tpu.iota {dimensions = array<i32: 1>} : vector<8x64xi32>
    %c0_104 = arith.constant 0 : index
    %c0_105 = arith.constant 0 : index
    %73 = vector.load %arg4[%c0_104, %c0_105] : memref<8x1xi32, #tpu.memory_space<vmem>>, vector<8x1xi32>
    %74 = vector.broadcast %73 : vector<8x1xi32> to vector<8x64xi32>
    %75 = arith.cmpi eq, %72, %74 : vector<8x64xi32>
    %76 = arith.extui %75 : vector<8x64xi1> to vector<8x64xi32>
    %77 = arith.sitofp %76 : vector<8x64xi32> to vector<8x64xf32>
    %c0_106 = arith.constant 0 : index
    %c0_107 = arith.constant 0 : index
    %78 = vector.load %arg5[%c0_106, %c0_107] : memref<64x128xf32, #tpu.memory_space<vmem>>, vector<64x128xf32>
    %cst = arith.constant dense<0.000000e+00> : vector<8x128xf32>
    %79 = tpu.matmul %77, %78, %cst {dimension_numbers = #tpu.dot_dimension_numbers<[1], [0], [0], [1], [0, 0, 1, 1], [], []>} : vector<8x64xf32>, vector<64x128xf32>, vector<8x128xf32> -> vector<8x128xf32>
    %c0_108 = arith.constant 0 : index
    %c0_109 = arith.constant 0 : index
    %80 = vector.load %arg6[%c0_108, %c0_109] : memref<128x384xf32, #tpu.memory_space<vmem>>, vector<128x384xf32>
    %cst_110 = arith.constant dense<0.000000e+00> : vector<8x384xf32>
    %81 = tpu.matmul %79, %80, %cst_110 {dimension_numbers = #tpu.dot_dimension_numbers<[1], [0], [0], [1], [0, 0, 1, 1], [], []>} : vector<8x128xf32>, vector<128x384xf32>, vector<8x384xf32> -> vector<8x384xf32>
    %82 = vector.extract_strided_slice %81 {offsets = [0, 0], sizes = [8, 128], strides = [1, 1]} : vector<8x384xf32> to vector<8x128xf32>
    %83 = vector.extract_strided_slice %81 {offsets = [0, 128], sizes = [8, 128], strides = [1, 1]} : vector<8x384xf32> to vector<8x128xf32>
    %84 = vector.extract_strided_slice %81 {offsets = [0, 256], sizes = [8, 128], strides = [1, 1]} : vector<8x384xf32> to vector<8x128xf32>
    %c0_111 = arith.constant 0 : index
    %85 = memref.load %arg2[%c0_111] : memref<8xi32, #tpu.memory_space<smem>>
    %c0_112 = arith.constant 0 : index
    %86 = memref.load %arg1[%c0_112] : memref<8xi32, #tpu.memory_space<smem>>
    %c0_i32_113 = arith.constant 0 : i32
    %c0_i32_114 = arith.constant 0 : i32
    %c0_i32_115 = arith.constant 0 : i32
    %c0_i32_116 = arith.constant 0 : i32
    %87 = tpu.memref_slice %arg13[%85, %c0_i32_115, %c0_i32_116] : memref<8x16x128xf32, #tpu.memory_space<any>> -> memref<1x16x128xf32, #tpu.memory_space<any>>
    %c0_i32_117 = arith.constant 0 : i32
    %c0_i32_118 = arith.constant 0 : i32
    %c0_i32_119 = arith.constant 0 : i32
    %88 = tpu.memref_slice %arg15[%c0_i32_117, %c0_i32_118, %c0_i32_119] : memref<8x16x128xf32, #tpu.memory_space<vmem>> -> memref<1x16x128xf32, #tpu.memory_space<vmem>>
    %89 = tpu.memref_slice %arg19[%c0_i32_113, %c0_i32_114] : memref<2x8x!tpu.dma_semaphore, #tpu.memory_space<semaphore_mem>> -> memref<1x1x!tpu.dma_semaphore, #tpu.memory_space<semaphore_mem>>
    %90 = tpu.memref_squeeze %89 : memref<1x1x!tpu.dma_semaphore, #tpu.memory_space<semaphore_mem>> -> memref<!tpu.dma_semaphore, #tpu.memory_space<semaphore_mem>>
    tpu.wait_dma2 semaphore(%90 : memref<!tpu.dma_semaphore, #tpu.memory_space<semaphore_mem>>) src(%87 : memref<1x16x128xf32, #tpu.memory_space<any>>) dst(%88 : memref<1x16x128xf32, #tpu.memory_space<vmem>>)
    %c1_i32_120 = arith.constant 1 : i32
    %c0_i32_121 = arith.constant 0 : i32
    %c0_i32_122 = arith.constant 0 : i32
    %c0_i32_123 = arith.constant 0 : i32
    %91 = tpu.memref_slice %arg14[%85, %c0_i32_122, %c0_i32_123] : memref<8x16x128xf32, #tpu.memory_space<any>> -> memref<1x16x128xf32, #tpu.memory_space<any>>
    %c0_i32_124 = arith.constant 0 : i32
    %c0_i32_125 = arith.constant 0 : i32
    %c0_i32_126 = arith.constant 0 : i32
    %92 = tpu.memref_slice %arg16[%c0_i32_124, %c0_i32_125, %c0_i32_126] : memref<8x16x128xf32, #tpu.memory_space<vmem>> -> memref<1x16x128xf32, #tpu.memory_space<vmem>>
    %93 = tpu.memref_slice %arg19[%c1_i32_120, %c0_i32_121] : memref<2x8x!tpu.dma_semaphore, #tpu.memory_space<semaphore_mem>> -> memref<1x1x!tpu.dma_semaphore, #tpu.memory_space<semaphore_mem>>
    %94 = tpu.memref_squeeze %93 : memref<1x1x!tpu.dma_semaphore, #tpu.memory_space<semaphore_mem>> -> memref<!tpu.dma_semaphore, #tpu.memory_space<semaphore_mem>>
    tpu.wait_dma2 semaphore(%94 : memref<!tpu.dma_semaphore, #tpu.memory_space<semaphore_mem>>) src(%91 : memref<1x16x128xf32, #tpu.memory_space<any>>) dst(%92 : memref<1x16x128xf32, #tpu.memory_space<vmem>>)
    %95 = vector.extract_strided_slice %83 {offsets = [0, 0], sizes = [1, 128], strides = [1, 1]} : vector<8x128xf32> to vector<1x128xf32>
    %c0_127 = arith.constant 0 : index
    %96 = arith.index_cast %86 : i32 to index
    %c0_128 = arith.constant 0 : index
    %97 = vector.load %arg15[%c0_127, %96, %c0_128] : memref<8x16x128xf32, #tpu.memory_space<vmem>>, vector<1x1x128xf32>
    %98 = vector.shape_cast %97 : vector<1x1x128xf32> to vector<1x128xf32>
    %99 = vector.shape_cast %95 : vector<1x128xf32> to vector<1x1x128xf32>
    tpu.vector_store %arg15[%c0_127, %96, %c0_128], %99 {strides = array<i32>} : memref<8x16x128xf32, #tpu.memory_space<vmem>>, vector<1x1x128xf32>,
    %100 = vector.extract_strided_slice %84 {offsets = [0, 0], sizes = [1, 128], strides = [1, 1]} : vector<8x128xf32> to vector<1x128xf32>
    %c0_129 = arith.constant 0 : index
    %101 = arith.index_cast %86 : i32 to index
    %c0_130 = arith.constant 0 : index
    %102 = vector.load %arg16[%c0_129, %101, %c0_130] : memref<8x16x128xf32, #tpu.memory_space<vmem>>, vector<1x1x128xf32>
    %103 = vector.shape_cast %102 : vector<1x1x128xf32> to vector<1x128xf32>
    %104 = vector.shape_cast %100 : vector<1x128xf32> to vector<1x1x128xf32>
    tpu.vector_store %arg16[%c0_129, %101, %c0_130], %104 {strides = array<i32>} : memref<8x16x128xf32, #tpu.memory_space<vmem>>, vector<1x1x128xf32>,
    %c0_i32_131 = arith.constant 0 : i32
    %c0_i32_132 = arith.constant 0 : i32
    %c0_i32_133 = arith.constant 0 : i32
    %c0_i32_134 = arith.constant 0 : i32
    %105 = tpu.memref_slice %arg15[%c0_i32_133, %86, %c0_i32_134] : memref<8x16x128xf32, #tpu.memory_space<vmem>> -> memref<1x1x128xf32, #tpu.memory_space<vmem>>
    %c0_i32_135 = arith.constant 0 : i32
    %106 = tpu.memref_slice %arg13[%85, %86, %c0_i32_135] : memref<8x16x128xf32, #tpu.memory_space<any>> -> memref<1x1x128xf32, #tpu.memory_space<any>>
    %107 = tpu.memref_slice %arg20[%c0_i32_131, %c0_i32_132] : memref<2x8x!tpu.dma_semaphore, #tpu.memory_space<semaphore_mem>> -> memref<1x1x!tpu.dma_semaphore, #tpu.memory_space<semaphore_mem>>
    %108 = tpu.memref_squeeze %107 : memref<1x1x!tpu.dma_semaphore, #tpu.memory_space<semaphore_mem>> -> memref<!tpu.dma_semaphore, #tpu.memory_space<semaphore_mem>>
    tpu.enqueue_dma source(%105 : memref<1x1x128xf32, #tpu.memory_space<vmem>>) target(%106 : memref<1x1x128xf32, #tpu.memory_space<any>>) target_semaphore(%108 : memref<!tpu.dma_semaphore, #tpu.memory_space<semaphore_mem>>)
    %c1_i32_136 = arith.constant 1 : i32
    %c0_i32_137 = arith.constant 0 : i32
    %c0_i32_138 = arith.constant 0 : i32
    %c0_i32_139 = arith.constant 0 : i32
    %109 = tpu.memref_slice %arg16[%c0_i32_138, %86, %c0_i32_139] : memref<8x16x128xf32, #tpu.memory_space<vmem>> -> memref<1x1x128xf32, #tpu.memory_space<vmem>>
    %c0_i32_140 = arith.constant 0 : i32
    %110 = tpu.memref_slice %arg14[%85, %86, %c0_i32_140] : memref<8x16x128xf32, #tpu.memory_space<any>> -> memref<1x1x128xf32, #tpu.memory_space<any>>
    %111 = tpu.memref_slice %arg20[%c1_i32_136, %c0_i32_137] : memref<2x8x!tpu.dma_semaphore, #tpu.memory_space<semaphore_mem>> -> memref<1x1x!tpu.dma_semaphore, #tpu.memory_space<semaphore_mem>>
    %112 = tpu.memref_squeeze %111 : memref<1x1x!tpu.dma_semaphore, #tpu.memory_space<semaphore_mem>> -> memref<!tpu.dma_semaphore, #tpu.memory_space<semaphore_mem>>
    tpu.enqueue_dma source(%109 : memref<1x1x128xf32, #tpu.memory_space<vmem>>) target(%110 : memref<1x1x128xf32, #tpu.memory_space<any>>) target_semaphore(%112 : memref<!tpu.dma_semaphore, #tpu.memory_space<semaphore_mem>>)
    %c1_141 = arith.constant 1 : index
    %113 = memref.load %arg2[%c1_141] : memref<8xi32, #tpu.memory_space<smem>>
    %c1_142 = arith.constant 1 : index
    %114 = memref.load %arg1[%c1_142] : memref<8xi32, #tpu.memory_space<smem>>
    %c0_i32_143 = arith.constant 0 : i32
    %c1_i32_144 = arith.constant 1 : i32
    %c0_i32_145 = arith.constant 0 : i32
    %c0_i32_146 = arith.constant 0 : i32
    %115 = tpu.memref_slice %arg13[%113, %c0_i32_145, %c0_i32_146] : memref<8x16x128xf32, #tpu.memory_space<any>> -> memref<1x16x128xf32, #tpu.memory_space<any>>
    %c1_i32_147 = arith.constant 1 : i32
    %c0_i32_148 = arith.constant 0 : i32
    %c0_i32_149 = arith.constant 0 : i32
    %116 = tpu.memref_slice %arg15[%c1_i32_147, %c0_i32_148, %c0_i32_149] : memref<8x16x128xf32, #tpu.memory_space<vmem>> -> memref<1x16x128xf32, #tpu.memory_space<vmem>>
    %117 = tpu.memref_slice %arg19[%c0_i32_143, %c1_i32_144] : memref<2x8x!tpu.dma_semaphore, #tpu.memory_space<semaphore_mem>> -> memref<1x1x!tpu.dma_semaphore, #tpu.memory_space<semaphore_mem>>
    %118 = tpu.memref_squeeze %117 : memref<1x1x!tpu.dma_semaphore, #tpu.memory_space<semaphore_mem>> -> memref<!tpu.dma_semaphore, #tpu.memory_space<semaphore_mem>>
    tpu.wait_dma2 semaphore(%118 : memref<!tpu.dma_semaphore, #tpu.memory_space<semaphore_mem>>) src(%115 : memref<1x16x128xf32, #tpu.memory_space<any>>) dst(%116 : memref<1x16x128xf32, #tpu.memory_space<vmem>>)
    %c1_i32_150 = arith.constant 1 : i32
    %c1_i32_151 = arith.constant 1 : i32
    %c0_i32_152 = arith.constant 0 : i32
    %c0_i32_153 = arith.constant 0 : i32
    %119 = tpu.memref_slice %arg14[%113, %c0_i32_152, %c0_i32_153] : memref<8x16x128xf32, #tpu.memory_space<any>> -> memref<1x16x128xf32, #tpu.memory_space<any>>
    %c1_i32_154 = arith.constant 1 : i32
    %c0_i32_155 = arith.constant 0 : i32
    %c0_i32_156 = arith.constant 0 : i32
    %120 = tpu.memref_slice %arg16[%c1_i32_154, %c0_i32_155, %c0_i32_156] : memref<8x16x128xf32, #tpu.memory_space<vmem>> -> memref<1x16x128xf32, #tpu.memory_space<vmem>>
    %121 = tpu.memref_slice %arg19[%c1_i32_150, %c1_i32_151] : memref<2x8x!tpu.dma_semaphore, #tpu.memory_space<semaphore_mem>> -> memref<1x1x!tpu.dma_semaphore, #tpu.memory_space<semaphore_mem>>
    %122 = tpu.memref_squeeze %121 : memref<1x1x!tpu.dma_semaphore, #tpu.memory_space<semaphore_mem>> -> memref<!tpu.dma_semaphore, #tpu.memory_space<semaphore_mem>>
    tpu.wait_dma2 semaphore(%122 : memref<!tpu.dma_semaphore, #tpu.memory_space<semaphore_mem>>) src(%119 : memref<1x16x128xf32, #tpu.memory_space<any>>) dst(%120 : memref<1x16x128xf32, #tpu.memory_space<vmem>>)
    %123 = vector.extract_strided_slice %83 {offsets = [1, 0], sizes = [1, 128], strides = [1, 1]} : vector<8x128xf32> to vector<1x128xf32>
    %c1_157 = arith.constant 1 : index
    %124 = arith.index_cast %114 : i32 to index
    %c0_158 = arith.constant 0 : index
    %125 = vector.load %arg15[%c1_157, %124, %c0_158] : memref<8x16x128xf32, #tpu.memory_space<vmem>>, vector<1x1x128xf32>
    %126 = vector.shape_cast %125 : vector<1x1x128xf32> to vector<1x128xf32>
    %127 = vector.shape_cast %123 : vector<1x128xf32> to vector<1x1x128xf32>
    tpu.vector_store %arg15[%c1_157, %124, %c0_158], %127 {strides = array<i32>} : memref<8x16x128xf32, #tpu.memory_space<vmem>>, vector<1x1x128xf32>,
    %128 = vector.extract_strided_slice %84 {offsets = [1, 0], sizes = [1, 128], strides = [1, 1]} : vector<8x128xf32> to vector<1x128xf32>
    %c1_159 = arith.constant 1 : index
    %129 = arith.index_cast %114 : i32 to index
    %c0_160 = arith.constant 0 : index
    %130 = vector.load %arg16[%c1_159, %129, %c0_160] : memref<8x16x128xf32, #tpu.memory_space<vmem>>, vector<1x1x128xf32>
    %131 = vector.shape_cast %130 : vector<1x1x128xf32> to vector<1x128xf32>
    %132 = vector.shape_cast %128 : vector<1x128xf32> to vector<1x1x128xf32>
    tpu.vector_store %arg16[%c1_159, %129, %c0_160], %132 {strides = array<i32>} : memref<8x16x128xf32, #tpu.memory_space<vmem>>, vector<1x1x128xf32>,
    %c0_i32_161 = arith.constant 0 : i32
    %c1_i32_162 = arith.constant 1 : i32
    %c1_i32_163 = arith.constant 1 : i32
    %c0_i32_164 = arith.constant 0 : i32
    %133 = tpu.memref_slice %arg15[%c1_i32_163, %114, %c0_i32_164] : memref<8x16x128xf32, #tpu.memory_space<vmem>> -> memref<1x1x128xf32, #tpu.memory_space<vmem>>
    %c0_i32_165 = arith.constant 0 : i32
    %134 = tpu.memref_slice %arg13[%113, %114, %c0_i32_165] : memref<8x16x128xf32, #tpu.memory_space<any>> -> memref<1x1x128xf32, #tpu.memory_space<any>>
    %135 = tpu.memref_slice %arg20[%c0_i32_161, %c1_i32_162] : memref<2x8x!tpu.dma_semaphore, #tpu.memory_space<semaphore_mem>> -> memref<1x1x!tpu.dma_semaphore, #tpu.memory_space<semaphore_mem>>
    %136 = tpu.memref_squeeze %135 : memref<1x1x!tpu.dma_semaphore, #tpu.memory_space<semaphore_mem>> -> memref<!tpu.dma_semaphore, #tpu.memory_space<semaphore_mem>>
    tpu.enqueue_dma source(%133 : memref<1x1x128xf32, #tpu.memory_space<vmem>>) target(%134 : memref<1x1x128xf32, #tpu.memory_space<any>>) target_semaphore(%136 : memref<!tpu.dma_semaphore, #tpu.memory_space<semaphore_mem>>)
    %c1_i32_166 = arith.constant 1 : i32
    %c1_i32_167 = arith.constant 1 : i32
    %c1_i32_168 = arith.constant 1 : i32
    %c0_i32_169 = arith.constant 0 : i32
    %137 = tpu.memref_slice %arg16[%c1_i32_168, %114, %c0_i32_169] : memref<8x16x128xf32, #tpu.memory_space<vmem>> -> memref<1x1x128xf32, #tpu.memory_space<vmem>>
    %c0_i32_170 = arith.constant 0 : i32
    %138 = tpu.memref_slice %arg14[%113, %114, %c0_i32_170] : memref<8x16x128xf32, #tpu.memory_space<any>> -> memref<1x1x128xf32, #tpu.memory_space<any>>
    %139 = tpu.memref_slice %arg20[%c1_i32_166, %c1_i32_167] : memref<2x8x!tpu.dma_semaphore, #tpu.memory_space<semaphore_mem>> -> memref<1x1x!tpu.dma_semaphore, #tpu.memory_space<semaphore_mem>>
    %140 = tpu.memref_squeeze %139 : memref<1x1x!tpu.dma_semaphore, #tpu.memory_space<semaphore_mem>> -> memref<!tpu.dma_semaphore, #tpu.memory_space<semaphore_mem>>
    tpu.enqueue_dma source(%137 : memref<1x1x128xf32, #tpu.memory_space<vmem>>) target(%138 : memref<1x1x128xf32, #tpu.memory_space<any>>) target_semaphore(%140 : memref<!tpu.dma_semaphore, #tpu.memory_space<semaphore_mem>>)
    %c2_171 = arith.constant 2 : index
    %141 = memref.load %arg2[%c2_171] : memref<8xi32, #tpu.memory_space<smem>>
    %c2_172 = arith.constant 2 : index
    %142 = memref.load %arg1[%c2_172] : memref<8xi32, #tpu.memory_space<smem>>
    %c0_i32_173 = arith.constant 0 : i32
    %c2_i32_174 = arith.constant 2 : i32
    %c0_i32_175 = arith.constant 0 : i32
    %c0_i32_176 = arith.constant 0 : i32
    %143 = tpu.memref_slice %arg13[%141, %c0_i32_175, %c0_i32_176] : memref<8x16x128xf32, #tpu.memory_space<any>> -> memref<1x16x128xf32, #tpu.memory_space<any>>
    %c2_i32_177 = arith.constant 2 : i32
    %c0_i32_178 = arith.constant 0 : i32
    %c0_i32_179 = arith.constant 0 : i32
    %144 = tpu.memref_slice %arg15[%c2_i32_177, %c0_i32_178, %c0_i32_179] : memref<8x16x128xf32, #tpu.memory_space<vmem>> -> memref<1x16x128xf32, #tpu.memory_space<vmem>>
    %145 = tpu.memref_slice %arg19[%c0_i32_173, %c2_i32_174] : memref<2x8x!tpu.dma_semaphore, #tpu.memory_space<semaphore_mem>> -> memref<1x1x!tpu.dma_semaphore, #tpu.memory_space<semaphore_mem>>
    %146 = tpu.memref_squeeze %145 : memref<1x1x!tpu.dma_semaphore, #tpu.memory_space<semaphore_mem>> -> memref<!tpu.dma_semaphore, #tpu.memory_space<semaphore_mem>>
    tpu.wait_dma2 semaphore(%146 : memref<!tpu.dma_semaphore, #tpu.memory_space<semaphore_mem>>) src(%143 : memref<1x16x128xf32, #tpu.memory_space<any>>) dst(%144 : memref<1x16x128xf32, #tpu.memory_space<vmem>>)
    %c1_i32_180 = arith.constant 1 : i32
    %c2_i32_181 = arith.constant 2 : i32
    %c0_i32_182 = arith.constant 0 : i32
    %c0_i32_183 = arith.constant 0 : i32
    %147 = tpu.memref_slice %arg14[%141, %c0_i32_182, %c0_i32_183] : memref<8x16x128xf32, #tpu.memory_space<any>> -> memref<1x16x128xf32, #tpu.memory_space<any>>
    %c2_i32_184 = arith.constant 2 : i32
    %c0_i32_185 = arith.constant 0 : i32
    %c0_i32_186 = arith.constant 0 : i32
    %148 = tpu.memref_slice %arg16[%c2_i32_184, %c0_i32_185, %c0_i32_186] : memref<8x16x128xf32, #tpu.memory_space<vmem>> -> memref<1x16x128xf32, #tpu.memory_space<vmem>>
    %149 = tpu.memref_slice %arg19[%c1_i32_180, %c2_i32_181] : memref<2x8x!tpu.dma_semaphore, #tpu.memory_space<semaphore_mem>> -> memref<1x1x!tpu.dma_semaphore, #tpu.memory_space<semaphore_mem>>
    %150 = tpu.memref_squeeze %149 : memref<1x1x!tpu.dma_semaphore, #tpu.memory_space<semaphore_mem>> -> memref<!tpu.dma_semaphore, #tpu.memory_space<semaphore_mem>>
    tpu.wait_dma2 semaphore(%150 : memref<!tpu.dma_semaphore, #tpu.memory_space<semaphore_mem>>) src(%147 : memref<1x16x128xf32, #tpu.memory_space<any>>) dst(%148 : memref<1x16x128xf32, #tpu.memory_space<vmem>>)
    %151 = vector.extract_strided_slice %83 {offsets = [2, 0], sizes = [1, 128], strides = [1, 1]} : vector<8x128xf32> to vector<1x128xf32>
    %c2_187 = arith.constant 2 : index
    %152 = arith.index_cast %142 : i32 to index
    %c0_188 = arith.constant 0 : index
    %153 = vector.load %arg15[%c2_187, %152, %c0_188] : memref<8x16x128xf32, #tpu.memory_space<vmem>>, vector<1x1x128xf32>
    %154 = vector.shape_cast %153 : vector<1x1x128xf32> to vector<1x128xf32>
    %155 = vector.shape_cast %151 : vector<1x128xf32> to vector<1x1x128xf32>
    tpu.vector_store %arg15[%c2_187, %152, %c0_188], %155 {strides = array<i32>} : memref<8x16x128xf32, #tpu.memory_space<vmem>>, vector<1x1x128xf32>,
    %156 = vector.extract_strided_slice %84 {offsets = [2, 0], sizes = [1, 128], strides = [1, 1]} : vector<8x128xf32> to vector<1x128xf32>
    %c2_189 = arith.constant 2 : index
    %157 = arith.index_cast %142 : i32 to index
    %c0_190 = arith.constant 0 : index
    %158 = vector.load %arg16[%c2_189, %157, %c0_190] : memref<8x16x128xf32, #tpu.memory_space<vmem>>, vector<1x1x128xf32>
    %159 = vector.shape_cast %158 : vector<1x1x128xf32> to vector<1x128xf32>
    %160 = vector.shape_cast %156 : vector<1x128xf32> to vector<1x1x128xf32>
    tpu.vector_store %arg16[%c2_189, %157, %c0_190], %160 {strides = array<i32>} : memref<8x16x128xf32, #tpu.memory_space<vmem>>, vector<1x1x128xf32>,
    %c0_i32_191 = arith.constant 0 : i32
    %c2_i32_192 = arith.constant 2 : i32
    %c2_i32_193 = arith.constant 2 : i32
    %c0_i32_194 = arith.constant 0 : i32
    %161 = tpu.memref_slice %arg15[%c2_i32_193, %142, %c0_i32_194] : memref<8x16x128xf32, #tpu.memory_space<vmem>> -> memref<1x1x128xf32, #tpu.memory_space<vmem>>
    %c0_i32_195 = arith.constant 0 : i32
    %162 = tpu.memref_slice %arg13[%141, %142, %c0_i32_195] : memref<8x16x128xf32, #tpu.memory_space<any>> -> memref<1x1x128xf32, #tpu.memory_space<any>>
    %163 = tpu.memref_slice %arg20[%c0_i32_191, %c2_i32_192] : memref<2x8x!tpu.dma_semaphore, #tpu.memory_space<semaphore_mem>> -> memref<1x1x!tpu.dma_semaphore, #tpu.memory_space<semaphore_mem>>
    %164 = tpu.memref_squeeze %163 : memref<1x1x!tpu.dma_semaphore, #tpu.memory_space<semaphore_mem>> -> memref<!tpu.dma_semaphore, #tpu.memory_space<semaphore_mem>>
    tpu.enqueue_dma source(%161 : memref<1x1x128xf32, #tpu.memory_space<vmem>>) target(%162 : memref<1x1x128xf32, #tpu.memory_space<any>>) target_semaphore(%164 : memref<!tpu.dma_semaphore, #tpu.memory_space<semaphore_mem>>)
    %c1_i32_196 = arith.constant 1 : i32
    %c2_i32_197 = arith.constant 2 : i32
    %c2_i32_198 = arith.constant 2 : i32
    %c0_i32_199 = arith.constant 0 : i32
    %165 = tpu.memref_slice %arg16[%c2_i32_198, %142, %c0_i32_199] : memref<8x16x128xf32, #tpu.memory_space<vmem>> -> memref<1x1x128xf32, #tpu.memory_space<vmem>>
    %c0_i32_200 = arith.constant 0 : i32
    %166 = tpu.memref_slice %arg14[%141, %142, %c0_i32_200] : memref<8x16x128xf32, #tpu.memory_space<any>> -> memref<1x1x128xf32, #tpu.memory_space<any>>
    %167 = tpu.memref_slice %arg20[%c1_i32_196, %c2_i32_197] : memref<2x8x!tpu.dma_semaphore, #tpu.memory_space<semaphore_mem>> -> memref<1x1x!tpu.dma_semaphore, #tpu.memory_space<semaphore_mem>>
    %168 = tpu.memref_squeeze %167 : memref<1x1x!tpu.dma_semaphore, #tpu.memory_space<semaphore_mem>> -> memref<!tpu.dma_semaphore, #tpu.memory_space<semaphore_mem>>
    tpu.enqueue_dma source(%165 : memref<1x1x128xf32, #tpu.memory_space<vmem>>) target(%166 : memref<1x1x128xf32, #tpu.memory_space<any>>) target_semaphore(%168 : memref<!tpu.dma_semaphore, #tpu.memory_space<semaphore_mem>>)
    %c3_201 = arith.constant 3 : index
    %169 = memref.load %arg2[%c3_201] : memref<8xi32, #tpu.memory_space<smem>>
    %c3_202 = arith.constant 3 : index
    %170 = memref.load %arg1[%c3_202] : memref<8xi32, #tpu.memory_space<smem>>
    %c0_i32_203 = arith.constant 0 : i32
    %c3_i32_204 = arith.constant 3 : i32
    %c0_i32_205 = arith.constant 0 : i32
    %c0_i32_206 = arith.constant 0 : i32
    %171 = tpu.memref_slice %arg13[%169, %c0_i32_205, %c0_i32_206] : memref<8x16x128xf32, #tpu.memory_space<any>> -> memref<1x16x128xf32, #tpu.memory_space<any>>
    %c3_i32_207 = arith.constant 3 : i32
    %c0_i32_208 = arith.constant 0 : i32
    %c0_i32_209 = arith.constant 0 : i32
    %172 = tpu.memref_slice %arg15[%c3_i32_207, %c0_i32_208, %c0_i32_209] : memref<8x16x128xf32, #tpu.memory_space<vmem>> -> memref<1x16x128xf32, #tpu.memory_space<vmem>>
    %173 = tpu.memref_slice %arg19[%c0_i32_203, %c3_i32_204] : memref<2x8x!tpu.dma_semaphore, #tpu.memory_space<semaphore_mem>> -> memref<1x1x!tpu.dma_semaphore, #tpu.memory_space<semaphore_mem>>
    %174 = tpu.memref_squeeze %173 : memref<1x1x!tpu.dma_semaphore, #tpu.memory_space<semaphore_mem>> -> memref<!tpu.dma_semaphore, #tpu.memory_space<semaphore_mem>>
    tpu.wait_dma2 semaphore(%174 : memref<!tpu.dma_semaphore, #tpu.memory_space<semaphore_mem>>) src(%171 : memref<1x16x128xf32, #tpu.memory_space<any>>) dst(%172 : memref<1x16x128xf32, #tpu.memory_space<vmem>>)
    %c1_i32_210 = arith.constant 1 : i32
    %c3_i32_211 = arith.constant 3 : i32
    %c0_i32_212 = arith.constant 0 : i32
    %c0_i32_213 = arith.constant 0 : i32
    %175 = tpu.memref_slice %arg14[%169, %c0_i32_212, %c0_i32_213] : memref<8x16x128xf32, #tpu.memory_space<any>> -> memref<1x16x128xf32, #tpu.memory_space<any>>
    %c3_i32_214 = arith.constant 3 : i32
    %c0_i32_215 = arith.constant 0 : i32
    %c0_i32_216 = arith.constant 0 : i32
    %176 = tpu.memref_slice %arg16[%c3_i32_214, %c0_i32_215, %c0_i32_216] : memref<8x16x128xf32, #tpu.memory_space<vmem>> -> memref<1x16x128xf32, #tpu.memory_space<vmem>>
    %177 = tpu.memref_slice %arg19[%c1_i32_210, %c3_i32_211] : memref<2x8x!tpu.dma_semaphore, #tpu.memory_space<semaphore_mem>> -> memref<1x1x!tpu.dma_semaphore, #tpu.memory_space<semaphore_mem>>
    %178 = tpu.memref_squeeze %177 : memref<1x1x!tpu.dma_semaphore, #tpu.memory_space<semaphore_mem>> -> memref<!tpu.dma_semaphore, #tpu.memory_space<semaphore_mem>>
    tpu.wait_dma2 semaphore(%178 : memref<!tpu.dma_semaphore, #tpu.memory_space<semaphore_mem>>) src(%175 : memref<1x16x128xf32, #tpu.memory_space<any>>) dst(%176 : memref<1x16x128xf32, #tpu.memory_space<vmem>>)
    %179 = vector.extract_strided_slice %83 {offsets = [3, 0], sizes = [1, 128], strides = [1, 1]} : vector<8x128xf32> to vector<1x128xf32>
    %c3_217 = arith.constant 3 : index
    %180 = arith.index_cast %170 : i32 to index
    %c0_218 = arith.constant 0 : index
    %181 = vector.load %arg15[%c3_217, %180, %c0_218] : memref<8x16x128xf32, #tpu.memory_space<vmem>>, vector<1x1x128xf32>
    %182 = vector.shape_cast %181 : vector<1x1x128xf32> to vector<1x128xf32>
    %183 = vector.shape_cast %179 : vector<1x128xf32> to vector<1x1x128xf32>
    tpu.vector_store %arg15[%c3_217, %180, %c0_218], %183 {strides = array<i32>} : memref<8x16x128xf32, #tpu.memory_space<vmem>>, vector<1x1x128xf32>,
    %184 = vector.extract_strided_slice %84 {offsets = [3, 0], sizes = [1, 128], strides = [1, 1]} : vector<8x128xf32> to vector<1x128xf32>
    %c3_219 = arith.constant 3 : index
    %185 = arith.index_cast %170 : i32 to index
    %c0_220 = arith.constant 0 : index
    %186 = vector.load %arg16[%c3_219, %185, %c0_220] : memref<8x16x128xf32, #tpu.memory_space<vmem>>, vector<1x1x128xf32>
    %187 = vector.shape_cast %186 : vector<1x1x128xf32> to vector<1x128xf32>
    %188 = vector.shape_cast %184 : vector<1x128xf32> to vector<1x1x128xf32>
    tpu.vector_store %arg16[%c3_219, %185, %c0_220], %188 {strides = array<i32>} : memref<8x16x128xf32, #tpu.memory_space<vmem>>, vector<1x1x128xf32>,
    %c0_i32_221 = arith.constant 0 : i32
    %c3_i32_222 = arith.constant 3 : i32
    %c3_i32_223 = arith.constant 3 : i32
    %c0_i32_224 = arith.constant 0 : i32
    %189 = tpu.memref_slice %arg15[%c3_i32_223, %170, %c0_i32_224] : memref<8x16x128xf32, #tpu.memory_space<vmem>> -> memref<1x1x128xf32, #tpu.memory_space<vmem>>
    %c0_i32_225 = arith.constant 0 : i32
    %190 = tpu.memref_slice %arg13[%169, %170, %c0_i32_225] : memref<8x16x128xf32, #tpu.memory_space<any>> -> memref<1x1x128xf32, #tpu.memory_space<any>>
    %191 = tpu.memref_slice %arg20[%c0_i32_221, %c3_i32_222] : memref<2x8x!tpu.dma_semaphore, #tpu.memory_space<semaphore_mem>> -> memref<1x1x!tpu.dma_semaphore, #tpu.memory_space<semaphore_mem>>
    %192 = tpu.memref_squeeze %191 : memref<1x1x!tpu.dma_semaphore, #tpu.memory_space<semaphore_mem>> -> memref<!tpu.dma_semaphore, #tpu.memory_space<semaphore_mem>>
    tpu.enqueue_dma source(%189 : memref<1x1x128xf32, #tpu.memory_space<vmem>>) target(%190 : memref<1x1x128xf32, #tpu.memory_space<any>>) target_semaphore(%192 : memref<!tpu.dma_semaphore, #tpu.memory_space<semaphore_mem>>)
    %c1_i32_226 = arith.constant 1 : i32
    %c3_i32_227 = arith.constant 3 : i32
    %c3_i32_228 = arith.constant 3 : i32
    %c0_i32_229 = arith.constant 0 : i32
    %193 = tpu.memref_slice %arg16[%c3_i32_228, %170, %c0_i32_229] : memref<8x16x128xf32, #tpu.memory_space<vmem>> -> memref<1x1x128xf32, #tpu.memory_space<vmem>>
    %c0_i32_230 = arith.constant 0 : i32
    %194 = tpu.memref_slice %arg14[%169, %170, %c0_i32_230] : memref<8x16x128xf32, #tpu.memory_space<any>> -> memref<1x1x128xf32, #tpu.memory_space<any>>
    %195 = tpu.memref_slice %arg20[%c1_i32_226, %c3_i32_227] : memref<2x8x!tpu.dma_semaphore, #tpu.memory_space<semaphore_mem>> -> memref<1x1x!tpu.dma_semaphore, #tpu.memory_space<semaphore_mem>>
    %196 = tpu.memref_squeeze %195 : memref<1x1x!tpu.dma_semaphore, #tpu.memory_space<semaphore_mem>> -> memref<!tpu.dma_semaphore, #tpu.memory_space<semaphore_mem>>
    tpu.enqueue_dma source(%193 : memref<1x1x128xf32, #tpu.memory_space<vmem>>) target(%194 : memref<1x1x128xf32, #tpu.memory_space<any>>) target_semaphore(%196 : memref<!tpu.dma_semaphore, #tpu.memory_space<semaphore_mem>>)
    %c4_231 = arith.constant 4 : index
    %197 = memref.load %arg2[%c4_231] : memref<8xi32, #tpu.memory_space<smem>>
    %c4_232 = arith.constant 4 : index
    %198 = memref.load %arg1[%c4_232] : memref<8xi32, #tpu.memory_space<smem>>
    %c0_i32_233 = arith.constant 0 : i32
    %c4_i32_234 = arith.constant 4 : i32
    %c0_i32_235 = arith.constant 0 : i32
    %c0_i32_236 = arith.constant 0 : i32
    %199 = tpu.memref_slice %arg13[%197, %c0_i32_235, %c0_i32_236] : memref<8x16x128xf32, #tpu.memory_space<any>> -> memref<1x16x128xf32, #tpu.memory_space<any>>
    %c4_i32_237 = arith.constant 4 : i32
    %c0_i32_238 = arith.constant 0 : i32
    %c0_i32_239 = arith.constant 0 : i32
    %200 = tpu.memref_slice %arg15[%c4_i32_237, %c0_i32_238, %c0_i32_239] : memref<8x16x128xf32, #tpu.memory_space<vmem>> -> memref<1x16x128xf32, #tpu.memory_space<vmem>>
    %201 = tpu.memref_slice %arg19[%c0_i32_233, %c4_i32_234] : memref<2x8x!tpu.dma_semaphore, #tpu.memory_space<semaphore_mem>> -> memref<1x1x!tpu.dma_semaphore, #tpu.memory_space<semaphore_mem>>
    %202 = tpu.memref_squeeze %201 : memref<1x1x!tpu.dma_semaphore, #tpu.memory_space<semaphore_mem>> -> memref<!tpu.dma_semaphore, #tpu.memory_space<semaphore_mem>>
    tpu.wait_dma2 semaphore(%202 : memref<!tpu.dma_semaphore, #tpu.memory_space<semaphore_mem>>) src(%199 : memref<1x16x128xf32, #tpu.memory_space<any>>) dst(%200 : memref<1x16x128xf32, #tpu.memory_space<vmem>>)
    %c1_i32_240 = arith.constant 1 : i32
    %c4_i32_241 = arith.constant 4 : i32
    %c0_i32_242 = arith.constant 0 : i32
    %c0_i32_243 = arith.constant 0 : i32
    %203 = tpu.memref_slice %arg14[%197, %c0_i32_242, %c0_i32_243] : memref<8x16x128xf32, #tpu.memory_space<any>> -> memref<1x16x128xf32, #tpu.memory_space<any>>
    %c4_i32_244 = arith.constant 4 : i32
    %c0_i32_245 = arith.constant 0 : i32
    %c0_i32_246 = arith.constant 0 : i32
    %204 = tpu.memref_slice %arg16[%c4_i32_244, %c0_i32_245, %c0_i32_246] : memref<8x16x128xf32, #tpu.memory_space<vmem>> -> memref<1x16x128xf32, #tpu.memory_space<vmem>>
    %205 = tpu.memref_slice %arg19[%c1_i32_240, %c4_i32_241] : memref<2x8x!tpu.dma_semaphore, #tpu.memory_space<semaphore_mem>> -> memref<1x1x!tpu.dma_semaphore, #tpu.memory_space<semaphore_mem>>
    %206 = tpu.memref_squeeze %205 : memref<1x1x!tpu.dma_semaphore, #tpu.memory_space<semaphore_mem>> -> memref<!tpu.dma_semaphore, #tpu.memory_space<semaphore_mem>>
    tpu.wait_dma2 semaphore(%206 : memref<!tpu.dma_semaphore, #tpu.memory_space<semaphore_mem>>) src(%203 : memref<1x16x128xf32, #tpu.memory_space<any>>) dst(%204 : memref<1x16x128xf32, #tpu.memory_space<vmem>>)
    %207 = vector.extract_strided_slice %83 {offsets = [4, 0], sizes = [1, 128], strides = [1, 1]} : vector<8x128xf32> to vector<1x128xf32>
    %c4_247 = arith.constant 4 : index
    %208 = arith.index_cast %198 : i32 to index
    %c0_248 = arith.constant 0 : index
    %209 = vector.load %arg15[%c4_247, %208, %c0_248] : memref<8x16x128xf32, #tpu.memory_space<vmem>>, vector<1x1x128xf32>
    %210 = vector.shape_cast %209 : vector<1x1x128xf32> to vector<1x128xf32>
    %211 = vector.shape_cast %207 : vector<1x128xf32> to vector<1x1x128xf32>
    tpu.vector_store %arg15[%c4_247, %208, %c0_248], %211 {strides = array<i32>} : memref<8x16x128xf32, #tpu.memory_space<vmem>>, vector<1x1x128xf32>,
    %212 = vector.extract_strided_slice %84 {offsets = [4, 0], sizes = [1, 128], strides = [1, 1]} : vector<8x128xf32> to vector<1x128xf32>
    %c4_249 = arith.constant 4 : index
    %213 = arith.index_cast %198 : i32 to index
    %c0_250 = arith.constant 0 : index
    %214 = vector.load %arg16[%c4_249, %213, %c0_250] : memref<8x16x128xf32, #tpu.memory_space<vmem>>, vector<1x1x128xf32>
    %215 = vector.shape_cast %214 : vector<1x1x128xf32> to vector<1x128xf32>
    %216 = vector.shape_cast %212 : vector<1x128xf32> to vector<1x1x128xf32>
    tpu.vector_store %arg16[%c4_249, %213, %c0_250], %216 {strides = array<i32>} : memref<8x16x128xf32, #tpu.memory_space<vmem>>, vector<1x1x128xf32>,
    %c0_i32_251 = arith.constant 0 : i32
    %c4_i32_252 = arith.constant 4 : i32
    %c4_i32_253 = arith.constant 4 : i32
    %c0_i32_254 = arith.constant 0 : i32
    %217 = tpu.memref_slice %arg15[%c4_i32_253, %198, %c0_i32_254] : memref<8x16x128xf32, #tpu.memory_space<vmem>> -> memref<1x1x128xf32, #tpu.memory_space<vmem>>
    %c0_i32_255 = arith.constant 0 : i32
    %218 = tpu.memref_slice %arg13[%197, %198, %c0_i32_255] : memref<8x16x128xf32, #tpu.memory_space<any>> -> memref<1x1x128xf32, #tpu.memory_space<any>>
    %219 = tpu.memref_slice %arg20[%c0_i32_251, %c4_i32_252] : memref<2x8x!tpu.dma_semaphore, #tpu.memory_space<semaphore_mem>> -> memref<1x1x!tpu.dma_semaphore, #tpu.memory_space<semaphore_mem>>
    %220 = tpu.memref_squeeze %219 : memref<1x1x!tpu.dma_semaphore, #tpu.memory_space<semaphore_mem>> -> memref<!tpu.dma_semaphore, #tpu.memory_space<semaphore_mem>>
    tpu.enqueue_dma source(%217 : memref<1x1x128xf32, #tpu.memory_space<vmem>>) target(%218 : memref<1x1x128xf32, #tpu.memory_space<any>>) target_semaphore(%220 : memref<!tpu.dma_semaphore, #tpu.memory_space<semaphore_mem>>)
    %c1_i32_256 = arith.constant 1 : i32
    %c4_i32_257 = arith.constant 4 : i32
    %c4_i32_258 = arith.constant 4 : i32
    %c0_i32_259 = arith.constant 0 : i32
    %221 = tpu.memref_slice %arg16[%c4_i32_258, %198, %c0_i32_259] : memref<8x16x128xf32, #tpu.memory_space<vmem>> -> memref<1x1x128xf32, #tpu.memory_space<vmem>>
    %c0_i32_260 = arith.constant 0 : i32
    %222 = tpu.memref_slice %arg14[%197, %198, %c0_i32_260] : memref<8x16x128xf32, #tpu.memory_space<any>> -> memref<1x1x128xf32, #tpu.memory_space<any>>
    %223 = tpu.memref_slice %arg20[%c1_i32_256, %c4_i32_257] : memref<2x8x!tpu.dma_semaphore, #tpu.memory_space<semaphore_mem>> -> memref<1x1x!tpu.dma_semaphore, #tpu.memory_space<semaphore_mem>>
    %224 = tpu.memref_squeeze %223 : memref<1x1x!tpu.dma_semaphore, #tpu.memory_space<semaphore_mem>> -> memref<!tpu.dma_semaphore, #tpu.memory_space<semaphore_mem>>
    tpu.enqueue_dma source(%221 : memref<1x1x128xf32, #tpu.memory_space<vmem>>) target(%222 : memref<1x1x128xf32, #tpu.memory_space<any>>) target_semaphore(%224 : memref<!tpu.dma_semaphore, #tpu.memory_space<semaphore_mem>>)
    %c5_261 = arith.constant 5 : index
    %225 = memref.load %arg2[%c5_261] : memref<8xi32, #tpu.memory_space<smem>>
    %c5_262 = arith.constant 5 : index
    %226 = memref.load %arg1[%c5_262] : memref<8xi32, #tpu.memory_space<smem>>
    %c0_i32_263 = arith.constant 0 : i32
    %c5_i32_264 = arith.constant 5 : i32
    %c0_i32_265 = arith.constant 0 : i32
    %c0_i32_266 = arith.constant 0 : i32
    %227 = tpu.memref_slice %arg13[%225, %c0_i32_265, %c0_i32_266] : memref<8x16x128xf32, #tpu.memory_space<any>> -> memref<1x16x128xf32, #tpu.memory_space<any>>
    %c5_i32_267 = arith.constant 5 : i32
    %c0_i32_268 = arith.constant 0 : i32
    %c0_i32_269 = arith.constant 0 : i32
    %228 = tpu.memref_slice %arg15[%c5_i32_267, %c0_i32_268, %c0_i32_269] : memref<8x16x128xf32, #tpu.memory_space<vmem>> -> memref<1x16x128xf32, #tpu.memory_space<vmem>>
    %229 = tpu.memref_slice %arg19[%c0_i32_263, %c5_i32_264] : memref<2x8x!tpu.dma_semaphore, #tpu.memory_space<semaphore_mem>> -> memref<1x1x!tpu.dma_semaphore, #tpu.memory_space<semaphore_mem>>
    %230 = tpu.memref_squeeze %229 : memref<1x1x!tpu.dma_semaphore, #tpu.memory_space<semaphore_mem>> -> memref<!tpu.dma_semaphore, #tpu.memory_space<semaphore_mem>>
    tpu.wait_dma2 semaphore(%230 : memref<!tpu.dma_semaphore, #tpu.memory_space<semaphore_mem>>) src(%227 : memref<1x16x128xf32, #tpu.memory_space<any>>) dst(%228 : memref<1x16x128xf32, #tpu.memory_space<vmem>>)
    %c1_i32_270 = arith.constant 1 : i32
    %c5_i32_271 = arith.constant 5 : i32
    %c0_i32_272 = arith.constant 0 : i32
    %c0_i32_273 = arith.constant 0 : i32
    %231 = tpu.memref_slice %arg14[%225, %c0_i32_272, %c0_i32_273] : memref<8x16x128xf32, #tpu.memory_space<any>> -> memref<1x16x128xf32, #tpu.memory_space<any>>
    %c5_i32_274 = arith.constant 5 : i32
    %c0_i32_275 = arith.constant 0 : i32
    %c0_i32_276 = arith.constant 0 : i32
    %232 = tpu.memref_slice %arg16[%c5_i32_274, %c0_i32_275, %c0_i32_276] : memref<8x16x128xf32, #tpu.memory_space<vmem>> -> memref<1x16x128xf32, #tpu.memory_space<vmem>>
    %233 = tpu.memref_slice %arg19[%c1_i32_270, %c5_i32_271] : memref<2x8x!tpu.dma_semaphore, #tpu.memory_space<semaphore_mem>> -> memref<1x1x!tpu.dma_semaphore, #tpu.memory_space<semaphore_mem>>
    %234 = tpu.memref_squeeze %233 : memref<1x1x!tpu.dma_semaphore, #tpu.memory_space<semaphore_mem>> -> memref<!tpu.dma_semaphore, #tpu.memory_space<semaphore_mem>>
    tpu.wait_dma2 semaphore(%234 : memref<!tpu.dma_semaphore, #tpu.memory_space<semaphore_mem>>) src(%231 : memref<1x16x128xf32, #tpu.memory_space<any>>) dst(%232 : memref<1x16x128xf32, #tpu.memory_space<vmem>>)
    %235 = vector.extract_strided_slice %83 {offsets = [5, 0], sizes = [1, 128], strides = [1, 1]} : vector<8x128xf32> to vector<1x128xf32>
    %c5_277 = arith.constant 5 : index
    %236 = arith.index_cast %226 : i32 to index
    %c0_278 = arith.constant 0 : index
    %237 = vector.load %arg15[%c5_277, %236, %c0_278] : memref<8x16x128xf32, #tpu.memory_space<vmem>>, vector<1x1x128xf32>
    %238 = vector.shape_cast %237 : vector<1x1x128xf32> to vector<1x128xf32>
    %239 = vector.shape_cast %235 : vector<1x128xf32> to vector<1x1x128xf32>
    tpu.vector_store %arg15[%c5_277, %236, %c0_278], %239 {strides = array<i32>} : memref<8x16x128xf32, #tpu.memory_space<vmem>>, vector<1x1x128xf32>,
    %240 = vector.extract_strided_slice %84 {offsets = [5, 0], sizes = [1, 128], strides = [1, 1]} : vector<8x128xf32> to vector<1x128xf32>
    %c5_279 = arith.constant 5 : index
    %241 = arith.index_cast %226 : i32 to index
    %c0_280 = arith.constant 0 : index
    %242 = vector.load %arg16[%c5_279, %241, %c0_280] : memref<8x16x128xf32, #tpu.memory_space<vmem>>, vector<1x1x128xf32>
    %243 = vector.shape_cast %242 : vector<1x1x128xf32> to vector<1x128xf32>
    %244 = vector.shape_cast %240 : vector<1x128xf32> to vector<1x1x128xf32>
    tpu.vector_store %arg16[%c5_279, %241, %c0_280], %244 {strides = array<i32>} : memref<8x16x128xf32, #tpu.memory_space<vmem>>, vector<1x1x128xf32>,
    %c0_i32_281 = arith.constant 0 : i32
    %c5_i32_282 = arith.constant 5 : i32
    %c5_i32_283 = arith.constant 5 : i32
    %c0_i32_284 = arith.constant 0 : i32
    %245 = tpu.memref_slice %arg15[%c5_i32_283, %226, %c0_i32_284] : memref<8x16x128xf32, #tpu.memory_space<vmem>> -> memref<1x1x128xf32, #tpu.memory_space<vmem>>
    %c0_i32_285 = arith.constant 0 : i32
    %246 = tpu.memref_slice %arg13[%225, %226, %c0_i32_285] : memref<8x16x128xf32, #tpu.memory_space<any>> -> memref<1x1x128xf32, #tpu.memory_space<any>>
    %247 = tpu.memref_slice %arg20[%c0_i32_281, %c5_i32_282] : memref<2x8x!tpu.dma_semaphore, #tpu.memory_space<semaphore_mem>> -> memref<1x1x!tpu.dma_semaphore, #tpu.memory_space<semaphore_mem>>
    %248 = tpu.memref_squeeze %247 : memref<1x1x!tpu.dma_semaphore, #tpu.memory_space<semaphore_mem>> -> memref<!tpu.dma_semaphore, #tpu.memory_space<semaphore_mem>>
    tpu.enqueue_dma source(%245 : memref<1x1x128xf32, #tpu.memory_space<vmem>>) target(%246 : memref<1x1x128xf32, #tpu.memory_space<any>>) target_semaphore(%248 : memref<!tpu.dma_semaphore, #tpu.memory_space<semaphore_mem>>)
    %c1_i32_286 = arith.constant 1 : i32
    %c5_i32_287 = arith.constant 5 : i32
    %c5_i32_288 = arith.constant 5 : i32
    %c0_i32_289 = arith.constant 0 : i32
    %249 = tpu.memref_slice %arg16[%c5_i32_288, %226, %c0_i32_289] : memref<8x16x128xf32, #tpu.memory_space<vmem>> -> memref<1x1x128xf32, #tpu.memory_space<vmem>>
    %c0_i32_290 = arith.constant 0 : i32
    %250 = tpu.memref_slice %arg14[%225, %226, %c0_i32_290] : memref<8x16x128xf32, #tpu.memory_space<any>> -> memref<1x1x128xf32, #tpu.memory_space<any>>
    %251 = tpu.memref_slice %arg20[%c1_i32_286, %c5_i32_287] : memref<2x8x!tpu.dma_semaphore, #tpu.memory_space<semaphore_mem>> -> memref<1x1x!tpu.dma_semaphore, #tpu.memory_space<semaphore_mem>>
    %252 = tpu.memref_squeeze %251 : memref<1x1x!tpu.dma_semaphore, #tpu.memory_space<semaphore_mem>> -> memref<!tpu.dma_semaphore, #tpu.memory_space<semaphore_mem>>
    tpu.enqueue_dma source(%249 : memref<1x1x128xf32, #tpu.memory_space<vmem>>) target(%250 : memref<1x1x128xf32, #tpu.memory_space<any>>) target_semaphore(%252 : memref<!tpu.dma_semaphore, #tpu.memory_space<semaphore_mem>>)
    %c6_291 = arith.constant 6 : index
    %253 = memref.load %arg2[%c6_291] : memref<8xi32, #tpu.memory_space<smem>>
    %c6_292 = arith.constant 6 : index
    %254 = memref.load %arg1[%c6_292] : memref<8xi32, #tpu.memory_space<smem>>
    %c0_i32_293 = arith.constant 0 : i32
    %c6_i32_294 = arith.constant 6 : i32
    %c0_i32_295 = arith.constant 0 : i32
    %c0_i32_296 = arith.constant 0 : i32
    %255 = tpu.memref_slice %arg13[%253, %c0_i32_295, %c0_i32_296] : memref<8x16x128xf32, #tpu.memory_space<any>> -> memref<1x16x128xf32, #tpu.memory_space<any>>
    %c6_i32_297 = arith.constant 6 : i32
    %c0_i32_298 = arith.constant 0 : i32
    %c0_i32_299 = arith.constant 0 : i32
    %256 = tpu.memref_slice %arg15[%c6_i32_297, %c0_i32_298, %c0_i32_299] : memref<8x16x128xf32, #tpu.memory_space<vmem>> -> memref<1x16x128xf32, #tpu.memory_space<vmem>>
    %257 = tpu.memref_slice %arg19[%c0_i32_293, %c6_i32_294] : memref<2x8x!tpu.dma_semaphore, #tpu.memory_space<semaphore_mem>> -> memref<1x1x!tpu.dma_semaphore, #tpu.memory_space<semaphore_mem>>
    %258 = tpu.memref_squeeze %257 : memref<1x1x!tpu.dma_semaphore, #tpu.memory_space<semaphore_mem>> -> memref<!tpu.dma_semaphore, #tpu.memory_space<semaphore_mem>>
    tpu.wait_dma2 semaphore(%258 : memref<!tpu.dma_semaphore, #tpu.memory_space<semaphore_mem>>) src(%255 : memref<1x16x128xf32, #tpu.memory_space<any>>) dst(%256 : memref<1x16x128xf32, #tpu.memory_space<vmem>>)
    %c1_i32_300 = arith.constant 1 : i32
    %c6_i32_301 = arith.constant 6 : i32
    %c0_i32_302 = arith.constant 0 : i32
    %c0_i32_303 = arith.constant 0 : i32
    %259 = tpu.memref_slice %arg14[%253, %c0_i32_302, %c0_i32_303] : memref<8x16x128xf32, #tpu.memory_space<any>> -> memref<1x16x128xf32, #tpu.memory_space<any>>
    %c6_i32_304 = arith.constant 6 : i32
    %c0_i32_305 = arith.constant 0 : i32
    %c0_i32_306 = arith.constant 0 : i32
    %260 = tpu.memref_slice %arg16[%c6_i32_304, %c0_i32_305, %c0_i32_306] : memref<8x16x128xf32, #tpu.memory_space<vmem>> -> memref<1x16x128xf32, #tpu.memory_space<vmem>>
    %261 = tpu.memref_slice %arg19[%c1_i32_300, %c6_i32_301] : memref<2x8x!tpu.dma_semaphore, #tpu.memory_space<semaphore_mem>> -> memref<1x1x!tpu.dma_semaphore, #tpu.memory_space<semaphore_mem>>
    %262 = tpu.memref_squeeze %261 : memref<1x1x!tpu.dma_semaphore, #tpu.memory_space<semaphore_mem>> -> memref<!tpu.dma_semaphore, #tpu.memory_space<semaphore_mem>>
    tpu.wait_dma2 semaphore(%262 : memref<!tpu.dma_semaphore, #tpu.memory_space<semaphore_mem>>) src(%259 : memref<1x16x128xf32, #tpu.memory_space<any>>) dst(%260 : memref<1x16x128xf32, #tpu.memory_space<vmem>>)
    %263 = vector.extract_strided_slice %83 {offsets = [6, 0], sizes = [1, 128], strides = [1, 1]} : vector<8x128xf32> to vector<1x128xf32>
    %c6_307 = arith.constant 6 : index
    %264 = arith.index_cast %254 : i32 to index
    %c0_308 = arith.constant 0 : index
    %265 = vector.load %arg15[%c6_307, %264, %c0_308] : memref<8x16x128xf32, #tpu.memory_space<vmem>>, vector<1x1x128xf32>
    %266 = vector.shape_cast %265 : vector<1x1x128xf32> to vector<1x128xf32>
    %267 = vector.shape_cast %263 : vector<1x128xf32> to vector<1x1x128xf32>
    tpu.vector_store %arg15[%c6_307, %264, %c0_308], %267 {strides = array<i32>} : memref<8x16x128xf32, #tpu.memory_space<vmem>>, vector<1x1x128xf32>,
    %268 = vector.extract_strided_slice %84 {offsets = [6, 0], sizes = [1, 128], strides = [1, 1]} : vector<8x128xf32> to vector<1x128xf32>
    %c6_309 = arith.constant 6 : index
    %269 = arith.index_cast %254 : i32 to index
    %c0_310 = arith.constant 0 : index
    %270 = vector.load %arg16[%c6_309, %269, %c0_310] : memref<8x16x128xf32, #tpu.memory_space<vmem>>, vector<1x1x128xf32>
    %271 = vector.shape_cast %270 : vector<1x1x128xf32> to vector<1x128xf32>
    %272 = vector.shape_cast %268 : vector<1x128xf32> to vector<1x1x128xf32>
    tpu.vector_store %arg16[%c6_309, %269, %c0_310], %272 {strides = array<i32>} : memref<8x16x128xf32, #tpu.memory_space<vmem>>, vector<1x1x128xf32>,
    %c0_i32_311 = arith.constant 0 : i32
    %c6_i32_312 = arith.constant 6 : i32
    %c6_i32_313 = arith.constant 6 : i32
    %c0_i32_314 = arith.constant 0 : i32
    %273 = tpu.memref_slice %arg15[%c6_i32_313, %254, %c0_i32_314] : memref<8x16x128xf32, #tpu.memory_space<vmem>> -> memref<1x1x128xf32, #tpu.memory_space<vmem>>
    %c0_i32_315 = arith.constant 0 : i32
    %274 = tpu.memref_slice %arg13[%253, %254, %c0_i32_315] : memref<8x16x128xf32, #tpu.memory_space<any>> -> memref<1x1x128xf32, #tpu.memory_space<any>>
    %275 = tpu.memref_slice %arg20[%c0_i32_311, %c6_i32_312] : memref<2x8x!tpu.dma_semaphore, #tpu.memory_space<semaphore_mem>> -> memref<1x1x!tpu.dma_semaphore, #tpu.memory_space<semaphore_mem>>
    %276 = tpu.memref_squeeze %275 : memref<1x1x!tpu.dma_semaphore, #tpu.memory_space<semaphore_mem>> -> memref<!tpu.dma_semaphore, #tpu.memory_space<semaphore_mem>>
    tpu.enqueue_dma source(%273 : memref<1x1x128xf32, #tpu.memory_space<vmem>>) target(%274 : memref<1x1x128xf32, #tpu.memory_space<any>>) target_semaphore(%276 : memref<!tpu.dma_semaphore, #tpu.memory_space<semaphore_mem>>)
    %c1_i32_316 = arith.constant 1 : i32
    %c6_i32_317 = arith.constant 6 : i32
    %c6_i32_318 = arith.constant 6 : i32
    %c0_i32_319 = arith.constant 0 : i32
    %277 = tpu.memref_slice %arg16[%c6_i32_318, %254, %c0_i32_319] : memref<8x16x128xf32, #tpu.memory_space<vmem>> -> memref<1x1x128xf32, #tpu.memory_space<vmem>>
    %c0_i32_320 = arith.constant 0 : i32
    %278 = tpu.memref_slice %arg14[%253, %254, %c0_i32_320] : memref<8x16x128xf32, #tpu.memory_space<any>> -> memref<1x1x128xf32, #tpu.memory_space<any>>
    %279 = tpu.memref_slice %arg20[%c1_i32_316, %c6_i32_317] : memref<2x8x!tpu.dma_semaphore, #tpu.memory_space<semaphore_mem>> -> memref<1x1x!tpu.dma_semaphore, #tpu.memory_space<semaphore_mem>>
    %280 = tpu.memref_squeeze %279 : memref<1x1x!tpu.dma_semaphore, #tpu.memory_space<semaphore_mem>> -> memref<!tpu.dma_semaphore, #tpu.memory_space<semaphore_mem>>
    tpu.enqueue_dma source(%277 : memref<1x1x128xf32, #tpu.memory_space<vmem>>) target(%278 : memref<1x1x128xf32, #tpu.memory_space<any>>) target_semaphore(%280 : memref<!tpu.dma_semaphore, #tpu.memory_space<semaphore_mem>>)
    %c7_321 = arith.constant 7 : index
    %281 = memref.load %arg2[%c7_321] : memref<8xi32, #tpu.memory_space<smem>>
    %c7_322 = arith.constant 7 : index
    %282 = memref.load %arg1[%c7_322] : memref<8xi32, #tpu.memory_space<smem>>
    %c0_i32_323 = arith.constant 0 : i32
    %c7_i32_324 = arith.constant 7 : i32
    %c0_i32_325 = arith.constant 0 : i32
    %c0_i32_326 = arith.constant 0 : i32
    %283 = tpu.memref_slice %arg13[%281, %c0_i32_325, %c0_i32_326] : memref<8x16x128xf32, #tpu.memory_space<any>> -> memref<1x16x128xf32, #tpu.memory_space<any>>
    %c7_i32_327 = arith.constant 7 : i32
    %c0_i32_328 = arith.constant 0 : i32
    %c0_i32_329 = arith.constant 0 : i32
    %284 = tpu.memref_slice %arg15[%c7_i32_327, %c0_i32_328, %c0_i32_329] : memref<8x16x128xf32, #tpu.memory_space<vmem>> -> memref<1x16x128xf32, #tpu.memory_space<vmem>>
    %285 = tpu.memref_slice %arg19[%c0_i32_323, %c7_i32_324] : memref<2x8x!tpu.dma_semaphore, #tpu.memory_space<semaphore_mem>> -> memref<1x1x!tpu.dma_semaphore, #tpu.memory_space<semaphore_mem>>
    %286 = tpu.memref_squeeze %285 : memref<1x1x!tpu.dma_semaphore, #tpu.memory_space<semaphore_mem>> -> memref<!tpu.dma_semaphore, #tpu.memory_space<semaphore_mem>>
    tpu.wait_dma2 semaphore(%286 : memref<!tpu.dma_semaphore, #tpu.memory_space<semaphore_mem>>) src(%283 : memref<1x16x128xf32, #tpu.memory_space<any>>) dst(%284 : memref<1x16x128xf32, #tpu.memory_space<vmem>>)
    %c1_i32_330 = arith.constant 1 : i32
    %c7_i32_331 = arith.constant 7 : i32
    %c0_i32_332 = arith.constant 0 : i32
    %c0_i32_333 = arith.constant 0 : i32
    %287 = tpu.memref_slice %arg14[%281, %c0_i32_332, %c0_i32_333] : memref<8x16x128xf32, #tpu.memory_space<any>> -> memref<1x16x128xf32, #tpu.memory_space<any>>
    %c7_i32_334 = arith.constant 7 : i32
    %c0_i32_335 = arith.constant 0 : i32
    %c0_i32_336 = arith.constant 0 : i32
    %288 = tpu.memref_slice %arg16[%c7_i32_334, %c0_i32_335, %c0_i32_336] : memref<8x16x128xf32, #tpu.memory_space<vmem>> -> memref<1x16x128xf32, #tpu.memory_space<vmem>>
    %289 = tpu.memref_slice %arg19[%c1_i32_330, %c7_i32_331] : memref<2x8x!tpu.dma_semaphore, #tpu.memory_space<semaphore_mem>> -> memref<1x1x!tpu.dma_semaphore, #tpu.memory_space<semaphore_mem>>
    %290 = tpu.memref_squeeze %289 : memref<1x1x!tpu.dma_semaphore, #tpu.memory_space<semaphore_mem>> -> memref<!tpu.dma_semaphore, #tpu.memory_space<semaphore_mem>>
    tpu.wait_dma2 semaphore(%290 : memref<!tpu.dma_semaphore, #tpu.memory_space<semaphore_mem>>) src(%287 : memref<1x16x128xf32, #tpu.memory_space<any>>) dst(%288 : memref<1x16x128xf32, #tpu.memory_space<vmem>>)
    %291 = vector.extract_strided_slice %83 {offsets = [7, 0], sizes = [1, 128], strides = [1, 1]} : vector<8x128xf32> to vector<1x128xf32>
    %c7_337 = arith.constant 7 : index
    %292 = arith.index_cast %282 : i32 to index
    %c0_338 = arith.constant 0 : index
    %293 = vector.load %arg15[%c7_337, %292, %c0_338] : memref<8x16x128xf32, #tpu.memory_space<vmem>>, vector<1x1x128xf32>
    %294 = vector.shape_cast %293 : vector<1x1x128xf32> to vector<1x128xf32>
    %295 = vector.shape_cast %291 : vector<1x128xf32> to vector<1x1x128xf32>
    tpu.vector_store %arg15[%c7_337, %292, %c0_338], %295 {strides = array<i32>} : memref<8x16x128xf32, #tpu.memory_space<vmem>>, vector<1x1x128xf32>,
    %296 = vector.extract_strided_slice %84 {offsets = [7, 0], sizes = [1, 128], strides = [1, 1]} : vector<8x128xf32> to vector<1x128xf32>
    %c7_339 = arith.constant 7 : index
    %297 = arith.index_cast %282 : i32 to index
    %c0_340 = arith.constant 0 : index
    %298 = vector.load %arg16[%c7_339, %297, %c0_340] : memref<8x16x128xf32, #tpu.memory_space<vmem>>, vector<1x1x128xf32>
    %299 = vector.shape_cast %298 : vector<1x1x128xf32> to vector<1x128xf32>
    %300 = vector.shape_cast %296 : vector<1x128xf32> to vector<1x1x128xf32>
    tpu.vector_store %arg16[%c7_339, %297, %c0_340], %300 {strides = array<i32>} : memref<8x16x128xf32, #tpu.memory_space<vmem>>, vector<1x1x128xf32>,
    %c0_i32_341 = arith.constant 0 : i32
    %c7_i32_342 = arith.constant 7 : i32
    %c7_i32_343 = arith.constant 7 : i32
    %c0_i32_344 = arith.constant 0 : i32
    %301 = tpu.memref_slice %arg15[%c7_i32_343, %282, %c0_i32_344] : memref<8x16x128xf32, #tpu.memory_space<vmem>> -> memref<1x1x128xf32, #tpu.memory_space<vmem>>
    %c0_i32_345 = arith.constant 0 : i32
    %302 = tpu.memref_slice %arg13[%281, %282, %c0_i32_345] : memref<8x16x128xf32, #tpu.memory_space<any>> -> memref<1x1x128xf32, #tpu.memory_space<any>>
    %303 = tpu.memref_slice %arg20[%c0_i32_341, %c7_i32_342] : memref<2x8x!tpu.dma_semaphore, #tpu.memory_space<semaphore_mem>> -> memref<1x1x!tpu.dma_semaphore, #tpu.memory_space<semaphore_mem>>
    %304 = tpu.memref_squeeze %303 : memref<1x1x!tpu.dma_semaphore, #tpu.memory_space<semaphore_mem>> -> memref<!tpu.dma_semaphore, #tpu.memory_space<semaphore_mem>>
    tpu.enqueue_dma source(%301 : memref<1x1x128xf32, #tpu.memory_space<vmem>>) target(%302 : memref<1x1x128xf32, #tpu.memory_space<any>>) target_semaphore(%304 : memref<!tpu.dma_semaphore, #tpu.memory_space<semaphore_mem>>)
    %c1_i32_346 = arith.constant 1 : i32
    %c7_i32_347 = arith.constant 7 : i32
    %c7_i32_348 = arith.constant 7 : i32
    %c0_i32_349 = arith.constant 0 : i32
    %305 = tpu.memref_slice %arg16[%c7_i32_348, %282, %c0_i32_349] : memref<8x16x128xf32, #tpu.memory_space<vmem>> -> memref<1x1x128xf32, #tpu.memory_space<vmem>>
    %c0_i32_350 = arith.constant 0 : i32
    %306 = tpu.memref_slice %arg14[%281, %282, %c0_i32_350] : memref<8x16x128xf32, #tpu.memory_space<any>> -> memref<1x1x128xf32, #tpu.memory_space<any>>
    %307 = tpu.memref_slice %arg20[%c1_i32_346, %c7_i32_347] : memref<2x8x!tpu.dma_semaphore, #tpu.memory_space<semaphore_mem>> -> memref<1x1x!tpu.dma_semaphore, #tpu.memory_space<semaphore_mem>>
    %308 = tpu.memref_squeeze %307 : memref<1x1x!tpu.dma_semaphore, #tpu.memory_space<semaphore_mem>> -> memref<!tpu.dma_semaphore, #tpu.memory_space<semaphore_mem>>
    tpu.enqueue_dma source(%305 : memref<1x1x128xf32, #tpu.memory_space<vmem>>) target(%306 : memref<1x1x128xf32, #tpu.memory_space<any>>) target_semaphore(%308 : memref<!tpu.dma_semaphore, #tpu.memory_space<semaphore_mem>>)
    %c0_351 = arith.constant 0 : index
    %c0_352 = arith.constant 0 : index
    %c0_353 = arith.constant 0 : index
    %309 = vector.load %arg15[%c0_351, %c0_352, %c0_353] : memref<8x16x128xf32, #tpu.memory_space<vmem>>, vector<8x16x128xf32>
    %310 = vector.shape_cast %82 : vector<8x128xf32> to vector<8x1x128xf32>
    %311 = vector.broadcast %310 : vector<8x1x128xf32> to vector<8x16x128xf32>
    %312 = arith.mulf %309, %311 : vector<8x16x128xf32>
    %313 = vector.shape_cast %312 : vector<8x16x128xf32> to vector<128x128xf32>
    %c0_354 = arith.constant 0 : index
    %c0_355 = arith.constant 0 : index
    %314 = vector.load %arg8[%c0_354, %c0_355] : memref<128x4xf32, #tpu.memory_space<vmem>>, vector<128x4xf32>
    %cst_356 = arith.constant dense<0.000000e+00> : vector<128x4xf32>
    %315 = tpu.matmul %313, %314, %cst_356 {dimension_numbers = #tpu.dot_dimension_numbers<[1], [0], [0], [1], [0, 0, 1, 1], [], []>} : vector<128x128xf32>, vector<128x4xf32>, vector<128x4xf32> -> vector<128x4xf32>
    %316 = vector.shape_cast %315 : vector<128x4xf32> to vector<8x16x4xf32>
    %317 = tpu.iota {dimensions = array<i32: 0>} : vector<16x1xi32>
    %c0_357 = arith.constant 0 : index
    %318 = memref.load %arg3[%c0_357] : memref<8xi32, #tpu.memory_space<smem>>
    %319 = vector.broadcast %318 : i32 to vector<16x1xi32>
    %320 = arith.cmpi slt, %317, %319 : vector<16x1xi32>
    %321 = vector.extract_strided_slice %316 {offsets = [0, 0, 0], sizes = [1, 16, 4], strides = [1, 1, 1]} : vector<8x16x4xf32> to vector<1x16x4xf32>
    %322 = vector.shape_cast %321 : vector<1x16x4xf32> to vector<16x4xf32>
    %cst_358 = arith.constant -1.000000e+30 : f32
    %323 = vector.shape_cast %320 : vector<16x1xi1> to vector<16x1xi1>
    %324 = vector.broadcast %323 : vector<16x1xi1> to vector<16x4xi1>
    %325 = vector.broadcast %cst_358 : f32 to vector<16x4xf32>
    %326 = arith.select %324, %322, %325 : vector<16x4xi1>, vector<16x4xf32>
    %cst_359 = arith.constant dense<0xFF800000> : vector<4xf32>
    %327 = vector.multi_reduction <maximumf>, %326, %cst_359 [0] : vector<16x4xf32> to vector<4xf32>
    %328 = vector.shape_cast %327 : vector<4xf32> to vector<1x4xf32>
    %329 = vector.broadcast %328 : vector<1x4xf32> to vector<16x4xf32>
    %330 = arith.subf %326, %329 : vector<16x4xf32>
    %331 = math.exp %330 : vector<16x4xf32>
    %cst_360 = arith.constant dense<0.000000e+00> : vector<4xf32>
    %332 = vector.multi_reduction <add>, %331, %cst_360 [0] : vector<16x4xf32> to vector<4xf32>
    %333 = vector.shape_cast %332 : vector<4xf32> to vector<1x4xf32>
    %334 = vector.broadcast %333 : vector<1x4xf32> to vector<16x4xf32>
    %335 = arith.divf %331, %334 : vector<16x4xf32>
    %c0_361 = arith.constant 0 : index
    %c0_362 = arith.constant 0 : index
    %336 = vector.load %arg17[%c0_361, %c0_362] : memref<128x4xf32, #tpu.memory_space<vmem>>, vector<16x4xf32>
    tpu.vector_store %arg17[%c0_361, %c0_362], %335 {strides = array<i32>} : memref<128x4xf32, #tpu.memory_space<vmem>>, vector<16x4xf32>,
    %c1_363 = arith.constant 1 : index
    %337 = memref.load %arg3[%c1_363] : memref<8xi32, #tpu.memory_space<smem>>
    %338 = vector.broadcast %337 : i32 to vector<16x1xi32>
    %339 = arith.cmpi slt, %317, %338 : vector<16x1xi32>
    %340 = vector.extract_strided_slice %316 {offsets = [1, 0, 0], sizes = [1, 16, 4], strides = [1, 1, 1]} : vector<8x16x4xf32> to vector<1x16x4xf32>
    %341 = vector.shape_cast %340 : vector<1x16x4xf32> to vector<16x4xf32>
    %cst_364 = arith.constant -1.000000e+30 : f32
    %342 = vector.shape_cast %339 : vector<16x1xi1> to vector<16x1xi1>
    %343 = vector.broadcast %342 : vector<16x1xi1> to vector<16x4xi1>
    %344 = vector.broadcast %cst_364 : f32 to vector<16x4xf32>
    %345 = arith.select %343, %341, %344 : vector<16x4xi1>, vector<16x4xf32>
    %cst_365 = arith.constant dense<0xFF800000> : vector<4xf32>
    %346 = vector.multi_reduction <maximumf>, %345, %cst_365 [0] : vector<16x4xf32> to vector<4xf32>
    %347 = vector.shape_cast %346 : vector<4xf32> to vector<1x4xf32>
    %348 = vector.broadcast %347 : vector<1x4xf32> to vector<16x4xf32>
    %349 = arith.subf %345, %348 : vector<16x4xf32>
    %350 = math.exp %349 : vector<16x4xf32>
    %cst_366 = arith.constant dense<0.000000e+00> : vector<4xf32>
    %351 = vector.multi_reduction <add>, %350, %cst_366 [0] : vector<16x4xf32> to vector<4xf32>
    %352 = vector.shape_cast %351 : vector<4xf32> to vector<1x4xf32>
    %353 = vector.broadcast %352 : vector<1x4xf32> to vector<16x4xf32>
    %354 = arith.divf %350, %353 : vector<16x4xf32>
    %c16 = arith.constant 16 : index
    %c0_367 = arith.constant 0 : index
    %355 = vector.load %arg17[%c16, %c0_367] : memref<128x4xf32, #tpu.memory_space<vmem>>, vector<16x4xf32>
    tpu.vector_store %arg17[%c16, %c0_367], %354 {strides = array<i32>} : memref<128x4xf32, #tpu.memory_space<vmem>>, vector<16x4xf32>,
    %c2_368 = arith.constant 2 : index
    %356 = memref.load %arg3[%c2_368] : memref<8xi32, #tpu.memory_space<smem>>
    %357 = vector.broadcast %356 : i32 to vector<16x1xi32>
    %358 = arith.cmpi slt, %317, %357 : vector<16x1xi32>
    %359 = vector.extract_strided_slice %316 {offsets = [2, 0, 0], sizes = [1, 16, 4], strides = [1, 1, 1]} : vector<8x16x4xf32> to vector<1x16x4xf32>
    %360 = vector.shape_cast %359 : vector<1x16x4xf32> to vector<16x4xf32>
    %cst_369 = arith.constant -1.000000e+30 : f32
    %361 = vector.shape_cast %358 : vector<16x1xi1> to vector<16x1xi1>
    %362 = vector.broadcast %361 : vector<16x1xi1> to vector<16x4xi1>
    %363 = vector.broadcast %cst_369 : f32 to vector<16x4xf32>
    %364 = arith.select %362, %360, %363 : vector<16x4xi1>, vector<16x4xf32>
    %cst_370 = arith.constant dense<0xFF800000> : vector<4xf32>
    %365 = vector.multi_reduction <maximumf>, %364, %cst_370 [0] : vector<16x4xf32> to vector<4xf32>
    %366 = vector.shape_cast %365 : vector<4xf32> to vector<1x4xf32>
    %367 = vector.broadcast %366 : vector<1x4xf32> to vector<16x4xf32>
    %368 = arith.subf %364, %367 : vector<16x4xf32>
    %369 = math.exp %368 : vector<16x4xf32>
    %cst_371 = arith.constant dense<0.000000e+00> : vector<4xf32>
    %370 = vector.multi_reduction <add>, %369, %cst_371 [0] : vector<16x4xf32> to vector<4xf32>
    %371 = vector.shape_cast %370 : vector<4xf32> to vector<1x4xf32>
    %372 = vector.broadcast %371 : vector<1x4xf32> to vector<16x4xf32>
    %373 = arith.divf %369, %372 : vector<16x4xf32>
    %c32 = arith.constant 32 : index
    %c0_372 = arith.constant 0 : index
    %374 = vector.load %arg17[%c32, %c0_372] : memref<128x4xf32, #tpu.memory_space<vmem>>, vector<16x4xf32>
    tpu.vector_store %arg17[%c32, %c0_372], %373 {strides = array<i32>} : memref<128x4xf32, #tpu.memory_space<vmem>>, vector<16x4xf32>,
    %c3_373 = arith.constant 3 : index
    %375 = memref.load %arg3[%c3_373] : memref<8xi32, #tpu.memory_space<smem>>
    %376 = vector.broadcast %375 : i32 to vector<16x1xi32>
    %377 = arith.cmpi slt, %317, %376 : vector<16x1xi32>
    %378 = vector.extract_strided_slice %316 {offsets = [3, 0, 0], sizes = [1, 16, 4], strides = [1, 1, 1]} : vector<8x16x4xf32> to vector<1x16x4xf32>
    %379 = vector.shape_cast %378 : vector<1x16x4xf32> to vector<16x4xf32>
    %cst_374 = arith.constant -1.000000e+30 : f32
    %380 = vector.shape_cast %377 : vector<16x1xi1> to vector<16x1xi1>
    %381 = vector.broadcast %380 : vector<16x1xi1> to vector<16x4xi1>
    %382 = vector.broadcast %cst_374 : f32 to vector<16x4xf32>
    %383 = arith.select %381, %379, %382 : vector<16x4xi1>, vector<16x4xf32>
    %cst_375 = arith.constant dense<0xFF800000> : vector<4xf32>
    %384 = vector.multi_reduction <maximumf>, %383, %cst_375 [0] : vector<16x4xf32> to vector<4xf32>
    %385 = vector.shape_cast %384 : vector<4xf32> to vector<1x4xf32>
    %386 = vector.broadcast %385 : vector<1x4xf32> to vector<16x4xf32>
    %387 = arith.subf %383, %386 : vector<16x4xf32>
    %388 = math.exp %387 : vector<16x4xf32>
    %cst_376 = arith.constant dense<0.000000e+00> : vector<4xf32>
    %389 = vector.multi_reduction <add>, %388, %cst_376 [0] : vector<16x4xf32> to vector<4xf32>
    %390 = vector.shape_cast %389 : vector<4xf32> to vector<1x4xf32>
    %391 = vector.broadcast %390 : vector<1x4xf32> to vector<16x4xf32>
    %392 = arith.divf %388, %391 : vector<16x4xf32>
    %c48 = arith.constant 48 : index
    %c0_377 = arith.constant 0 : index
    %393 = vector.load %arg17[%c48, %c0_377] : memref<128x4xf32, #tpu.memory_space<vmem>>, vector<16x4xf32>
    tpu.vector_store %arg17[%c48, %c0_377], %392 {strides = array<i32>} : memref<128x4xf32, #tpu.memory_space<vmem>>, vector<16x4xf32>,
    %c4_378 = arith.constant 4 : index
    %394 = memref.load %arg3[%c4_378] : memref<8xi32, #tpu.memory_space<smem>>
    %395 = vector.broadcast %394 : i32 to vector<16x1xi32>
    %396 = arith.cmpi slt, %317, %395 : vector<16x1xi32>
    %397 = vector.extract_strided_slice %316 {offsets = [4, 0, 0], sizes = [1, 16, 4], strides = [1, 1, 1]} : vector<8x16x4xf32> to vector<1x16x4xf32>
    %398 = vector.shape_cast %397 : vector<1x16x4xf32> to vector<16x4xf32>
    %cst_379 = arith.constant -1.000000e+30 : f32
    %399 = vector.shape_cast %396 : vector<16x1xi1> to vector<16x1xi1>
    %400 = vector.broadcast %399 : vector<16x1xi1> to vector<16x4xi1>
    %401 = vector.broadcast %cst_379 : f32 to vector<16x4xf32>
    %402 = arith.select %400, %398, %401 : vector<16x4xi1>, vector<16x4xf32>
    %cst_380 = arith.constant dense<0xFF800000> : vector<4xf32>
    %403 = vector.multi_reduction <maximumf>, %402, %cst_380 [0] : vector<16x4xf32> to vector<4xf32>
    %404 = vector.shape_cast %403 : vector<4xf32> to vector<1x4xf32>
    %405 = vector.broadcast %404 : vector<1x4xf32> to vector<16x4xf32>
    %406 = arith.subf %402, %405 : vector<16x4xf32>
    %407 = math.exp %406 : vector<16x4xf32>
    %cst_381 = arith.constant dense<0.000000e+00> : vector<4xf32>
    %408 = vector.multi_reduction <add>, %407, %cst_381 [0] : vector<16x4xf32> to vector<4xf32>
    %409 = vector.shape_cast %408 : vector<4xf32> to vector<1x4xf32>
    %410 = vector.broadcast %409 : vector<1x4xf32> to vector<16x4xf32>
    %411 = arith.divf %407, %410 : vector<16x4xf32>
    %c64 = arith.constant 64 : index
    %c0_382 = arith.constant 0 : index
    %412 = vector.load %arg17[%c64, %c0_382] : memref<128x4xf32, #tpu.memory_space<vmem>>, vector<16x4xf32>
    tpu.vector_store %arg17[%c64, %c0_382], %411 {strides = array<i32>} : memref<128x4xf32, #tpu.memory_space<vmem>>, vector<16x4xf32>,
    %c5_383 = arith.constant 5 : index
    %413 = memref.load %arg3[%c5_383] : memref<8xi32, #tpu.memory_space<smem>>
    %414 = vector.broadcast %413 : i32 to vector<16x1xi32>
    %415 = arith.cmpi slt, %317, %414 : vector<16x1xi32>
    %416 = vector.extract_strided_slice %316 {offsets = [5, 0, 0], sizes = [1, 16, 4], strides = [1, 1, 1]} : vector<8x16x4xf32> to vector<1x16x4xf32>
    %417 = vector.shape_cast %416 : vector<1x16x4xf32> to vector<16x4xf32>
    %cst_384 = arith.constant -1.000000e+30 : f32
    %418 = vector.shape_cast %415 : vector<16x1xi1> to vector<16x1xi1>
    %419 = vector.broadcast %418 : vector<16x1xi1> to vector<16x4xi1>
    %420 = vector.broadcast %cst_384 : f32 to vector<16x4xf32>
    %421 = arith.select %419, %417, %420 : vector<16x4xi1>, vector<16x4xf32>
    %cst_385 = arith.constant dense<0xFF800000> : vector<4xf32>
    %422 = vector.multi_reduction <maximumf>, %421, %cst_385 [0] : vector<16x4xf32> to vector<4xf32>
    %423 = vector.shape_cast %422 : vector<4xf32> to vector<1x4xf32>
    %424 = vector.broadcast %423 : vector<1x4xf32> to vector<16x4xf32>
    %425 = arith.subf %421, %424 : vector<16x4xf32>
    %426 = math.exp %425 : vector<16x4xf32>
    %cst_386 = arith.constant dense<0.000000e+00> : vector<4xf32>
    %427 = vector.multi_reduction <add>, %426, %cst_386 [0] : vector<16x4xf32> to vector<4xf32>
    %428 = vector.shape_cast %427 : vector<4xf32> to vector<1x4xf32>
    %429 = vector.broadcast %428 : vector<1x4xf32> to vector<16x4xf32>
    %430 = arith.divf %426, %429 : vector<16x4xf32>
    %c80 = arith.constant 80 : index
    %c0_387 = arith.constant 0 : index
    %431 = vector.load %arg17[%c80, %c0_387] : memref<128x4xf32, #tpu.memory_space<vmem>>, vector<16x4xf32>
    tpu.vector_store %arg17[%c80, %c0_387], %430 {strides = array<i32>} : memref<128x4xf32, #tpu.memory_space<vmem>>, vector<16x4xf32>,
    %c6_388 = arith.constant 6 : index
    %432 = memref.load %arg3[%c6_388] : memref<8xi32, #tpu.memory_space<smem>>
    %433 = vector.broadcast %432 : i32 to vector<16x1xi32>
    %434 = arith.cmpi slt, %317, %433 : vector<16x1xi32>
    %435 = vector.extract_strided_slice %316 {offsets = [6, 0, 0], sizes = [1, 16, 4], strides = [1, 1, 1]} : vector<8x16x4xf32> to vector<1x16x4xf32>
    %436 = vector.shape_cast %435 : vector<1x16x4xf32> to vector<16x4xf32>
    %cst_389 = arith.constant -1.000000e+30 : f32
    %437 = vector.shape_cast %434 : vector<16x1xi1> to vector<16x1xi1>
    %438 = vector.broadcast %437 : vector<16x1xi1> to vector<16x4xi1>
    %439 = vector.broadcast %cst_389 : f32 to vector<16x4xf32>
    %440 = arith.select %438, %436, %439 : vector<16x4xi1>, vector<16x4xf32>
    %cst_390 = arith.constant dense<0xFF800000> : vector<4xf32>
    %441 = vector.multi_reduction <maximumf>, %440, %cst_390 [0] : vector<16x4xf32> to vector<4xf32>
    %442 = vector.shape_cast %441 : vector<4xf32> to vector<1x4xf32>
    %443 = vector.broadcast %442 : vector<1x4xf32> to vector<16x4xf32>
    %444 = arith.subf %440, %443 : vector<16x4xf32>
    %445 = math.exp %444 : vector<16x4xf32>
    %cst_391 = arith.constant dense<0.000000e+00> : vector<4xf32>
    %446 = vector.multi_reduction <add>, %445, %cst_391 [0] : vector<16x4xf32> to vector<4xf32>
    %447 = vector.shape_cast %446 : vector<4xf32> to vector<1x4xf32>
    %448 = vector.broadcast %447 : vector<1x4xf32> to vector<16x4xf32>
    %449 = arith.divf %445, %448 : vector<16x4xf32>
    %c96 = arith.constant 96 : index
    %c0_392 = arith.constant 0 : index
    %450 = vector.load %arg17[%c96, %c0_392] : memref<128x4xf32, #tpu.memory_space<vmem>>, vector<16x4xf32>
    tpu.vector_store %arg17[%c96, %c0_392], %449 {strides = array<i32>} : memref<128x4xf32, #tpu.memory_space<vmem>>, vector<16x4xf32>,
    %c7_393 = arith.constant 7 : index
    %451 = memref.load %arg3[%c7_393] : memref<8xi32, #tpu.memory_space<smem>>
    %452 = vector.broadcast %451 : i32 to vector<16x1xi32>
    %453 = arith.cmpi slt, %317, %452 : vector<16x1xi32>
    %454 = vector.extract_strided_slice %316 {offsets = [7, 0, 0], sizes = [1, 16, 4], strides = [1, 1, 1]} : vector<8x16x4xf32> to vector<1x16x4xf32>
    %455 = vector.shape_cast %454 : vector<1x16x4xf32> to vector<16x4xf32>
    %cst_394 = arith.constant -1.000000e+30 : f32
    %456 = vector.shape_cast %453 : vector<16x1xi1> to vector<16x1xi1>
    %457 = vector.broadcast %456 : vector<16x1xi1> to vector<16x4xi1>
    %458 = vector.broadcast %cst_394 : f32 to vector<16x4xf32>
    %459 = arith.select %457, %455, %458 : vector<16x4xi1>, vector<16x4xf32>
    %cst_395 = arith.constant dense<0xFF800000> : vector<4xf32>
    %460 = vector.multi_reduction <maximumf>, %459, %cst_395 [0] : vector<16x4xf32> to vector<4xf32>
    %461 = vector.shape_cast %460 : vector<4xf32> to vector<1x4xf32>
    %462 = vector.broadcast %461 : vector<1x4xf32> to vector<16x4xf32>
    %463 = arith.subf %459, %462 : vector<16x4xf32>
    %464 = math.exp %463 : vector<16x4xf32>
    %cst_396 = arith.constant dense<0.000000e+00> : vector<4xf32>
    %465 = vector.multi_reduction <add>, %464, %cst_396 [0] : vector<16x4xf32> to vector<4xf32>
    %466 = vector.shape_cast %465 : vector<4xf32> to vector<1x4xf32>
    %467 = vector.broadcast %466 : vector<1x4xf32> to vector<16x4xf32>
    %468 = arith.divf %464, %467 : vector<16x4xf32>
    %c112 = arith.constant 112 : index
    %c0_397 = arith.constant 0 : index
    %469 = vector.load %arg17[%c112, %c0_397] : memref<128x4xf32, #tpu.memory_space<vmem>>, vector<16x4xf32>
    tpu.vector_store %arg17[%c112, %c0_397], %468 {strides = array<i32>} : memref<128x4xf32, #tpu.memory_space<vmem>>, vector<16x4xf32>,
    %c0_398 = arith.constant 0 : index
    %c0_399 = arith.constant 0 : index
    %470 = vector.load %arg17[%c0_398, %c0_399] : memref<128x4xf32, #tpu.memory_space<vmem>>, vector<128x4xf32>
    %c0_400 = arith.constant 0 : index
    %c0_401 = arith.constant 0 : index
    %471 = vector.load %arg9[%c0_400, %c0_401] : memref<4x128xf32, #tpu.memory_space<vmem>>, vector<4x128xf32>
    %cst_402 = arith.constant dense<0.000000e+00> : vector<128x128xf32>
    %472 = tpu.matmul %470, %471, %cst_402 {dimension_numbers = #tpu.dot_dimension_numbers<[1], [0], [0], [1], [0, 0, 1, 1], [], []>} : vector<128x4xf32>, vector<4x128xf32>, vector<128x128xf32> -> vector<128x128xf32>
    %473 = vector.shape_cast %472 : vector<128x128xf32> to vector<8x16x128xf32>
    %474 = vector.extract_strided_slice %473 {offsets = [0, 0, 0], sizes = [1, 16, 128], strides = [1, 1, 1]} : vector<8x16x128xf32> to vector<1x16x128xf32>
    %475 = vector.shape_cast %474 : vector<1x16x128xf32> to vector<16x128xf32>
    %c0_403 = arith.constant 0 : index
    %c0_404 = arith.constant 0 : index
    %c0_405 = arith.constant 0 : index
    %476 = vector.load %arg16[%c0_403, %c0_404, %c0_405] : memref<8x16x128xf32, #tpu.memory_space<vmem>>, vector<1x16x128xf32>
    %477 = vector.shape_cast %476 : vector<1x16x128xf32> to vector<16x128xf32>
    %478 = arith.mulf %475, %477 : vector<16x128xf32>
    %cst_406 = arith.constant dense<0.000000e+00> : vector<128xf32>
    %479 = vector.multi_reduction <add>, %478, %cst_406 [0] : vector<16x128xf32> to vector<128xf32>
    %480 = vector.shape_cast %479 : vector<128xf32> to vector<1x128xf32>
    %c0_407 = arith.constant 0 : index
    %c0_408 = arith.constant 0 : index
    %481 = vector.load %arg18[%c0_407, %c0_408] : memref<8x128xf32, #tpu.memory_space<vmem>>, vector<1x128xf32>
    tpu.vector_store %arg18[%c0_407, %c0_408], %480 {strides = array<i32>} : memref<8x128xf32, #tpu.memory_space<vmem>>, vector<1x128xf32>,
    %482 = vector.extract_strided_slice %473 {offsets = [1, 0, 0], sizes = [1, 16, 128], strides = [1, 1, 1]} : vector<8x16x128xf32> to vector<1x16x128xf32>
    %483 = vector.shape_cast %482 : vector<1x16x128xf32> to vector<16x128xf32>
    %c1_409 = arith.constant 1 : index
    %c0_410 = arith.constant 0 : index
    %c0_411 = arith.constant 0 : index
    %484 = vector.load %arg16[%c1_409, %c0_410, %c0_411] : memref<8x16x128xf32, #tpu.memory_space<vmem>>, vector<1x16x128xf32>
    %485 = vector.shape_cast %484 : vector<1x16x128xf32> to vector<16x128xf32>
    %486 = arith.mulf %483, %485 : vector<16x128xf32>
    %cst_412 = arith.constant dense<0.000000e+00> : vector<128xf32>
    %487 = vector.multi_reduction <add>, %486, %cst_412 [0] : vector<16x128xf32> to vector<128xf32>
    %488 = vector.shape_cast %487 : vector<128xf32> to vector<1x128xf32>
    %c1_413 = arith.constant 1 : index
    %c0_414 = arith.constant 0 : index
    %489 = vector.load %arg18[%c1_413, %c0_414] : memref<8x128xf32, #tpu.memory_space<vmem>>, vector<1x128xf32>
    tpu.vector_store %arg18[%c1_413, %c0_414], %488 {strides = array<i32>} : memref<8x128xf32, #tpu.memory_space<vmem>>, vector<1x128xf32>,
    %490 = vector.extract_strided_slice %473 {offsets = [2, 0, 0], sizes = [1, 16, 128], strides = [1, 1, 1]} : vector<8x16x128xf32> to vector<1x16x128xf32>
    %491 = vector.shape_cast %490 : vector<1x16x128xf32> to vector<16x128xf32>
    %c2_415 = arith.constant 2 : index
    %c0_416 = arith.constant 0 : index
    %c0_417 = arith.constant 0 : index
    %492 = vector.load %arg16[%c2_415, %c0_416, %c0_417] : memref<8x16x128xf32, #tpu.memory_space<vmem>>, vector<1x16x128xf32>
    %493 = vector.shape_cast %492 : vector<1x16x128xf32> to vector<16x128xf32>
    %494 = arith.mulf %491, %493 : vector<16x128xf32>
    %cst_418 = arith.constant dense<0.000000e+00> : vector<128xf32>
    %495 = vector.multi_reduction <add>, %494, %cst_418 [0] : vector<16x128xf32> to vector<128xf32>
    %496 = vector.shape_cast %495 : vector<128xf32> to vector<1x128xf32>
    %c2_419 = arith.constant 2 : index
    %c0_420 = arith.constant 0 : index
    %497 = vector.load %arg18[%c2_419, %c0_420] : memref<8x128xf32, #tpu.memory_space<vmem>>, vector<1x128xf32>
    tpu.vector_store %arg18[%c2_419, %c0_420], %496 {strides = array<i32>} : memref<8x128xf32, #tpu.memory_space<vmem>>, vector<1x128xf32>,
    %498 = vector.extract_strided_slice %473 {offsets = [3, 0, 0], sizes = [1, 16, 128], strides = [1, 1, 1]} : vector<8x16x128xf32> to vector<1x16x128xf32>
    %499 = vector.shape_cast %498 : vector<1x16x128xf32> to vector<16x128xf32>
    %c3_421 = arith.constant 3 : index
    %c0_422 = arith.constant 0 : index
    %c0_423 = arith.constant 0 : index
    %500 = vector.load %arg16[%c3_421, %c0_422, %c0_423] : memref<8x16x128xf32, #tpu.memory_space<vmem>>, vector<1x16x128xf32>
    %501 = vector.shape_cast %500 : vector<1x16x128xf32> to vector<16x128xf32>
    %502 = arith.mulf %499, %501 : vector<16x128xf32>
    %cst_424 = arith.constant dense<0.000000e+00> : vector<128xf32>
    %503 = vector.multi_reduction <add>, %502, %cst_424 [0] : vector<16x128xf32> to vector<128xf32>
    %504 = vector.shape_cast %503 : vector<128xf32> to vector<1x128xf32>
    %c3_425 = arith.constant 3 : index
    %c0_426 = arith.constant 0 : index
    %505 = vector.load %arg18[%c3_425, %c0_426] : memref<8x128xf32, #tpu.memory_space<vmem>>, vector<1x128xf32>
    tpu.vector_store %arg18[%c3_425, %c0_426], %504 {strides = array<i32>} : memref<8x128xf32, #tpu.memory_space<vmem>>, vector<1x128xf32>,
    %506 = vector.extract_strided_slice %473 {offsets = [4, 0, 0], sizes = [1, 16, 128], strides = [1, 1, 1]} : vector<8x16x128xf32> to vector<1x16x128xf32>
    %507 = vector.shape_cast %506 : vector<1x16x128xf32> to vector<16x128xf32>
    %c4_427 = arith.constant 4 : index
    %c0_428 = arith.constant 0 : index
    %c0_429 = arith.constant 0 : index
    %508 = vector.load %arg16[%c4_427, %c0_428, %c0_429] : memref<8x16x128xf32, #tpu.memory_space<vmem>>, vector<1x16x128xf32>
    %509 = vector.shape_cast %508 : vector<1x16x128xf32> to vector<16x128xf32>
    %510 = arith.mulf %507, %509 : vector<16x128xf32>
    %cst_430 = arith.constant dense<0.000000e+00> : vector<128xf32>
    %511 = vector.multi_reduction <add>, %510, %cst_430 [0] : vector<16x128xf32> to vector<128xf32>
    %512 = vector.shape_cast %511 : vector<128xf32> to vector<1x128xf32>
    %c4_431 = arith.constant 4 : index
    %c0_432 = arith.constant 0 : index
    %513 = vector.load %arg18[%c4_431, %c0_432] : memref<8x128xf32, #tpu.memory_space<vmem>>, vector<1x128xf32>
    tpu.vector_store %arg18[%c4_431, %c0_432], %512 {strides = array<i32>} : memref<8x128xf32, #tpu.memory_space<vmem>>, vector<1x128xf32>,
    %514 = vector.extract_strided_slice %473 {offsets = [5, 0, 0], sizes = [1, 16, 128], strides = [1, 1, 1]} : vector<8x16x128xf32> to vector<1x16x128xf32>
    %515 = vector.shape_cast %514 : vector<1x16x128xf32> to vector<16x128xf32>
    %c5_433 = arith.constant 5 : index
    %c0_434 = arith.constant 0 : index
    %c0_435 = arith.constant 0 : index
    %516 = vector.load %arg16[%c5_433, %c0_434, %c0_435] : memref<8x16x128xf32, #tpu.memory_space<vmem>>, vector<1x16x128xf32>
    %517 = vector.shape_cast %516 : vector<1x16x128xf32> to vector<16x128xf32>
    %518 = arith.mulf %515, %517 : vector<16x128xf32>
    %cst_436 = arith.constant dense<0.000000e+00> : vector<128xf32>
    %519 = vector.multi_reduction <add>, %518, %cst_436 [0] : vector<16x128xf32> to vector<128xf32>
    %520 = vector.shape_cast %519 : vector<128xf32> to vector<1x128xf32>
    %c5_437 = arith.constant 5 : index
    %c0_438 = arith.constant 0 : index
    %521 = vector.load %arg18[%c5_437, %c0_438] : memref<8x128xf32, #tpu.memory_space<vmem>>, vector<1x128xf32>
    tpu.vector_store %arg18[%c5_437, %c0_438], %520 {strides = array<i32>} : memref<8x128xf32, #tpu.memory_space<vmem>>, vector<1x128xf32>,
    %522 = vector.extract_strided_slice %473 {offsets = [6, 0, 0], sizes = [1, 16, 128], strides = [1, 1, 1]} : vector<8x16x128xf32> to vector<1x16x128xf32>
    %523 = vector.shape_cast %522 : vector<1x16x128xf32> to vector<16x128xf32>
    %c6_439 = arith.constant 6 : index
    %c0_440 = arith.constant 0 : index
    %c0_441 = arith.constant 0 : index
    %524 = vector.load %arg16[%c6_439, %c0_440, %c0_441] : memref<8x16x128xf32, #tpu.memory_space<vmem>>, vector<1x16x128xf32>
    %525 = vector.shape_cast %524 : vector<1x16x128xf32> to vector<16x128xf32>
    %526 = arith.mulf %523, %525 : vector<16x128xf32>
    %cst_442 = arith.constant dense<0.000000e+00> : vector<128xf32>
    %527 = vector.multi_reduction <add>, %526, %cst_442 [0] : vector<16x128xf32> to vector<128xf32>
    %528 = vector.shape_cast %527 : vector<128xf32> to vector<1x128xf32>
    %c6_443 = arith.constant 6 : index
    %c0_444 = arith.constant 0 : index
    %529 = vector.load %arg18[%c6_443, %c0_444] : memref<8x128xf32, #tpu.memory_space<vmem>>, vector<1x128xf32>
    tpu.vector_store %arg18[%c6_443, %c0_444], %528 {strides = array<i32>} : memref<8x128xf32, #tpu.memory_space<vmem>>, vector<1x128xf32>,
    %530 = vector.extract_strided_slice %473 {offsets = [7, 0, 0], sizes = [1, 16, 128], strides = [1, 1, 1]} : vector<8x16x128xf32> to vector<1x16x128xf32>
    %531 = vector.shape_cast %530 : vector<1x16x128xf32> to vector<16x128xf32>
    %c7_445 = arith.constant 7 : index
    %c0_446 = arith.constant 0 : index
    %c0_447 = arith.constant 0 : index
    %532 = vector.load %arg16[%c7_445, %c0_446, %c0_447] : memref<8x16x128xf32, #tpu.memory_space<vmem>>, vector<1x16x128xf32>
    %533 = vector.shape_cast %532 : vector<1x16x128xf32> to vector<16x128xf32>
    %534 = arith.mulf %531, %533 : vector<16x128xf32>
    %cst_448 = arith.constant dense<0.000000e+00> : vector<128xf32>
    %535 = vector.multi_reduction <add>, %534, %cst_448 [0] : vector<16x128xf32> to vector<128xf32>
    %536 = vector.shape_cast %535 : vector<128xf32> to vector<1x128xf32>
    %c7_449 = arith.constant 7 : index
    %c0_450 = arith.constant 0 : index
    %537 = vector.load %arg18[%c7_449, %c0_450] : memref<8x128xf32, #tpu.memory_space<vmem>>, vector<1x128xf32>
    tpu.vector_store %arg18[%c7_449, %c0_450], %536 {strides = array<i32>} : memref<8x128xf32, #tpu.memory_space<vmem>>, vector<1x128xf32>,
    %c0_451 = arith.constant 0 : index
    %c0_452 = arith.constant 0 : index
    %538 = vector.load %arg18[%c0_451, %c0_452] : memref<8x128xf32, #tpu.memory_space<vmem>>, vector<8x128xf32>
    %c0_453 = arith.constant 0 : index
    %c0_454 = arith.constant 0 : index
    %539 = vector.load %arg7[%c0_453, %c0_454] : memref<128x128xf32, #tpu.memory_space<vmem>>, vector<128x128xf32>
    %cst_455 = arith.constant dense<0.000000e+00> : vector<8x128xf32>
    %540 = tpu.matmul %538, %539, %cst_455 {dimension_numbers = #tpu.dot_dimension_numbers<[1], [0], [0], [1], [0, 0, 1, 1], [], []>} : vector<8x128xf32>, vector<128x128xf32>, vector<8x128xf32> -> vector<8x128xf32>
    %c0_456 = arith.constant 0 : index
    %c0_457 = arith.constant 0 : index
    %541 = vector.load %arg12[%c0_456, %c0_457] : memref<8x128xf32, #tpu.memory_space<vmem>>, vector<8x128xf32>
    tpu.vector_store %arg12[%c0_456, %c0_457], %540 {strides = array<i32>} : memref<8x128xf32, #tpu.memory_space<vmem>>, vector<8x128xf32>,
    %c0_458 = arith.constant 0 : index
    %542 = memref.load %arg2[%c0_458] : memref<8xi32, #tpu.memory_space<smem>>
    %c0_459 = arith.constant 0 : index
    %543 = memref.load %arg1[%c0_459] : memref<8xi32, #tpu.memory_space<smem>>
    %c0_i32_460 = arith.constant 0 : i32
    %c0_i32_461 = arith.constant 0 : i32
    %c0_i32_462 = arith.constant 0 : i32
    %c0_i32_463 = arith.constant 0 : i32
    %544 = tpu.memref_slice %arg15[%c0_i32_462, %543, %c0_i32_463] : memref<8x16x128xf32, #tpu.memory_space<vmem>> -> memref<1x1x128xf32, #tpu.memory_space<vmem>>
    %c0_i32_464 = arith.constant 0 : i32
    %545 = tpu.memref_slice %arg13[%542, %543, %c0_i32_464] : memref<8x16x128xf32, #tpu.memory_space<any>> -> memref<1x1x128xf32, #tpu.memory_space<any>>
    %546 = tpu.memref_slice %arg20[%c0_i32_460, %c0_i32_461] : memref<2x8x!tpu.dma_semaphore, #tpu.memory_space<semaphore_mem>> -> memref<1x1x!tpu.dma_semaphore, #tpu.memory_space<semaphore_mem>>
    %547 = tpu.memref_squeeze %546 : memref<1x1x!tpu.dma_semaphore, #tpu.memory_space<semaphore_mem>> -> memref<!tpu.dma_semaphore, #tpu.memory_space<semaphore_mem>>
    tpu.wait_dma2 semaphore(%547 : memref<!tpu.dma_semaphore, #tpu.memory_space<semaphore_mem>>) src(%544 : memref<1x1x128xf32, #tpu.memory_space<vmem>>) dst(%545 : memref<1x1x128xf32, #tpu.memory_space<any>>)
    %c1_i32_465 = arith.constant 1 : i32
    %c0_i32_466 = arith.constant 0 : i32
    %c0_i32_467 = arith.constant 0 : i32
    %c0_i32_468 = arith.constant 0 : i32
    %548 = tpu.memref_slice %arg16[%c0_i32_467, %543, %c0_i32_468] : memref<8x16x128xf32, #tpu.memory_space<vmem>> -> memref<1x1x128xf32, #tpu.memory_space<vmem>>
    %c0_i32_469 = arith.constant 0 : i32
    %549 = tpu.memref_slice %arg14[%542, %543, %c0_i32_469] : memref<8x16x128xf32, #tpu.memory_space<any>> -> memref<1x1x128xf32, #tpu.memory_space<any>>
    %550 = tpu.memref_slice %arg20[%c1_i32_465, %c0_i32_466] : memref<2x8x!tpu.dma_semaphore, #tpu.memory_space<semaphore_mem>> -> memref<1x1x!tpu.dma_semaphore, #tpu.memory_space<semaphore_mem>>
    %551 = tpu.memref_squeeze %550 : memref<1x1x!tpu.dma_semaphore, #tpu.memory_space<semaphore_mem>> -> memref<!tpu.dma_semaphore, #tpu.memory_space<semaphore_mem>>
    tpu.wait_dma2 semaphore(%551 : memref<!tpu.dma_semaphore, #tpu.memory_space<semaphore_mem>>) src(%548 : memref<1x1x128xf32, #tpu.memory_space<vmem>>) dst(%549 : memref<1x1x128xf32, #tpu.memory_space<any>>)
    %c1_470 = arith.constant 1 : index
    %552 = memref.load %arg2[%c1_470] : memref<8xi32, #tpu.memory_space<smem>>
    %c1_471 = arith.constant 1 : index
    %553 = memref.load %arg1[%c1_471] : memref<8xi32, #tpu.memory_space<smem>>
    %c0_i32_472 = arith.constant 0 : i32
    %c1_i32_473 = arith.constant 1 : i32
    %c1_i32_474 = arith.constant 1 : i32
    %c0_i32_475 = arith.constant 0 : i32
    %554 = tpu.memref_slice %arg15[%c1_i32_474, %553, %c0_i32_475] : memref<8x16x128xf32, #tpu.memory_space<vmem>> -> memref<1x1x128xf32, #tpu.memory_space<vmem>>
    %c0_i32_476 = arith.constant 0 : i32
    %555 = tpu.memref_slice %arg13[%552, %553, %c0_i32_476] : memref<8x16x128xf32, #tpu.memory_space<any>> -> memref<1x1x128xf32, #tpu.memory_space<any>>
    %556 = tpu.memref_slice %arg20[%c0_i32_472, %c1_i32_473] : memref<2x8x!tpu.dma_semaphore, #tpu.memory_space<semaphore_mem>> -> memref<1x1x!tpu.dma_semaphore, #tpu.memory_space<semaphore_mem>>
    %557 = tpu.memref_squeeze %556 : memref<1x1x!tpu.dma_semaphore, #tpu.memory_space<semaphore_mem>> -> memref<!tpu.dma_semaphore, #tpu.memory_space<semaphore_mem>>
    tpu.wait_dma2 semaphore(%557 : memref<!tpu.dma_semaphore, #tpu.memory_space<semaphore_mem>>) src(%554 : memref<1x1x128xf32, #tpu.memory_space<vmem>>) dst(%555 : memref<1x1x128xf32, #tpu.memory_space<any>>)
    %c1_i32_477 = arith.constant 1 : i32
    %c1_i32_478 = arith.constant 1 : i32
    %c1_i32_479 = arith.constant 1 : i32
    %c0_i32_480 = arith.constant 0 : i32
    %558 = tpu.memref_slice %arg16[%c1_i32_479, %553, %c0_i32_480] : memref<8x16x128xf32, #tpu.memory_space<vmem>> -> memref<1x1x128xf32, #tpu.memory_space<vmem>>
    %c0_i32_481 = arith.constant 0 : i32
    %559 = tpu.memref_slice %arg14[%552, %553, %c0_i32_481] : memref<8x16x128xf32, #tpu.memory_space<any>> -> memref<1x1x128xf32, #tpu.memory_space<any>>
    %560 = tpu.memref_slice %arg20[%c1_i32_477, %c1_i32_478] : memref<2x8x!tpu.dma_semaphore, #tpu.memory_space<semaphore_mem>> -> memref<1x1x!tpu.dma_semaphore, #tpu.memory_space<semaphore_mem>>
    %561 = tpu.memref_squeeze %560 : memref<1x1x!tpu.dma_semaphore, #tpu.memory_space<semaphore_mem>> -> memref<!tpu.dma_semaphore, #tpu.memory_space<semaphore_mem>>
    tpu.wait_dma2 semaphore(%561 : memref<!tpu.dma_semaphore, #tpu.memory_space<semaphore_mem>>) src(%558 : memref<1x1x128xf32, #tpu.memory_space<vmem>>) dst(%559 : memref<1x1x128xf32, #tpu.memory_space<any>>)
    %c2_482 = arith.constant 2 : index
    %562 = memref.load %arg2[%c2_482] : memref<8xi32, #tpu.memory_space<smem>>
    %c2_483 = arith.constant 2 : index
    %563 = memref.load %arg1[%c2_483] : memref<8xi32, #tpu.memory_space<smem>>
    %c0_i32_484 = arith.constant 0 : i32
    %c2_i32_485 = arith.constant 2 : i32
    %c2_i32_486 = arith.constant 2 : i32
    %c0_i32_487 = arith.constant 0 : i32
    %564 = tpu.memref_slice %arg15[%c2_i32_486, %563, %c0_i32_487] : memref<8x16x128xf32, #tpu.memory_space<vmem>> -> memref<1x1x128xf32, #tpu.memory_space<vmem>>
    %c0_i32_488 = arith.constant 0 : i32
    %565 = tpu.memref_slice %arg13[%562, %563, %c0_i32_488] : memref<8x16x128xf32, #tpu.memory_space<any>> -> memref<1x1x128xf32, #tpu.memory_space<any>>
    %566 = tpu.memref_slice %arg20[%c0_i32_484, %c2_i32_485] : memref<2x8x!tpu.dma_semaphore, #tpu.memory_space<semaphore_mem>> -> memref<1x1x!tpu.dma_semaphore, #tpu.memory_space<semaphore_mem>>
    %567 = tpu.memref_squeeze %566 : memref<1x1x!tpu.dma_semaphore, #tpu.memory_space<semaphore_mem>> -> memref<!tpu.dma_semaphore, #tpu.memory_space<semaphore_mem>>
    tpu.wait_dma2 semaphore(%567 : memref<!tpu.dma_semaphore, #tpu.memory_space<semaphore_mem>>) src(%564 : memref<1x1x128xf32, #tpu.memory_space<vmem>>) dst(%565 : memref<1x1x128xf32, #tpu.memory_space<any>>)
    %c1_i32_489 = arith.constant 1 : i32
    %c2_i32_490 = arith.constant 2 : i32
    %c2_i32_491 = arith.constant 2 : i32
    %c0_i32_492 = arith.constant 0 : i32
    %568 = tpu.memref_slice %arg16[%c2_i32_491, %563, %c0_i32_492] : memref<8x16x128xf32, #tpu.memory_space<vmem>> -> memref<1x1x128xf32, #tpu.memory_space<vmem>>
    %c0_i32_493 = arith.constant 0 : i32
    %569 = tpu.memref_slice %arg14[%562, %563, %c0_i32_493] : memref<8x16x128xf32, #tpu.memory_space<any>> -> memref<1x1x128xf32, #tpu.memory_space<any>>
    %570 = tpu.memref_slice %arg20[%c1_i32_489, %c2_i32_490] : memref<2x8x!tpu.dma_semaphore, #tpu.memory_space<semaphore_mem>> -> memref<1x1x!tpu.dma_semaphore, #tpu.memory_space<semaphore_mem>>
    %571 = tpu.memref_squeeze %570 : memref<1x1x!tpu.dma_semaphore, #tpu.memory_space<semaphore_mem>> -> memref<!tpu.dma_semaphore, #tpu.memory_space<semaphore_mem>>
    tpu.wait_dma2 semaphore(%571 : memref<!tpu.dma_semaphore, #tpu.memory_space<semaphore_mem>>) src(%568 : memref<1x1x128xf32, #tpu.memory_space<vmem>>) dst(%569 : memref<1x1x128xf32, #tpu.memory_space<any>>)
    %c3_494 = arith.constant 3 : index
    %572 = memref.load %arg2[%c3_494] : memref<8xi32, #tpu.memory_space<smem>>
    %c3_495 = arith.constant 3 : index
    %573 = memref.load %arg1[%c3_495] : memref<8xi32, #tpu.memory_space<smem>>
    %c0_i32_496 = arith.constant 0 : i32
    %c3_i32_497 = arith.constant 3 : i32
    %c3_i32_498 = arith.constant 3 : i32
    %c0_i32_499 = arith.constant 0 : i32
    %574 = tpu.memref_slice %arg15[%c3_i32_498, %573, %c0_i32_499] : memref<8x16x128xf32, #tpu.memory_space<vmem>> -> memref<1x1x128xf32, #tpu.memory_space<vmem>>
    %c0_i32_500 = arith.constant 0 : i32
    %575 = tpu.memref_slice %arg13[%572, %573, %c0_i32_500] : memref<8x16x128xf32, #tpu.memory_space<any>> -> memref<1x1x128xf32, #tpu.memory_space<any>>
    %576 = tpu.memref_slice %arg20[%c0_i32_496, %c3_i32_497] : memref<2x8x!tpu.dma_semaphore, #tpu.memory_space<semaphore_mem>> -> memref<1x1x!tpu.dma_semaphore, #tpu.memory_space<semaphore_mem>>
    %577 = tpu.memref_squeeze %576 : memref<1x1x!tpu.dma_semaphore, #tpu.memory_space<semaphore_mem>> -> memref<!tpu.dma_semaphore, #tpu.memory_space<semaphore_mem>>
    tpu.wait_dma2 semaphore(%577 : memref<!tpu.dma_semaphore, #tpu.memory_space<semaphore_mem>>) src(%574 : memref<1x1x128xf32, #tpu.memory_space<vmem>>) dst(%575 : memref<1x1x128xf32, #tpu.memory_space<any>>)
    %c1_i32_501 = arith.constant 1 : i32
    %c3_i32_502 = arith.constant 3 : i32
    %c3_i32_503 = arith.constant 3 : i32
    %c0_i32_504 = arith.constant 0 : i32
    %578 = tpu.memref_slice %arg16[%c3_i32_503, %573, %c0_i32_504] : memref<8x16x128xf32, #tpu.memory_space<vmem>> -> memref<1x1x128xf32, #tpu.memory_space<vmem>>
    %c0_i32_505 = arith.constant 0 : i32
    %579 = tpu.memref_slice %arg14[%572, %573, %c0_i32_505] : memref<8x16x128xf32, #tpu.memory_space<any>> -> memref<1x1x128xf32, #tpu.memory_space<any>>
    %580 = tpu.memref_slice %arg20[%c1_i32_501, %c3_i32_502] : memref<2x8x!tpu.dma_semaphore, #tpu.memory_space<semaphore_mem>> -> memref<1x1x!tpu.dma_semaphore, #tpu.memory_space<semaphore_mem>>
    %581 = tpu.memref_squeeze %580 : memref<1x1x!tpu.dma_semaphore, #tpu.memory_space<semaphore_mem>> -> memref<!tpu.dma_semaphore, #tpu.memory_space<semaphore_mem>>
    tpu.wait_dma2 semaphore(%581 : memref<!tpu.dma_semaphore, #tpu.memory_space<semaphore_mem>>) src(%578 : memref<1x1x128xf32, #tpu.memory_space<vmem>>) dst(%579 : memref<1x1x128xf32, #tpu.memory_space<any>>)
    %c4_506 = arith.constant 4 : index
    %582 = memref.load %arg2[%c4_506] : memref<8xi32, #tpu.memory_space<smem>>
    %c4_507 = arith.constant 4 : index
    %583 = memref.load %arg1[%c4_507] : memref<8xi32, #tpu.memory_space<smem>>
    %c0_i32_508 = arith.constant 0 : i32
    %c4_i32_509 = arith.constant 4 : i32
    %c4_i32_510 = arith.constant 4 : i32
    %c0_i32_511 = arith.constant 0 : i32
    %584 = tpu.memref_slice %arg15[%c4_i32_510, %583, %c0_i32_511] : memref<8x16x128xf32, #tpu.memory_space<vmem>> -> memref<1x1x128xf32, #tpu.memory_space<vmem>>
    %c0_i32_512 = arith.constant 0 : i32
    %585 = tpu.memref_slice %arg13[%582, %583, %c0_i32_512] : memref<8x16x128xf32, #tpu.memory_space<any>> -> memref<1x1x128xf32, #tpu.memory_space<any>>
    %586 = tpu.memref_slice %arg20[%c0_i32_508, %c4_i32_509] : memref<2x8x!tpu.dma_semaphore, #tpu.memory_space<semaphore_mem>> -> memref<1x1x!tpu.dma_semaphore, #tpu.memory_space<semaphore_mem>>
    %587 = tpu.memref_squeeze %586 : memref<1x1x!tpu.dma_semaphore, #tpu.memory_space<semaphore_mem>> -> memref<!tpu.dma_semaphore, #tpu.memory_space<semaphore_mem>>
    tpu.wait_dma2 semaphore(%587 : memref<!tpu.dma_semaphore, #tpu.memory_space<semaphore_mem>>) src(%584 : memref<1x1x128xf32, #tpu.memory_space<vmem>>) dst(%585 : memref<1x1x128xf32, #tpu.memory_space<any>>)
    %c1_i32_513 = arith.constant 1 : i32
    %c4_i32_514 = arith.constant 4 : i32
    %c4_i32_515 = arith.constant 4 : i32
    %c0_i32_516 = arith.constant 0 : i32
    %588 = tpu.memref_slice %arg16[%c4_i32_515, %583, %c0_i32_516] : memref<8x16x128xf32, #tpu.memory_space<vmem>> -> memref<1x1x128xf32, #tpu.memory_space<vmem>>
    %c0_i32_517 = arith.constant 0 : i32
    %589 = tpu.memref_slice %arg14[%582, %583, %c0_i32_517] : memref<8x16x128xf32, #tpu.memory_space<any>> -> memref<1x1x128xf32, #tpu.memory_space<any>>
    %590 = tpu.memref_slice %arg20[%c1_i32_513, %c4_i32_514] : memref<2x8x!tpu.dma_semaphore, #tpu.memory_space<semaphore_mem>> -> memref<1x1x!tpu.dma_semaphore, #tpu.memory_space<semaphore_mem>>
    %591 = tpu.memref_squeeze %590 : memref<1x1x!tpu.dma_semaphore, #tpu.memory_space<semaphore_mem>> -> memref<!tpu.dma_semaphore, #tpu.memory_space<semaphore_mem>>
    tpu.wait_dma2 semaphore(%591 : memref<!tpu.dma_semaphore, #tpu.memory_space<semaphore_mem>>) src(%588 : memref<1x1x128xf32, #tpu.memory_space<vmem>>) dst(%589 : memref<1x1x128xf32, #tpu.memory_space<any>>)
    %c5_518 = arith.constant 5 : index
    %592 = memref.load %arg2[%c5_518] : memref<8xi32, #tpu.memory_space<smem>>
    %c5_519 = arith.constant 5 : index
    %593 = memref.load %arg1[%c5_519] : memref<8xi32, #tpu.memory_space<smem>>
    %c0_i32_520 = arith.constant 0 : i32
    %c5_i32_521 = arith.constant 5 : i32
    %c5_i32_522 = arith.constant 5 : i32
    %c0_i32_523 = arith.constant 0 : i32
    %594 = tpu.memref_slice %arg15[%c5_i32_522, %593, %c0_i32_523] : memref<8x16x128xf32, #tpu.memory_space<vmem>> -> memref<1x1x128xf32, #tpu.memory_space<vmem>>
    %c0_i32_524 = arith.constant 0 : i32
    %595 = tpu.memref_slice %arg13[%592, %593, %c0_i32_524] : memref<8x16x128xf32, #tpu.memory_space<any>> -> memref<1x1x128xf32, #tpu.memory_space<any>>
    %596 = tpu.memref_slice %arg20[%c0_i32_520, %c5_i32_521] : memref<2x8x!tpu.dma_semaphore, #tpu.memory_space<semaphore_mem>> -> memref<1x1x!tpu.dma_semaphore, #tpu.memory_space<semaphore_mem>>
    %597 = tpu.memref_squeeze %596 : memref<1x1x!tpu.dma_semaphore, #tpu.memory_space<semaphore_mem>> -> memref<!tpu.dma_semaphore, #tpu.memory_space<semaphore_mem>>
    tpu.wait_dma2 semaphore(%597 : memref<!tpu.dma_semaphore, #tpu.memory_space<semaphore_mem>>) src(%594 : memref<1x1x128xf32, #tpu.memory_space<vmem>>) dst(%595 : memref<1x1x128xf32, #tpu.memory_space<any>>)
    %c1_i32_525 = arith.constant 1 : i32
    %c5_i32_526 = arith.constant 5 : i32
    %c5_i32_527 = arith.constant 5 : i32
    %c0_i32_528 = arith.constant 0 : i32
    %598 = tpu.memref_slice %arg16[%c5_i32_527, %593, %c0_i32_528] : memref<8x16x128xf32, #tpu.memory_space<vmem>> -> memref<1x1x128xf32, #tpu.memory_space<vmem>>
    %c0_i32_529 = arith.constant 0 : i32
    %599 = tpu.memref_slice %arg14[%592, %593, %c0_i32_529] : memref<8x16x128xf32, #tpu.memory_space<any>> -> memref<1x1x128xf32, #tpu.memory_space<any>>
    %600 = tpu.memref_slice %arg20[%c1_i32_525, %c5_i32_526] : memref<2x8x!tpu.dma_semaphore, #tpu.memory_space<semaphore_mem>> -> memref<1x1x!tpu.dma_semaphore, #tpu.memory_space<semaphore_mem>>
    %601 = tpu.memref_squeeze %600 : memref<1x1x!tpu.dma_semaphore, #tpu.memory_space<semaphore_mem>> -> memref<!tpu.dma_semaphore, #tpu.memory_space<semaphore_mem>>
    tpu.wait_dma2 semaphore(%601 : memref<!tpu.dma_semaphore, #tpu.memory_space<semaphore_mem>>) src(%598 : memref<1x1x128xf32, #tpu.memory_space<vmem>>) dst(%599 : memref<1x1x128xf32, #tpu.memory_space<any>>)
    %c6_530 = arith.constant 6 : index
    %602 = memref.load %arg2[%c6_530] : memref<8xi32, #tpu.memory_space<smem>>
    %c6_531 = arith.constant 6 : index
    %603 = memref.load %arg1[%c6_531] : memref<8xi32, #tpu.memory_space<smem>>
    %c0_i32_532 = arith.constant 0 : i32
    %c6_i32_533 = arith.constant 6 : i32
    %c6_i32_534 = arith.constant 6 : i32
    %c0_i32_535 = arith.constant 0 : i32
    %604 = tpu.memref_slice %arg15[%c6_i32_534, %603, %c0_i32_535] : memref<8x16x128xf32, #tpu.memory_space<vmem>> -> memref<1x1x128xf32, #tpu.memory_space<vmem>>
    %c0_i32_536 = arith.constant 0 : i32
    %605 = tpu.memref_slice %arg13[%602, %603, %c0_i32_536] : memref<8x16x128xf32, #tpu.memory_space<any>> -> memref<1x1x128xf32, #tpu.memory_space<any>>
    %606 = tpu.memref_slice %arg20[%c0_i32_532, %c6_i32_533] : memref<2x8x!tpu.dma_semaphore, #tpu.memory_space<semaphore_mem>> -> memref<1x1x!tpu.dma_semaphore, #tpu.memory_space<semaphore_mem>>
    %607 = tpu.memref_squeeze %606 : memref<1x1x!tpu.dma_semaphore, #tpu.memory_space<semaphore_mem>> -> memref<!tpu.dma_semaphore, #tpu.memory_space<semaphore_mem>>
    tpu.wait_dma2 semaphore(%607 : memref<!tpu.dma_semaphore, #tpu.memory_space<semaphore_mem>>) src(%604 : memref<1x1x128xf32, #tpu.memory_space<vmem>>) dst(%605 : memref<1x1x128xf32, #tpu.memory_space<any>>)
    %c1_i32_537 = arith.constant 1 : i32
    %c6_i32_538 = arith.constant 6 : i32
    %c6_i32_539 = arith.constant 6 : i32
    %c0_i32_540 = arith.constant 0 : i32
    %608 = tpu.memref_slice %arg16[%c6_i32_539, %603, %c0_i32_540] : memref<8x16x128xf32, #tpu.memory_space<vmem>> -> memref<1x1x128xf32, #tpu.memory_space<vmem>>
    %c0_i32_541 = arith.constant 0 : i32
    %609 = tpu.memref_slice %arg14[%602, %603, %c0_i32_541] : memref<8x16x128xf32, #tpu.memory_space<any>> -> memref<1x1x128xf32, #tpu.memory_space<any>>
    %610 = tpu.memref_slice %arg20[%c1_i32_537, %c6_i32_538] : memref<2x8x!tpu.dma_semaphore, #tpu.memory_space<semaphore_mem>> -> memref<1x1x!tpu.dma_semaphore, #tpu.memory_space<semaphore_mem>>
    %611 = tpu.memref_squeeze %610 : memref<1x1x!tpu.dma_semaphore, #tpu.memory_space<semaphore_mem>> -> memref<!tpu.dma_semaphore, #tpu.memory_space<semaphore_mem>>
    tpu.wait_dma2 semaphore(%611 : memref<!tpu.dma_semaphore, #tpu.memory_space<semaphore_mem>>) src(%608 : memref<1x1x128xf32, #tpu.memory_space<vmem>>) dst(%609 : memref<1x1x128xf32, #tpu.memory_space<any>>)
    %c7_542 = arith.constant 7 : index
    %612 = memref.load %arg2[%c7_542] : memref<8xi32, #tpu.memory_space<smem>>
    %c7_543 = arith.constant 7 : index
    %613 = memref.load %arg1[%c7_543] : memref<8xi32, #tpu.memory_space<smem>>
    %c0_i32_544 = arith.constant 0 : i32
    %c7_i32_545 = arith.constant 7 : i32
    %c7_i32_546 = arith.constant 7 : i32
    %c0_i32_547 = arith.constant 0 : i32
    %614 = tpu.memref_slice %arg15[%c7_i32_546, %613, %c0_i32_547] : memref<8x16x128xf32, #tpu.memory_space<vmem>> -> memref<1x1x128xf32, #tpu.memory_space<vmem>>
    %c0_i32_548 = arith.constant 0 : i32
    %615 = tpu.memref_slice %arg13[%612, %613, %c0_i32_548] : memref<8x16x128xf32, #tpu.memory_space<any>> -> memref<1x1x128xf32, #tpu.memory_space<any>>
    %616 = tpu.memref_slice %arg20[%c0_i32_544, %c7_i32_545] : memref<2x8x!tpu.dma_semaphore, #tpu.memory_space<semaphore_mem>> -> memref<1x1x!tpu.dma_semaphore, #tpu.memory_space<semaphore_mem>>
    %617 = tpu.memref_squeeze %616 : memref<1x1x!tpu.dma_semaphore, #tpu.memory_space<semaphore_mem>> -> memref<!tpu.dma_semaphore, #tpu.memory_space<semaphore_mem>>
    tpu.wait_dma2 semaphore(%617 : memref<!tpu.dma_semaphore, #tpu.memory_space<semaphore_mem>>) src(%614 : memref<1x1x128xf32, #tpu.memory_space<vmem>>) dst(%615 : memref<1x1x128xf32, #tpu.memory_space<any>>)
    %c1_i32_549 = arith.constant 1 : i32
    %c7_i32_550 = arith.constant 7 : i32
    %c7_i32_551 = arith.constant 7 : i32
    %c0_i32_552 = arith.constant 0 : i32
    %618 = tpu.memref_slice %arg16[%c7_i32_551, %613, %c0_i32_552] : memref<8x16x128xf32, #tpu.memory_space<vmem>> -> memref<1x1x128xf32, #tpu.memory_space<vmem>>
    %c0_i32_553 = arith.constant 0 : i32
    %619 = tpu.memref_slice %arg14[%612, %613, %c0_i32_553] : memref<8x16x128xf32, #tpu.memory_space<any>> -> memref<1x1x128xf32, #tpu.memory_space<any>>
    %620 = tpu.memref_slice %arg20[%c1_i32_549, %c7_i32_550] : memref<2x8x!tpu.dma_semaphore, #tpu.memory_space<semaphore_mem>> -> memref<1x1x!tpu.dma_semaphore, #tpu.memory_space<semaphore_mem>>
    %621 = tpu.memref_squeeze %620 : memref<1x1x!tpu.dma_semaphore, #tpu.memory_space<semaphore_mem>> -> memref<!tpu.dma_semaphore, #tpu.memory_space<semaphore_mem>>
    tpu.wait_dma2 semaphore(%621 : memref<!tpu.dma_semaphore, #tpu.memory_space<semaphore_mem>>) src(%618 : memref<1x1x128xf32, #tpu.memory_space<vmem>>) dst(%619 : memref<1x1x128xf32, #tpu.memory_space<any>>)
    return
  }
  func.func @transform_0(%arg0: i32, %arg1: memref<8xi32, #tpu.memory_space<smem>>, %arg2: memref<8xi32, #tpu.memory_space<smem>>, %arg3: memref<8xi32, #tpu.memory_space<smem>>) -> (i32, i32) {
    %c0_i32 = arith.constant 0 : i32
    %c0_i32_0 = arith.constant 0 : i32
    %c0_i32_1 = arith.constant 0 : i32
    return %c0_i32, %c0_i32_0 : i32, i32
  }
  func.func @transform_1(%arg0: i32, %arg1: memref<8xi32, #tpu.memory_space<smem>>, %arg2: memref<8xi32, #tpu.memory_space<smem>>, %arg3: memref<8xi32, #tpu.memory_space<smem>>) -> (i32, i32) {
    %c0_i32 = arith.constant 0 : i32
    %c0_i32_0 = arith.constant 0 : i32
    %c0_i32_1 = arith.constant 0 : i32
    return %c0_i32, %c0_i32_0 : i32, i32
  }
  func.func @transform_2(%arg0: i32, %arg1: memref<8xi32, #tpu.memory_space<smem>>, %arg2: memref<8xi32, #tpu.memory_space<smem>>, %arg3: memref<8xi32, #tpu.memory_space<smem>>) -> (i32, i32) {
    %c0_i32 = arith.constant 0 : i32
    %c0_i32_0 = arith.constant 0 : i32
    %c0_i32_1 = arith.constant 0 : i32
    return %c0_i32, %c0_i32_0 : i32, i32
  }
  func.func @transform_3(%arg0: i32, %arg1: memref<8xi32, #tpu.memory_space<smem>>, %arg2: memref<8xi32, #tpu.memory_space<smem>>, %arg3: memref<8xi32, #tpu.memory_space<smem>>) -> (i32, i32) {
    %c0_i32 = arith.constant 0 : i32
    %c0_i32_0 = arith.constant 0 : i32
    %c0_i32_1 = arith.constant 0 : i32
    return %c0_i32, %c0_i32_0 : i32, i32
  }
  func.func @transform_4(%arg0: i32, %arg1: memref<8xi32, #tpu.memory_space<smem>>, %arg2: memref<8xi32, #tpu.memory_space<smem>>, %arg3: memref<8xi32, #tpu.memory_space<smem>>) -> (i32, i32) {
    %c0_i32 = arith.constant 0 : i32
    %c0_i32_0 = arith.constant 0 : i32
    %c0_i32_1 = arith.constant 0 : i32
    return %c0_i32, %c0_i32_0 : i32, i32
  }
  func.func @transform_5(%arg0: i32, %arg1: memref<8xi32, #tpu.memory_space<smem>>, %arg2: memref<8xi32, #tpu.memory_space<smem>>, %arg3: memref<8xi32, #tpu.memory_space<smem>>) -> (i32, i32) {
    %c0_i32 = arith.constant 0 : i32
    %c0_i32_0 = arith.constant 0 : i32
    %c0_i32_1 = arith.constant 0 : i32
    return %c0_i32, %c0_i32_0 : i32, i32
  }
  func.func @transform_8(%arg0: i32, %arg1: memref<8xi32, #tpu.memory_space<smem>>, %arg2: memref<8xi32, #tpu.memory_space<smem>>, %arg3: memref<8xi32, #tpu.memory_space<smem>>) -> (i32, i32) {
    %c0_i32 = arith.constant 0 : i32
    %c0_i32_0 = arith.constant 0 : i32
    %c0_i32_1 = arith.constant 0 : i32
    return %c0_i32, %c0_i32_0 : i32, i32
  }
}

</mosaic_0001>

<bundles_post_ra>
// kernel: tpu_custom_call.1
= control target key start
LH: loop header
LB: loop body
LE: loop exit
PB: predicated region body
PF: predicated region fallthrough
CT: control target
= control target key end

     0   :  { %s4959_s0 = inlined_call_operand.vmem [shape: s32[8], index: 0, kind: input, shape index: {}]   ;;  %s4960_s3 = inlined_call_operand.vmem [shape: s32[8,1], index: 3, kind: input, shape index: {}]   ;;  %s4961_s4 = inlined_call_operand.vmem [shape: f32[64,128], index: 4, kind: input, shape index: {}]   ;;  %s4962_s5 = inlined_call_operand.vmem [shape: f32[128,384], index: 5, kind: input, shape index: {}]   ;;  %s4963_s6 = inlined_call_operand.vmem [shape: f32[128,128], index: 6, kind: input, shape index: {}]   ;;  %s4964_s7 = inlined_call_operand.vmem [shape: f32[128,4], index: 7, kind: input, shape index: {}]   ;;  %s4965_s8 = inlined_call_operand.vmem [shape: f32[4,128], index: 8, kind: input, shape index: {}]   ;;  %s4966_s9 = inlined_call_operand.hbm [shape: f32[8,16,128], index: 9, kind: input, shape index: {}, may-alias: {9,12}]   ;;  %s4967_s10 = inlined_call_operand.hbm [shape: f32[8,16,128], index: 10, kind: input, shape index: {}, may-alias: {10,13}]   ;;  %s4968_s11 = inlined_call_operand.hbm [shape: f32[8,128], index: 11, kind: output, shape index: {0}]   ;;  %s4969_s12 = inlined_call_operand.hbm [shape: f32[8,16,128], index: 12, kind: output, shape index: {1}, may-alias: {9,12}]   ;;  %s4970_s13 = inlined_call_operand.hbm [shape: f32[8,16,128], index: 13, kind: output, shape index: {2}, may-alias: {10,13}]   ;;  %s4971_s1 = inlined_call_operand.vmem [shape: s32[8], index: 1, kind: input, shape index: {}]   ;;  %s4972_s2 = inlined_call_operand.vmem [shape: s32[8], index: 2, kind: input, shape index: {}]  }
   0x1   :  { %s19_s26 = sshll.u32 %s4959_s0, 4  ;;  %s23_s28 = sshll.u32 %s4971_s1, 4  ;;  %s20_s26 = int_to_ptr.vmem [resolvable:$true] %s19_s26  ;;  %s24_s28 = int_to_ptr.vmem [resolvable:$true] %s23_s28 }
   0x2   :  { %s2809_s29 = scalar_lea.vmem %s20_s26, 16  ;;  %p2814_p1 = scmp.lt.s32.totalorder %s20_s26, %s20_s26 }
   0x3   :  { %p2810_p0 = scmp.ne.s32.totalorder %s20_s26, %s2809_s29  ;;  %p2815_p2 = scmp.lt.s32.totalorder %s2809_s29, %s2809_s29 }
   0x5   :  { %p2816_p3 = por %p2815_p2, %p2814_p1 }
   0x7   :  { %p2817_p4 = pnand %p2816_p3, %p2810_p0 }
   0x9   :  { %2820 = shalt.err (!%p2817_p4)  }
   0xa   :  { %s3637_s30 = smov [#allocation9]   ;;  %s2821_s14 = scalar_lea.vmem %s24_s28, 16 }
   0xb   :  { %22 = dma.vmem_to_smem %s20_s26, 16, %s3637_s30, [#allocation8] }
   0xc   :  { %p2822_p5 = scmp.ne.s32.totalorder %s24_s28, %s2821_s14  ;;  %p2826_p6 = scmp.lt.s32.totalorder %s24_s28, %s24_s28 }
   0xd   :  { %p2827_p7 = scmp.lt.s32.totalorder %s2821_s14, %s2821_s14 }
   0xf   :  { %p2828_p8 = por %p2827_p7, %p2826_p6 }
  0x11   :  { %p2829_p9 = pnand %p2828_p8, %p2822_p5 }
  0x13   :  { %2832 = shalt.err (!%p2829_p9)  }
  0x14   :  { %s3638_s0 = smov [#allocation10]   ;;  %s27_s16 = sshll.u32 %s4972_s2, 4  ;;  %s28_s16 = int_to_ptr.vmem [resolvable:$true] %s27_s16 }
  0x15   :  { %26 = dma.vmem_to_smem %s24_s28, 16, %s3638_s0, [#allocation8] }
  0x16   :  { %s2833_s17 = scalar_lea.vmem %s28_s16, 16  ;;  %p2838_p11 = scmp.lt.s32.totalorder %s28_s16, %s28_s16 }
  0x17   :  { %p2834_p10 = scmp.ne.s32.totalorder %s28_s16, %s2833_s17  ;;  %p2839_p12 = scmp.lt.s32.totalorder %s2833_s17, %s2833_s17 }
  0x19   :  { %p2840_p13 = por %p2839_p12, %p2838_p11 }
  0x1b   :  { %p2841_p0 = pnand %p2840_p13, %p2834_p10 }
  0x1d   :  { %2844 = shalt.err (!%p2841_p0)  }
  0x1e   :  { %s3639_s18 = smov [#allocation11]  }
  0x1f   :  { %30 = dma.vmem_to_smem %s28_s16, 16, %s3639_s18, [#allocation8] }
  0x20   :  { %3569 = dma.done.wait [#allocation8], 48 }
  0x21   :  { %3570 = vsyncadd [#allocation8], 4294967248 }
  0x22   :  { %32 = sfence }
  0x23   :  { %v301_v0 = vld [vmem:[%s4960_s3] sm:$0xff]  ;;  %v315_v1 = vld [vmem:[%s4961_s4 + $0x38] sm:$0xff]  ;;  %v3640_v2 = vmov 0   ;;  %v3641_v3 = vmov 0.0   ;;  %v314_v4 = vld [vmem:[%s4961_s4 + $0x30] sm:$0xff]  ;;  %vm3642_vm0 = vmmov 0  }
  0x24   :  { %2760 = vset.pattern.permute.xlu0 %v3640_v2  ;;  %2565 = vmatprep.subr.mxu0 %v3641_v3  ;;  %v313_v5 = vld [vmem:[%s4961_s4 + $0x28] sm:$0xff]  ;;  %v436_v6 = vld [vmem:[%s4962_s5 + $0x170] sm:$0xff]  ;;  %v433_v8 = vld [vmem:[%s4962_s5 + $0x158] sm:$0xff] }
  0x25   :  { %303 = vperm.xlu0 %2760, %v301_v0   ;;  %2566 = vmatpush3.msra.mxu0 %v315_v1  ;;  %v435_v7 = vld [vmem:[%s4962_s5 + $0x168] sm:$0xff]  ;;  %v432_v9 = vld [vmem:[%s4962_s5 + $0x150] sm:$0xff]  ;;  %v312_v10 = vld [vmem:[%s4961_s4 + $0x20] sm:$0xff] }
  0x26   :  { %2567 = vmatprep.subr.mxu0 %v3641_v3  ;;  %2581 = vmatprep.mubr.msk.f32.mxu0 %vm3642_vm0, %v3641_v3  ;;  %v430_v11 = vld [vmem:[%s4962_s5 + $0x140] sm:$0xff]  ;;  %v429_v12 = vld [vmem:[%s4962_s5 + $0x138] sm:$0xff]  ;;  %v427_v14 = vld [vmem:[%s4962_s5 + $0x128] sm:$0xff] }
  0x27   :  { %2568 = vmatpush3.msra.mxu0 %v314_v4  ;;  %438 = vmatprep.subr.mxu1 %v436_v6  ;;  %v311_v13 = vld [vmem:[%s4961_s4 + $0x18] sm:$0xff] }
  0x28   :  { %2569 = vmatprep.subr.mxu0 %v3641_v3  ;;  %439 = vmatpush1.msra.mxu1 %v435_v7 }
  0x29   :  { %2570 = vmatpush3.msra.mxu0 %v313_v5  ;;  %440 = vmatprep.subr.mxu1 %v433_v8 }
  0x2a   :  { %2571 = vmatprep.subr.mxu0 %v3641_v3  ;;  %441 = vmatpush1.msra.mxu1 %v432_v9 }
  0x2b   :  { %33 = vsyncpa [#allocation13], 0  ;;  %2572 = vmatpush3.msra.mxu0 %v312_v10  ;;  %442 = vmatprep.subr.mxu1 %v430_v11  ;;  %v426_v15 = vld [vmem:[%s4962_s5 + $0x120] sm:$0xff]  ;;  %v310_v16 = vld [vmem:[%s4961_s4 + $0x10] sm:$0xff]  ;;  %v299_v42 = vlaneseq  ;;  %vm316_vm1 = vcmask 523264   ;;  %s3942_s15 = sld [smem:[#allocation10]] }
  0x2c   :  { %2573 = vmatprep.subr.mxu0 %v3641_v3  ;;  %443 = vmatpush1.msra.mxu1 %v429_v12  ;;  %v424_v17 = vld [vmem:[%s4962_s5 + $0x110] sm:$0xff]  ;;  %v423_v18 = vld [vmem:[%s4962_s5 + $0x108] sm:$0xff]  ;;  %v421_v20 = vld [vmem:[%s4962_s5 + $0xf8] sm:$0xff]  ;;  %s3643_s16 = smov [#allocation2]   ;;  %s3644_s18 = smov [#allocation3]  }
  0x2d   :  { %2574 = vmatpush3.msra.mxu0 %v311_v13  ;;  %444 = vmatprep.subr.mxu1 %v427_v14  ;;  %v309_v19 = vld [vmem:[%s4961_s4 + $0x8] sm:$0xff]  ;;  %v420_v21 = vld [vmem:[%s4962_s5 + $0xf0] sm:$0xff]  ;;  %v308_v22 = vld [vmem:[%s4961_s4] sm:$0xff]  ;;  %v300_v43 = vand.u32 127, %v299_v42  ;;  %s57_s17 = sshll.u32 %s3643_s16, 4  ;;  %s71_s19 = sshll.u32 %s3644_s18, 4  ;;  %s3944_s17 = int_to_ptr.vmem [resolvable:$true] %s57_s17  ;;  %s3946_s19 = int_to_ptr.vmem [resolvable:$true] %s71_s19 }
  0x2e   :  { %2575 = vmatprep.subr.mxu0 %v3641_v3  ;;  %445 = vmatpush1.msra.mxu1 %v426_v15  ;;  %v418_v23 = vld [vmem:[%s4962_s5 + $0xe0] sm:$0xff]  ;;  %v417_v24 = vld [vmem:[%s4962_s5 + $0xd8] sm:$0xff]  ;;  %v415_v25 = vld [vmem:[%s4962_s5 + $0xc8] sm:$0xff]  ;;  %s3948_s20 = sld [smem:[#allocation10 + $0x1]]  ;;  %s3645_s4 = smov [#allocation2 + $0x10]  }
  0x2f   :  { %2576 = vmatpush3.msra.mxu0 %v310_v16  ;;  %446 = vmatprep.subr.mxu1 %v424_v17  ;;  %v414_v26 = vld [vmem:[%s4962_s5 + $0xc0] sm:$0xff]  ;;  %v412_v27 = vld [vmem:[%s4962_s5 + $0xb0] sm:$0xff]  ;;  %v411_v28 = vld [vmem:[%s4962_s5 + $0xa8] sm:$0xff]  ;;  %s88_s21 = sshll.u32 %s3645_s4, 4  ;;  %s3646_s22 = smov [#allocation3 + $0x10]   ;;  %s3953_s21 = int_to_ptr.vmem [resolvable:$true] %s88_s21 }
  0x30   :  { %2577 = vmatprep.subr.mxu0 %v3641_v3  ;;  %447 = vmatpush1.msra.mxu1 %v423_v18  ;;  %v409_v29 = vld [vmem:[%s4962_s5 + $0x98] sm:$0xff]  ;;  %v408_v30 = vld [vmem:[%s4962_s5 + $0x90] sm:$0xff]  ;;  %v406_v31 = vld [vmem:[%s4962_s5 + $0x80] sm:$0xff]  ;;  %s3950_s2 = sshll.u32 %s3646_s22, 4  ;;  %s3966_s29 = scalar_lea.hbm %s4969_s12, 2048  ;;  %s4005_s2 = int_to_ptr.vmem [resolvable:$true] %s3950_s2 }
  0x31   :  { %2578 = vmatpush3.msra.mxu0 %v309_v19  ;;  %448 = vmatprep.subr.mxu1 %v421_v20  ;;  %v405_v32 = vld [vmem:[%s4962_s5 + $0x78] sm:$0xff]  ;;  %v403_v33 = vld [vmem:[%s4962_s5 + $0x68] sm:$0xff]  ;;  %v402_v34 = vld [vmem:[%s4962_s5 + $0x60] sm:$0xff] }
  0x32   :  { %2579 = vmatprep.subr.mxu0 %v3641_v3  ;;  %449 = vmatpush1.msra.mxu1 %v420_v21  ;;  %v400_v35 = vld [vmem:[%s4962_s5 + $0x50] sm:$0xff]  ;;  %v399_v36 = vld [vmem:[%s4962_s5 + $0x48] sm:$0xff]  ;;  %v397_v37 = vld [vmem:[%s4962_s5 + $0x38] sm:$0xff] }
  0x33   :  { %2580 = vmatpush3.msra.mxu0 %v308_v22  ;;  %450 = vmatprep.subr.mxu1 %v418_v23  ;;  %v396_v38 = vld [vmem:[%s4962_s5 + $0x30] sm:$0xff]  ;;  %v394_v39 = vld [vmem:[%s4962_s5 + $0x20] sm:$0xff]  ;;  %v393_v40 = vld [vmem:[%s4962_s5 + $0x18] sm:$0xff] }
  0x34   :  { %2584 = vmatprep.subr.mxu0 %v3641_v3  ;;  %451 = vmatpush1.msra.mxu1 %v417_v24  ;;  %v391_v41 = vld [vmem:[%s4962_s5 + $0x8] sm:$0xff]  ;;  %v437_v45 = vld [vmem:[%s4962_s5 + $0x178] sm:$0xff]  ;;  %v434_v47 = vld [vmem:[%s4962_s5 + $0x160] sm:$0xff] }
  0x35   :  { %452 = vmatprep.subr.mxu1 %v415_v25  ;;  %502 = vmatprep.mubr.f32.mxu1 %v3641_v3  ;;  %v431_v48 = vld [vmem:[%s4962_s5 + $0x148] sm:$0xff]  ;;  %v428_v49 = vld [vmem:[%s4962_s5 + $0x130] sm:$0xff]  ;;  %v425_v50 = vld [vmem:[%s4962_s5 + $0x118] sm:$0xff] }
  0x36   :  { %453 = vmatpush1.msra.mxu1 %v414_v26  ;;  %v422_v51 = vld [vmem:[%s4962_s5 + $0x100] sm:$0xff]  ;;  %v419_v52 = vld [vmem:[%s4962_s5 + $0xe8] sm:$0xff]  ;;  %v416_v53 = vld [vmem:[%s4962_s5 + $0xd0] sm:$0xff] }
  0x37   :  { %454 = vmatprep.subr.mxu1 %v412_v27  ;;  %v413_v54 = vld [vmem:[%s4962_s5 + $0xb8] sm:$0xff]  ;;  %v410_v55 = vld [vmem:[%s4962_s5 + $0xa0] sm:$0xff]  ;;  %v407_v56 = vld [vmem:[%s4962_s5 + $0x88] sm:$0xff] }
  0x38   :  { %455 = vmatpush1.msra.mxu1 %v411_v28  ;;  %v404_v57 = vld [vmem:[%s4962_s5 + $0x70] sm:$0xff]  ;;  %v401_v58 = vld [vmem:[%s4962_s5 + $0x58] sm:$0xff]  ;;  %v398_v59 = vld [vmem:[%s4962_s5 + $0x40] sm:$0xff] }
  0x39   :  { %456 = vmatprep.subr.mxu1 %v409_v29  ;;  %v395_v60 = vld [vmem:[%s4962_s5 + $0x28] sm:$0xff]  ;;  %v390_v61 = vld [vmem:[%s4962_s5] sm:$0xff]  ;;  %v392_v62 = vld [vmem:[%s4962_s5 + $0x10] sm:$0xff]  ;;  %s2457_s5 = sshll.u32 %s3942_s15, 8 }
  0x3a   :  { %457 = vmatpush1.msra.mxu1 %v408_v30  ;;  %s49_s25 = scalar_lea.hbm %s4969_s12, %s2457_s5  ;;  %s3961_s26 = scalar_lea.hbm %s4970_s13, %s2457_s5 }
  0x3b   :  { %458 = vmatprep.subr.mxu1 %v406_v31  ;;  %s2845_s10 = scalar_lea.hbm %s49_s25, 256  ;;  %p2848_p2 = scmp.lt.s32.totalorder %s49_s25, %s4969_s12 }
  0x3c   :  { %459 = vmatpush1.msra.mxu1 %v405_v32  ;;  %p2846_p1 = scmp.ne.s32.totalorder %s49_s25, %s2845_s10  ;;  %p2849_p3 = scmp.lt.s32.totalorder %s3966_s29, %s2845_s10 }
  0x3d   :  { %460 = vmatprep.subr.mxu1 %v403_v33 }
  0x3e   :  { %461 = vmatpush1.msra.mxu1 %v402_v34  ;;  %p2850_p4 = por %p2849_p3, %p2848_p2 }
  0x3f   :  { %462 = vmatprep.subr.mxu1 %v400_v35 }
  0x40   :  { %463 = vmatpush1.msra.mxu1 %v399_v36  ;;  %p2851_p5 = pnand %p2850_p4, %p2846_p1 }
  0x41   :  { %464 = vmatprep.subr.mxu1 %v397_v37 }
  0x42   :  { %465 = vmatpush1.msra.mxu1 %v396_v38 }
  0x43   :  { %466 = vmatprep.subr.mxu1 %v394_v39 }
  0x44   :  { %467 = vmatpush1.msra.mxu1 %v393_v40 }
  0x45   :  { %468 = vmatprep.subr.mxu1 %v391_v41 }
  0x46   :  { %469 = vmatpush1.msra.mxu1 %v390_v61 }
  0xa0   :  { %v304_v44 = vpop.permute.xlu0 %303 }
  0xa1   :  { %vm305_vm2 = vcmp.eq.s32.totalorder %v300_v43, %v304_v44 }
  0xa2   :  { %v2347_v46 = vsel %vm305_vm2, 1.0, %v3641_v3 }
  0xa3   :  { %2582 = vmatmul.mubr.msk.f32.vlgmr.msra.gmra.mxu0 %vm316_vm1, %v2347_v46 }
  0xa4   :  { %2585 = vmatpush3.msra.mxu0 %v437_v45  ;;  %2616 = vmatprep.mubr.msk.f32.mxu0 %vm3642_vm0, %v3641_v3 }
  0xa5   :  { %2586 = vmatprep.subr.mxu0 %v3641_v3 }
  0xa6   :  { %2587 = vmatpush3.msra.mxu0 %v434_v47 }
  0xa7   :  { %2588 = vmatprep.subr.mxu0 %v3641_v3 }
  0xa8   :  { %2589 = vmatpush3.msra.mxu0 %v431_v48 }
  0xa9   :  { %2590 = vmatprep.subr.mxu0 %v3641_v3 }
  0xaa   :  { %2591 = vmatpush3.msra.mxu0 %v428_v49 }
  0xab   :  { %2592 = vmatprep.subr.mxu0 %v3641_v3 }
  0xac   :  { %2593 = vmatpush3.msra.mxu0 %v425_v50 }
  0xad   :  { %2594 = vmatprep.subr.mxu0 %v3641_v3 }
  0xae   :  { %2595 = vmatpush3.msra.mxu0 %v422_v51 }
  0xaf   :  { %2596 = vmatprep.subr.mxu0 %v3641_v3 }
  0xb0   :  { %2597 = vmatpush3.msra.mxu0 %v419_v52 }
  0xb1   :  { %2598 = vmatprep.subr.mxu0 %v3641_v3 }
  0xb2   :  { %2599 = vmatpush3.msra.mxu0 %v416_v53 }
  0xb3   :  { %2600 = vmatprep.subr.mxu0 %v3641_v3 }
  0xb4   :  { %2601 = vmatpush3.msra.mxu0 %v413_v54 }
  0xb5   :  { %2602 = vmatprep.subr.mxu0 %v3641_v3 }
  0xb6   :  { %2603 = vmatpush3.msra.mxu0 %v410_v55 }
  0xb7   :  { %2604 = vmatprep.subr.mxu0 %v3641_v3 }
  0xb8   :  { %2605 = vmatpush3.msra.mxu0 %v407_v56 }
  0xb9   :  { %2606 = vmatprep.subr.mxu0 %v3641_v3 }
  0xba   :  { %2607 = vmatpush3.msra.mxu0 %v404_v57 }
  0xbb   :  { %2608 = vmatprep.subr.mxu0 %v3641_v3 }
  0xbc   :  { %2609 = vmatpush3.msra.mxu0 %v401_v58 }
  0xbd   :  { %2610 = vmatprep.subr.mxu0 %v3641_v3 }
  0xbe   :  { %2611 = vmatpush3.msra.mxu0 %v398_v59 }
  0xbf   :  { %2612 = vmatprep.subr.mxu0 %v3641_v3 }
  0xc0   :  { %2613 = vmatpush3.msra.mxu0 %v395_v60 }
  0xc1   :  { %2614 = vmatprep.subr.mxu0 %v3641_v3 }
  0xc2   :  { %2615 = vmatpush3.msra.mxu0 %v392_v62 }
  0xc3   :  { %2854 = shalt.err (!%p2851_p5)  }
  0xc4   :  { %s2855_s0 = scalar_lea.vmem %s3944_s17, 256  ;;  %s3975_s1 = scalar_lea.vmem %s3944_s17, 2048 }
  0xc5   :  { %p2856_p6 = scmp.ne.s32.totalorder %s3944_s17, %s2855_s0  ;;  %p2860_p7 = scmp.lt.s32.totalorder %s3944_s17, %s3944_s17 }
  0xc6   :  { %p2861_p8 = scmp.lt.s32.totalorder %s3975_s1, %s2855_s0 }
  0xc8   :  { %p2862_p9 = por %p2861_p8, %p2860_p7 }
  0xca   :  { %p2863_p10 = pnand %p2862_p9, %p2856_p6 }
  0xcc   :  { %2866 = shalt.err (!%p2863_p10)  }
  0xcd   :  { %60 = dma.hbm_to_vmem [thread:$0]  %s49_s25, 256, %s3944_s17, [#allocation6] }
  0xce   :  { %s2867_s16 = scalar_lea.hbm %s3961_s26, 256  ;;  %s3986_s22 = scalar_lea.hbm %s4970_s13, 2048 }
  0xcf   :  { %p2868_p11 = scmp.ne.s32.totalorder %s3961_s26, %s2867_s16  ;;  %p2870_p12 = scmp.lt.s32.totalorder %s3961_s26, %s4970_s13 }
  0xd0   :  { %p2871_p13 = scmp.lt.s32.totalorder %s3986_s22, %s2867_s16 }
  0xd2   :  { %p2872_p0 = por %p2871_p13, %p2870_p12 }
  0xd4   :  { %p2873_p1 = pnand %p2872_p0, %p2868_p11 }
  0xd6   :  { %2876 = shalt.err (!%p2873_p1)  }
  0xd7   :  { %s2877_s24 = scalar_lea.vmem %s3946_s19, 256  ;;  %s3996_s25 = scalar_lea.vmem %s3946_s19, 2048 }
  0xd8   :  { %p2878_p2 = scmp.ne.s32.totalorder %s3946_s19, %s2877_s24  ;;  %p2882_p3 = scmp.lt.s32.totalorder %s3946_s19, %s3946_s19 }
  0xd9   :  { %p2883_p4 = scmp.lt.s32.totalorder %s3996_s25, %s2877_s24 }
  0xdb   :  { %p2884_p5 = por %p2883_p4, %p2882_p3 }
  0xdd   :  { %p2885_p6 = pnand %p2884_p5, %p2878_p2 }
  0xdf   :  { %2888 = shalt.err (!%p2885_p6)  }
  0xe0   :  { %74 = dma.hbm_to_vmem [thread:$0]  %s3961_s26, 256, %s3946_s19, [#allocation6 + $0x8] }
  0xe1   :  { %s2459_s3 = sshll.u32 %s3948_s20, 8 }
  0xe2   :  { %s78_s27 = scalar_lea.hbm %s4969_s12, %s2459_s3  ;;  %s4013_s14 = scalar_lea.hbm %s4970_s13, %s2459_s3 }
  0xe3   :  { %s2889_s0 = scalar_lea.hbm %s78_s27, 256  ;;  %p2892_p8 = scmp.lt.s32.totalorder %s78_s27, %s4969_s12 }
  0xe4   :  { %p2890_p7 = scmp.ne.s32.totalorder %s78_s27, %s2889_s0  ;;  %p2893_p9 = scmp.lt.s32.totalorder %s3966_s29, %s2889_s0 }
  0xe6   :  { %p2894_p10 = por %p2893_p9, %p2892_p8 }
  0xe8   :  { %p2895_p11 = pnand %p2894_p10, %p2890_p7 }
  0xea   :  { %2898 = shalt.err (!%p2895_p11)  }
  0xeb   :  { %s2899_s20 = scalar_lea.vmem %s3953_s21, 256  ;;  %p2904_p13 = scmp.lt.s32.totalorder %s3953_s21, %s3944_s17 }
  0xec   :  { %p2900_p12 = scmp.ne.s32.totalorder %s3953_s21, %s2899_s20  ;;  %p2905_p0 = scmp.lt.s32.totalorder %s3975_s1, %s2899_s20 }
  0xee   :  { %p2906_p1 = por %p2905_p0, %p2904_p13 }
  0xf0   :  { %p2907_p2 = pnand %p2906_p1, %p2900_p12 }
  0xf2   :  { %2910 = shalt.err (!%p2907_p2)  }
  0xf3   :  { %91 = dma.hbm_to_vmem [thread:$0]  %s78_s27, 256, %s3953_s21, [#allocation6 + $0x1] }
  0xf4   :  { %s2911_s26 = scalar_lea.hbm %s4013_s14, 256  ;;  %p2914_p4 = scmp.lt.s32.totalorder %s4013_s14, %s4970_s13 }
  0xf5   :  { %p2912_p3 = scmp.ne.s32.totalorder %s4013_s14, %s2911_s26  ;;  %p2915_p5 = scmp.lt.s32.totalorder %s3986_s22, %s2911_s26 }
  0xf7   :  { %p2916_p6 = por %p2915_p5, %p2914_p4 }
  0xf9   :  { %p2917_p7 = pnand %p2916_p6, %p2912_p3 }
  0xfb   :  { %2920 = shalt.err (!%p2917_p7)  }
  0xfc   :  { %s2921_s23 = scalar_lea.vmem %s4005_s2, 256  ;;  %p2926_p9 = scmp.lt.s32.totalorder %s4005_s2, %s3946_s19 }
  0xfd   :  { %p2922_p8 = scmp.ne.s32.totalorder %s4005_s2, %s2921_s23  ;;  %p2927_p10 = scmp.lt.s32.totalorder %s3996_s25, %s2921_s23 }
  0xff   :  { %p2928_p11 = por %p2927_p10, %p2926_p9 }
 0x101   :  { %p2929_p12 = pnand %p2928_p11, %p2922_p8 }
 0x103   :  { %2932 = shalt.err (!%p2929_p12)  }
 0x104   :  { %106 = dma.hbm_to_vmem [thread:$0]  %s4013_s14, 256, %s4005_s2, [#allocation6 + $0x9] }
 0x105   :  { %s2323_s21 = sld [smem:[#allocation10 + $0x2]]  ;;  %s3647_s24 = smov [#allocation2 + $0x20]  }
 0x106   :  { %s120_s3 = sshll.u32 %s3647_s24, 4  ;;  %s3648_s9 = smov [#allocation3 + $0x20]   ;;  %s121_s3 = int_to_ptr.vmem [resolvable:$true] %s120_s3 }
 0x107   :  { %s135_s10 = sshll.u32 %s3648_s9, 4  ;;  %s4041_s27 = sld [smem:[#allocation10 + $0x3]]  ;;  %s4039_s10 = int_to_ptr.vmem [resolvable:$true] %s135_s10 }
 0x108   :  { %s3649_s28 = smov [#allocation2 + $0x30]   ;;  %s3650_s0 = smov [#allocation3 + $0x30]  }
 0x109   :  { %s152_s30 = sshll.u32 %s3649_s28, 4  ;;  %s4043_s16 = sshll.u32 %s3650_s0, 4  ;;  %s4045_s30 = int_to_ptr.vmem [resolvable:$true] %s152_s30  ;;  %s4077_s16 = int_to_ptr.vmem [resolvable:$true] %s4043_s16 }
 0x10b   :  { %s2461_s18 = sshll.u32 %s2323_s21, 8 }
 0x10c   :  { %s110_s20 = scalar_lea.hbm %s4969_s12, %s2461_s18  ;;  %s4053_s5 = scalar_lea.hbm %s4970_s13, %s2461_s18 }
 0x10d   :  { %s2933_s23 = scalar_lea.hbm %s110_s20, 256  ;;  %p2936_p0 = scmp.lt.s32.totalorder %s110_s20, %s4969_s12 }
 0x10e   :  { %p2934_p13 = scmp.ne.s32.totalorder %s110_s20, %s2933_s23  ;;  %p2937_p1 = scmp.lt.s32.totalorder %s3966_s29, %s2933_s23 }
 0x110   :  { %p2938_p2 = por %p2937_p1, %p2936_p0 }
 0x112   :  { %p2939_p3 = pnand %p2938_p2, %p2934_p13 }
 0x114   :  { %2942 = shalt.err (!%p2939_p3)  }
 0x115   :  { %s2943_s21 = scalar_lea.vmem %s121_s3, 256  ;;  %p2948_p5 = scmp.lt.s32.totalorder %s121_s3, %s3944_s17 }
 0x116   :  { %p2944_p4 = scmp.ne.s32.totalorder %s121_s3, %s2943_s21  ;;  %p2949_p6 = scmp.lt.s32.totalorder %s3975_s1, %s2943_s21 }
 0x118   :  { %p2950_p7 = por %p2949_p6, %p2948_p5 }
 0x11a   :  { %p2951_p8 = pnand %p2950_p7, %p2944_p4 }
 0x11c   :  { %2954 = shalt.err (!%p2951_p8)  }
 0x11d   :  { %123 = dma.hbm_to_vmem [thread:$0]  %s110_s20, 256, %s121_s3, [#allocation6 + $0x2] }
 0x11e   :  { %s2955_s28 = scalar_lea.hbm %s4053_s5, 256  ;;  %p2958_p10 = scmp.lt.s32.totalorder %s4053_s5, %s4970_s13 }
 0x11f   :  { %p2956_p9 = scmp.ne.s32.totalorder %s4053_s5, %s2955_s28  ;;  %p2959_p11 = scmp.lt.s32.totalorder %s3986_s22, %s2955_s28 }
 0x121   :  { %p2960_p12 = por %p2959_p11, %p2958_p10 }
 0x123   :  { %p2961_p13 = pnand %p2960_p12, %p2956_p9 }
 0x125   :  { %2964 = shalt.err (!%p2961_p13)  }
 0x126   :  { %s2965_s3 = scalar_lea.vmem %s4039_s10, 256  ;;  %p2970_p1 = scmp.lt.s32.totalorder %s4039_s10, %s3946_s19 }
 0x127   :  { %p2966_p0 = scmp.ne.s32.totalorder %s4039_s10, %s2965_s3  ;;  %p2971_p2 = scmp.lt.s32.totalorder %s3996_s25, %s2965_s3 }
 0x129   :  { %p2972_p3 = por %p2971_p2, %p2970_p1 }
 0x12b   :  { %p2973_p4 = pnand %p2972_p3, %p2966_p0 }
 0x12d   :  { %2976 = shalt.err (!%p2973_p4)  }
 0x12e   :  { %138 = dma.hbm_to_vmem [thread:$0]  %s4053_s5, 256, %s4039_s10, [#allocation6 + $0xa] }
 0x12f   :  { %s2463_s2 = sshll.u32 %s4041_s27, 8 }
 0x130   :  { %s142_s26 = scalar_lea.hbm %s4969_s12, %s2463_s2  ;;  %s4085_s24 = scalar_lea.hbm %s4970_s13, %s2463_s2 }
 0x131   :  { %s2977_s9 = scalar_lea.hbm %s142_s26, 256  ;;  %p2980_p6 = scmp.lt.s32.totalorder %s142_s26, %s4969_s12 }
 0x132   :  { %p2978_p5 = scmp.ne.s32.totalorder %s142_s26, %s2977_s9  ;;  %p2981_p7 = scmp.lt.s32.totalorder %s3966_s29, %s2977_s9 }
 0x134   :  { %p2982_p8 = por %p2981_p7, %p2980_p6 }
 0x136   :  { %p2983_p9 = pnand %p2982_p8, %p2978_p5 }
 0x138   :  { %2986 = shalt.err (!%p2983_p9)  }
 0x139   :  { %s2987_s10 = scalar_lea.vmem %s4045_s30, 256  ;;  %p2992_p11 = scmp.lt.s32.totalorder %s4045_s30, %s3944_s17 }
 0x13a   :  { %p2988_p10 = scmp.ne.s32.totalorder %s4045_s30, %s2987_s10  ;;  %p2993_p12 = scmp.lt.s32.totalorder %s3975_s1, %s2987_s10 }
 0x13c   :  { %p2994_p13 = por %p2993_p12, %p2992_p11 }
 0x13e   :  { %p2995_p0 = pnand %p2994_p13, %p2988_p10 }
 0x140   :  { %2998 = shalt.err (!%p2995_p0)  }
 0x141   :  { %155 = dma.hbm_to_vmem [thread:$0]  %s142_s26, 256, %s4045_s30, [#allocation6 + $0x3] }
 0x142   :  { %s2999_s27 = scalar_lea.hbm %s4085_s24, 256  ;;  %p3002_p2 = scmp.lt.s32.totalorder %s4085_s24, %s4970_s13 }
 0x143   :  { %p3000_p1 = scmp.ne.s32.totalorder %s4085_s24, %s2999_s27  ;;  %p3003_p3 = scmp.lt.s32.totalorder %s3986_s22, %s2999_s27 }
 0x145   :  { %p3004_p4 = por %p3003_p3, %p3002_p2 }
 0x147   :  { %p3005_p5 = pnand %p3004_p4, %p3000_p1 }
 0x149   :  { %3008 = shalt.err (!%p3005_p5)  }
 0x14a   :  { %s3009_s18 = scalar_lea.vmem %s4077_s16, 256  ;;  %p3014_p7 = scmp.lt.s32.totalorder %s4077_s16, %s3946_s19 }
 0x14b   :  { %p3010_p6 = scmp.ne.s32.totalorder %s4077_s16, %s3009_s18  ;;  %p3015_p8 = scmp.lt.s32.totalorder %s3996_s25, %s3009_s18 }
 0x14d   :  { %p3016_p9 = por %p3015_p8, %p3014_p7 }
 0x14f   :  { %p3017_p10 = pnand %p3016_p9, %p3010_p6 }
 0x151   :  { %3020 = shalt.err (!%p3017_p10)  }
 0x152   :  { %170 = dma.hbm_to_vmem [thread:$0]  %s4085_s24, 256, %s4077_s16, [#allocation6 + $0xb] }
 0x153   :  { %s2331_s30 = sld [smem:[#allocation10 + $0x4]]  ;;  %s3651_s3 = smov [#allocation2 + $0x40]  }
 0x154   :  { %s184_s2 = sshll.u32 %s3651_s3, 4  ;;  %s3652_s14 = smov [#allocation3 + $0x40]   ;;  %s185_s2 = int_to_ptr.vmem [resolvable:$true] %s184_s2 }
 0x155   :  { %s199_s20 = sshll.u32 %s3652_s14, 4  ;;  %s4113_s26 = sld [smem:[#allocation10 + $0x5]]  ;;  %s4111_s20 = int_to_ptr.vmem [resolvable:$true] %s199_s20 }
 0x156   :  { %s3653_s4 = smov [#allocation2 + $0x50]   ;;  %s3654_s9 = smov [#allocation3 + $0x50]  }
 0x157   :  { %s216_s23 = sshll.u32 %s3653_s4, 4  ;;  %s4115_s21 = sshll.u32 %s3654_s9, 4  ;;  %s4117_s23 = int_to_ptr.vmem [resolvable:$true] %s216_s23  ;;  %s4149_s21 = int_to_ptr.vmem [resolvable:$true] %s4115_s21 }
 0x159   :  { %s2465_s28 = sshll.u32 %s2331_s30, 8 }
 0x15a   :  { %s174_s10 = scalar_lea.hbm %s4969_s12, %s2465_s28  ;;  %s4125_s0 = scalar_lea.hbm %s4970_s13, %s2465_s28 }
 0x15b   :  { %s3021_s18 = scalar_lea.hbm %s174_s10, 256  ;;  %p3024_p12 = scmp.lt.s32.totalorder %s174_s10, %s4969_s12 }
 0x15c   :  { %p3022_p11 = scmp.ne.s32.totalorder %s174_s10, %s3021_s18  ;;  %p3025_p13 = scmp.lt.s32.totalorder %s3966_s29, %s3021_s18 }
 0x15e   :  { %p3026_p0 = por %p3025_p13, %p3024_p12 }
 0x160   :  { %p3027_p1 = pnand %p3026_p0, %p3022_p11 }
 0x162   :  { %3030 = shalt.err (!%p3027_p1)  }
 0x163   :  { %s3031_s30 = scalar_lea.vmem %s185_s2, 256  ;;  %p3036_p3 = scmp.lt.s32.totalorder %s185_s2, %s3944_s17 }
 0x164   :  { %p3032_p2 = scmp.ne.s32.totalorder %s185_s2, %s3031_s30  ;;  %p3037_p4 = scmp.lt.s32.totalorder %s3975_s1, %s3031_s30 }
 0x166   :  { %p3038_p5 = por %p3037_p4, %p3036_p3 }
 0x168   :  { %p3039_p6 = pnand %p3038_p5, %p3032_p2 }
 0x16a   :  { %3042 = shalt.err (!%p3039_p6)  }
 0x16b   :  { %187 = dma.hbm_to_vmem [thread:$0]  %s174_s10, 256, %s185_s2, [#allocation6 + $0x4] }
 0x16c   :  { %s3043_s4 = scalar_lea.hbm %s4125_s0, 256  ;;  %p3046_p8 = scmp.lt.s32.totalorder %s4125_s0, %s4970_s13 }
 0x16d   :  { %p3044_p7 = scmp.ne.s32.totalorder %s4125_s0, %s3043_s4  ;;  %p3047_p9 = scmp.lt.s32.totalorder %s3986_s22, %s3043_s4 }
 0x16f   :  { %p3048_p10 = por %p3047_p9, %p3046_p8 }
 0x171   :  { %p3049_p11 = pnand %p3048_p10, %p3044_p7 }
 0x173   :  { %3052 = shalt.err (!%p3049_p11)  }
 0x174   :  { %s3053_s2 = scalar_lea.vmem %s4111_s20, 256  ;;  %p3058_p13 = scmp.lt.s32.totalorder %s4111_s20, %s3946_s19 }
 0x175   :  { %p3054_p12 = scmp.ne.s32.totalorder %s4111_s20, %s3053_s2  ;;  %p3059_p0 = scmp.lt.s32.totalorder %s3996_s25, %s3053_s2 }
 0x177   :  { %p3060_p1 = por %p3059_p0, %p3058_p13 }
 0x179   :  { %p3061_p2 = pnand %p3060_p1, %p3054_p12 }
 0x17b   :  { %3064 = shalt.err (!%p3061_p2)  }
 0x17c   :  { %202 = dma.hbm_to_vmem [thread:$0]  %s4125_s0, 256, %s4111_s20, [#allocation6 + $0xc] }
 0x17d   :  { %s2467_s16 = sshll.u32 %s4113_s26, 8 }
 0x17e   :  { %s206_s27 = scalar_lea.hbm %s4969_s12, %s2467_s16  ;;  %s4157_s3 = scalar_lea.hbm %s4970_s13, %s2467_s16 }
 0x17f   :  { %s3065_s14 = scalar_lea.hbm %s206_s27, 256  ;;  %p3068_p4 = scmp.lt.s32.totalorder %s206_s27, %s4969_s12 }
 0x180   :  { %p3066_p3 = scmp.ne.s32.totalorder %s206_s27, %s3065_s14  ;;  %p3069_p5 = scmp.lt.s32.totalorder %s3966_s29, %s3065_s14 }
 0x182   :  { %p3070_p6 = por %p3069_p5, %p3068_p4 }
 0x184   :  { %p3071_p7 = pnand %p3070_p6, %p3066_p3 }
 0x186   :  { %3074 = shalt.err (!%p3071_p7)  }
 0x187   :  { %s3075_s20 = scalar_lea.vmem %s4117_s23, 256  ;;  %p3080_p9 = scmp.lt.s32.totalorder %s4117_s23, %s3944_s17 }
 0x188   :  { %p3076_p8 = scmp.ne.s32.totalorder %s4117_s23, %s3075_s20  ;;  %p3081_p10 = scmp.lt.s32.totalorder %s3975_s1, %s3075_s20 }
 0x18a   :  { %p3082_p11 = por %p3081_p10, %p3080_p9 }
 0x18c   :  { %p3083_p12 = pnand %p3082_p11, %p3076_p8 }
 0x18e   :  { %3086 = shalt.err (!%p3083_p12)  }
 0x18f   :  { %219 = dma.hbm_to_vmem [thread:$0]  %s206_s27, 256, %s4117_s23, [#allocation6 + $0x5] }
 0x190   :  { %s3087_s26 = scalar_lea.hbm %s4157_s3, 256  ;;  %p3090_p0 = scmp.lt.s32.totalorder %s4157_s3, %s4970_s13 }
 0x191   :  { %p3088_p13 = scmp.ne.s32.totalorder %s4157_s3, %s3087_s26  ;;  %p3091_p1 = scmp.lt.s32.totalorder %s3986_s22, %s3087_s26 }
 0x193   :  { %p3092_p2 = por %p3091_p1, %p3090_p0 }
 0x195   :  { %p3093_p3 = pnand %p3092_p2, %p3088_p13 }
 0x197   :  { %3096 = shalt.err (!%p3093_p3)  }
 0x198   :  { %s3097_s28 = scalar_lea.vmem %s4149_s21, 256  ;;  %p3102_p5 = scmp.lt.s32.totalorder %s4149_s21, %s3946_s19 }
 0x199   :  { %p3098_p4 = scmp.ne.s32.totalorder %s4149_s21, %s3097_s28  ;;  %p3103_p6 = scmp.lt.s32.totalorder %s3996_s25, %s3097_s28 }
 0x19b   :  { %p3104_p7 = por %p3103_p6, %p3102_p5 }
 0x19d   :  { %p3105_p8 = pnand %p3104_p7, %p3098_p4 }
 0x19f   :  { %3108 = shalt.err (!%p3105_p8)  }
 0x1a0   :  { %234 = dma.hbm_to_vmem [thread:$0]  %s4157_s3, 256, %s4149_s21, [#allocation6 + $0xd] }
 0x1a1   :  { %s2339_s23 = sld [smem:[#allocation10 + $0x6]]  ;;  %s3655_s2 = smov [#allocation2 + $0x60]  }
 0x1a2   :  { %s248_s16 = sshll.u32 %s3655_s2, 4  ;;  %s3656_s24 = smov [#allocation3 + $0x60]   ;;  %s249_s16 = int_to_ptr.vmem [resolvable:$true] %s248_s16 }
 0x1a3   :  { %s263_s10 = sshll.u32 %s3656_s24, 4  ;;  %s4183_s10 = int_to_ptr.vmem [resolvable:$true] %s263_s10 }
 0x1a7   :  { %s2469_s27 = sshll.u32 %s2339_s23, 8 }
 0x1a8   :  { %s238_s14 = scalar_lea.hbm %s4969_s12, %s2469_s27  ;;  %s4191_s20 = scalar_lea.hbm %s4970_s13, %s2469_s27 }
 0x1a9   :  { %s3109_s26 = scalar_lea.hbm %s238_s14, 256  ;;  %p3112_p10 = scmp.lt.s32.totalorder %s238_s14, %s4969_s12 }
 0x1aa   :  { %p3110_p9 = scmp.ne.s32.totalorder %s238_s14, %s3109_s26  ;;  %p3113_p11 = scmp.lt.s32.totalorder %s3966_s29, %s3109_s26 }
 0x1ac   :  { %p3114_p12 = por %p3113_p11, %p3112_p10 }
 0x1ae   :  { %p3115_p13 = pnand %p3114_p12, %p3110_p9 }
 0x1b0   :  { %3118 = shalt.err (!%p3115_p13)  }
 0x1b1   :  { %s3119_s0 = scalar_lea.vmem %s249_s16, 256  ;;  %p3124_p1 = scmp.lt.s32.totalorder %s249_s16, %s3944_s17 }
 0x1b2   :  { %p3120_p0 = scmp.ne.s32.totalorder %s249_s16, %s3119_s0  ;;  %p3125_p2 = scmp.lt.s32.totalorder %s3975_s1, %s3119_s0 }
 0x1b4   :  { %p3126_p3 = por %p3125_p2, %p3124_p1 }
 0x1b6   :  { %p3127_p4 = pnand %p3126_p3, %p3120_p0 }
 0x1b8   :  { %3130 = shalt.err (!%p3127_p4)  }
 0x1b9   :  { %251 = dma.hbm_to_vmem [thread:$0]  %s238_s14, 256, %s249_s16, [#allocation6 + $0x6] }
 0x1ba   :  { %s3131_s9 = scalar_lea.hbm %s4191_s20, 256  ;;  %p3134_p6 = scmp.lt.s32.totalorder %s4191_s20, %s4970_s13 }
 0x1bb   :  { %p3132_p5 = scmp.ne.s32.totalorder %s4191_s20, %s3131_s9  ;;  %p3135_p7 = scmp.lt.s32.totalorder %s3986_s22, %s3131_s9 }
 0x1bd   :  { %p3136_p8 = por %p3135_p7, %p3134_p6 }
 0x1bf   :  { %p3137_p9 = pnand %p3136_p8, %p3132_p5 }
 0x1c1   :  { %3140 = shalt.err (!%p3137_p9)  }
 0x1c2   :  { %s3141_s2 = scalar_lea.vmem %s4183_s10, 256  ;;  %p3146_p11 = scmp.lt.s32.totalorder %s4183_s10, %s3946_s19 }
 0x1c3   :  { %p3142_p10 = scmp.ne.s32.totalorder %s4183_s10, %s3141_s2  ;;  %p3147_p12 = scmp.lt.s32.totalorder %s3996_s25, %s3141_s2 }
 0x1c5   :  { %p3148_p13 = por %p3147_p12, %p3146_p11 }
 0x1c7   :  { %p3149_p0 = pnand %p3148_p13, %p3142_p10 }
 0x1c9   :  { %3152 = shalt.err (!%p3149_p0)  }
 0x1ca   :  { %266 = dma.hbm_to_vmem [thread:$0]  %s4191_s20, 256, %s4183_s10, [#allocation6 + $0xe]  ;;  %v386_v63 = vpop.f32.mrf.mxu0 }
 0x1cb   :  { %503 = vmatmul.mubr.f32.vlgmr.msra.gmra.mxu1 %v386_v63  ;;  %2617 = vmatmul.mubr.f32.vlgmr.msra.gmra.mxu0 %v386_v63  ;;  %s2343_s16 = sld [smem:[#allocation10 + $0x7]]  ;;  %s3657_s27 = smov [#allocation2 + $0x70]  }
 0x1cc   :  { %v2583_v0 = vpop.f32.mrf.mxu0  ;;  %s280_s5 = sshll.u32 %s3657_s27, 4  ;;  %s281_s5 = int_to_ptr.vmem [resolvable:$true] %s280_s5 }
 0x1d1   :  { %s2471_s24 = sshll.u32 %s2343_s16, 8 }
 0x1d2   :  { %s270_s30 = scalar_lea.hbm %s4969_s12, %s2471_s24 }
 0x1d3   :  { %s3153_s4 = scalar_lea.hbm %s270_s30, 256  ;;  %p3156_p2 = scmp.lt.s32.totalorder %s270_s30, %s4969_s12 }
 0x1d4   :  { %p3154_p1 = scmp.ne.s32.totalorder %s270_s30, %s3153_s4  ;;  %p3157_p3 = scmp.lt.s32.totalorder %s3966_s29, %s3153_s4 }
 0x1d6   :  { %p3158_p4 = por %p3157_p3, %p3156_p2 }
 0x1d8   :  { %p3159_p5 = pnand %p3158_p4, %p3154_p1 }
 0x1da   :  { %3162 = shalt.err (!%p3159_p5)  }
 0x1db   :  { %s3163_s10 = scalar_lea.vmem %s281_s5, 256  ;;  %p3168_p7 = scmp.lt.s32.totalorder %s281_s5, %s3944_s17 }
 0x1dc   :  { %p3164_p6 = scmp.ne.s32.totalorder %s281_s5, %s3163_s10  ;;  %p3169_p8 = scmp.lt.s32.totalorder %s3975_s1, %s3163_s10 }
 0x1de   :  { %p3170_p9 = por %p3169_p8, %p3168_p7 }
 0x1e0   :  { %p3171_p10 = pnand %p3170_p9, %p3164_p6 }
 0x1e2   :  { %3174 = shalt.err (!%p3171_p10)  }
 0x1e3   :  { %283 = dma.hbm_to_vmem [thread:$0]  %s270_s30, 256, %s281_s5, [#allocation6 + $0x7] }
 0x1e4   :  { %s285_s0 = scalar_lea.hbm %s4970_s13, %s2471_s24  ;;  %s3658_s9 = smov [#allocation3 + $0x70]  }
 0x1e5   :  { %s295_s28 = sshll.u32 %s3658_s9, 4  ;;  %s4225_s23 = sld [smem:[#allocation9]]  ;;  %s296_s28 = int_to_ptr.vmem [resolvable:$true] %s295_s28 }
 0x1e6   :  { %s3175_s2 = scalar_lea.hbm %s285_s0, 256  ;;  %p3178_p12 = scmp.lt.s32.totalorder %s285_s0, %s4970_s13 }
 0x1e7   :  { %p3176_p11 = scmp.ne.s32.totalorder %s285_s0, %s3175_s2  ;;  %p3179_p13 = scmp.lt.s32.totalorder %s3986_s22, %s3175_s2 }
 0x1e9   :  { %p3180_p0 = por %p3179_p13, %p3178_p12 }
 0x1eb   :  { %p3181_p1 = pnand %p3180_p0, %p3176_p11 }
 0x1ed   :  { %3184 = shalt.err (!%p3181_p1)  }
 0x1ee   :  { %s3185_s5 = scalar_lea.vmem %s296_s28, 256  ;;  %p3190_p3 = scmp.lt.s32.totalorder %s296_s28, %s3946_s19 }
 0x1ef   :  { %p3186_p2 = scmp.ne.s32.totalorder %s296_s28, %s3185_s5  ;;  %p3191_p4 = scmp.lt.s32.totalorder %s3996_s25, %s3185_s5 }
 0x1f1   :  { %p3192_p5 = por %p3191_p4, %p3190_p3 }
 0x1f3   :  { %p3193_p6 = pnand %p3192_p5, %p3186_p2 }
 0x1f5   :  { %3196 = shalt.err (!%p3193_p6)  }
 0x1f6   :  { %298 = dma.hbm_to_vmem [thread:$0]  %s285_s0, 256, %s296_s28, [#allocation6 + $0xf] }
 0x28b   :  { %v4233_v1 = vpop.f32.mrf.mxu1  ;;  %v4235_v2 = vpop.f32.mrf.mxu0 }
 0x28d   :  { %v4237_v4 = vpop.f32.mrf.mxu1  ;;  %v2618_v5 = vpop.f32.mrf.mxu0 }
 0x28e   :  { %3571 = dma.done.wait [#allocation6], 256 }
 0x28f   :  { %3572 = vsyncadd [#allocation6], 4294967040 }
 0x290   :  { %3573 = dma.done.wait [#allocation6 + $0x8], 256 }
 0x291   :  { %3574 = vsyncadd [#allocation6 + $0x8], 4294967040  ;;  %s4239_s24 = sld [smem:[#allocation10 + $0x1]]  ;;  %s587_s18 = scalar_lea.vmem [#allocation2], %s4225_s23 }
 0x292   :  { %588 = vst [vmem:[%s587_s18] sm:$0x1] %v4237_v4  ;;  %s602_s14 = sshll.u32 %s587_s18, 4  ;;  %s589_s30 = scalar_lea.vmem [#allocation3], %s4225_s23  ;;  %s603_s14 = int_to_ptr.vmem [resolvable:$true] %s602_s14 }
 0x293   :  { %590 = vst [vmem:[%s589_s30] sm:$0x1] %v4235_v2  ;;  %s4245_s4 = sld [smem:[#allocation9 + $0x1]]  ;;  %s616_s26 = sshll.u32 %s589_s30, 4  ;;  %s4249_s26 = int_to_ptr.vmem [resolvable:$true] %s616_s26 }
 0x294   :  { %s2349_s21 = sshll.u32 %s3942_s15, 4  ;;  %s3197_s27 = scalar_lea.vmem %s603_s14, 16 }
 0x295   :  { %s592_s10 = sadd.s32 %s2349_s21, %s4225_s23  ;;  %p3198_p7 = scmp.ne.s32.totalorder %s603_s14, %s3197_s27 }
 0x296   :  { %s2350_s20 = sshll.u32 %s592_s10, 4  ;;  %p3202_p8 = scmp.lt.s32.totalorder %s603_s14, %s3944_s17 }
 0x297   :  { %s594_s9 = scalar_lea.hbm %s4969_s12, %s2350_s20  ;;  %s4257_s16 = scalar_lea.hbm %s4970_s13, %s2350_s20 }
 0x298   :  { %p3203_p9 = scmp.lt.s32.totalorder %s3975_s1, %s3197_s27 }
 0x29a   :  { %p3204_p10 = por %p3203_p9, %p3202_p8 }
 0x29c   :  { %p3205_p11 = pnand %p3204_p10, %p3198_p7 }
 0x29e   :  { %3208 = shalt.err (!%p3205_p11)  }
 0x29f   :  { %s3209_s15 = scalar_lea.hbm %s594_s9, 16  ;;  %p3212_p13 = scmp.lt.s32.totalorder %s594_s9, %s4969_s12 }
 0x2a0   :  { %p3210_p12 = scmp.ne.s32.totalorder %s594_s9, %s3209_s15  ;;  %p3213_p0 = scmp.lt.s32.totalorder %s3966_s29, %s3209_s15 }
 0x2a2   :  { %p3214_p1 = por %p3213_p0, %p3212_p13 }
 0x2a4   :  { %p3215_p2 = pnand %p3214_p1, %p3210_p12 }
 0x2a6   :  { %3218 = shalt.err (!%p3215_p2)  }
 0x2a7   :  { %605 = dma.vmem_to_hbm [thread:$0]  %s603_s14, 16, %s594_s9, [#allocation7] }
 0x2a8   :  { %s3219_s18 = scalar_lea.vmem %s4249_s26, 16  ;;  %p3224_p4 = scmp.lt.s32.totalorder %s4249_s26, %s3946_s19 }
 0x2a9   :  { %p3220_p3 = scmp.ne.s32.totalorder %s4249_s26, %s3219_s18  ;;  %p3225_p5 = scmp.lt.s32.totalorder %s3996_s25, %s3219_s18 }
 0x2ab   :  { %p3226_p6 = por %p3225_p5, %p3224_p4 }
 0x2ad   :  { %p3227_p7 = pnand %p3226_p6, %p3220_p3 }
 0x2af   :  { %3230 = shalt.err (!%p3227_p7)  }
 0x2b0   :  { %s3231_s30 = scalar_lea.hbm %s4257_s16, 16  ;;  %p3234_p9 = scmp.lt.s32.totalorder %s4257_s16, %s4970_s13 }
 0x2b1   :  { %p3232_p8 = scmp.ne.s32.totalorder %s4257_s16, %s3231_s30  ;;  %p3235_p10 = scmp.lt.s32.totalorder %s3986_s22, %s3231_s30 }
 0x2b3   :  { %p3236_p11 = por %p3235_p10, %p3234_p9 }
 0x2b5   :  { %p3237_p12 = pnand %p3236_p11, %p3232_p8 }
 0x2b7   :  { %3240 = shalt.err (!%p3237_p12)  }
 0x2b8   :  { %619 = dma.vmem_to_hbm [thread:$0]  %s4249_s26, 16, %s4257_s16, [#allocation7 + $0x8] }
 0x2b9   :  { %3575 = dma.done.wait [#allocation6 + $0x1], 256 }
 0x2ba   :  { %3576 = vsyncadd [#allocation6 + $0x1], 4294967040 }
 0x2bb   :  { %3577 = dma.done.wait [#allocation6 + $0x9], 256 }
 0x2bc   :  { %3578 = vsyncadd [#allocation6 + $0x9], 4294967040  ;;  %s4279_s10 = sld [smem:[#allocation10 + $0x2]]  ;;  %s2232_s20 = scalar_lea.vmem [#allocation2], %s4245_s4 }
 0x2bd   :  { %s2233_s3 = scalar_lea.vmem %s2232_s20, 16 [#allocation2]  ;;  %2354 = vst [vmem:[%s2232_s20 + $0xf] sm:$0x2] %v4237_v4  ;;  %s2234_s0 = scalar_lea.vmem [#allocation3], %s4245_s4 }
 0x2be   :  { %2355 = vst [vmem:[%s2234_s0 + $0xf] sm:$0x2] %v4235_v2  ;;  %s4285_s26 = sld [smem:[#allocation9 + $0x2]]  ;;  %s643_s9 = sshll.u32 %s2233_s3, 4  ;;  %s644_s9 = int_to_ptr.vmem [resolvable:$true] %s643_s9 }
 0x2bf   :  { %s2235_s28 = scalar_lea.vmem %s2234_s0, 16 [#allocation3]  ;;  %s2356_s16 = sshll.u32 %s4239_s24, 4 }
 0x2c0   :  { %s657_s2 = sshll.u32 %s2235_s28, 4  ;;  %s632_s27 = sadd.s32 %s2356_s16, %s4245_s4  ;;  %s4289_s2 = int_to_ptr.vmem [resolvable:$true] %s657_s2 }
 0x2c1   :  { %s2357_s15 = sshll.u32 %s632_s27, 4  ;;  %s3241_s20 = scalar_lea.vmem %s644_s9, 16 }
 0x2c2   :  { %s634_s18 = scalar_lea.hbm %s4969_s12, %s2357_s15  ;;  %s4297_s14 = scalar_lea.hbm %s4970_s13, %s2357_s15 }
 0x2c3   :  { %p3242_p13 = scmp.ne.s32.totalorder %s644_s9, %s3241_s20  ;;  %p3246_p0 = scmp.lt.s32.totalorder %s644_s9, %s3944_s17 }
 0x2c4   :  { %p3247_p1 = scmp.lt.s32.totalorder %s3975_s1, %s3241_s20 }
 0x2c6   :  { %p3248_p2 = por %p3247_p1, %p3246_p0 }
 0x2c8   :  { %p3249_p3 = pnand %p3248_p2, %p3242_p13 }
 0x2ca   :  { %3252 = shalt.err (!%p3249_p3)  }
 0x2cb   :  { %s3253_s24 = scalar_lea.hbm %s634_s18, 16  ;;  %p3256_p5 = scmp.lt.s32.totalorder %s634_s18, %s4969_s12 }
 0x2cc   :  { %p3254_p4 = scmp.ne.s32.totalorder %s634_s18, %s3253_s24  ;;  %p3257_p6 = scmp.lt.s32.totalorder %s3966_s29, %s3253_s24 }
 0x2ce   :  { %p3258_p7 = por %p3257_p6, %p3256_p5 }
 0x2d0   :  { %p3259_p8 = pnand %p3258_p7, %p3254_p4 }
 0x2d2   :  { %3262 = shalt.err (!%p3259_p8)  }
 0x2d3   :  { %646 = dma.vmem_to_hbm [thread:$0]  %s644_s9, 16, %s634_s18, [#allocation7 + $0x1] }
 0x2d4   :  { %s3263_s0 = scalar_lea.vmem %s4289_s2, 16  ;;  %p3268_p10 = scmp.lt.s32.totalorder %s4289_s2, %s3946_s19 }
 0x2d5   :  { %p3264_p9 = scmp.ne.s32.totalorder %s4289_s2, %s3263_s0  ;;  %p3269_p11 = scmp.lt.s32.totalorder %s3996_s25, %s3263_s0 }
 0x2d7   :  { %p3270_p12 = por %p3269_p11, %p3268_p10 }
 0x2d9   :  { %p3271_p13 = pnand %p3270_p12, %p3264_p9 }
 0x2db   :  { %3274 = shalt.err (!%p3271_p13)  }
 0x2dc   :  { %s3275_s28 = scalar_lea.hbm %s4297_s14, 16  ;;  %p3278_p1 = scmp.lt.s32.totalorder %s4297_s14, %s4970_s13 }
 0x2dd   :  { %p3276_p0 = scmp.ne.s32.totalorder %s4297_s14, %s3275_s28  ;;  %p3279_p2 = scmp.lt.s32.totalorder %s3986_s22, %s3275_s28 }
 0x2df   :  { %p3280_p3 = por %p3279_p2, %p3278_p1 }
 0x2e1   :  { %p3281_p4 = pnand %p3280_p3, %p3276_p0 }
 0x2e3   :  { %3284 = shalt.err (!%p3281_p4)  }
 0x2e4   :  { %660 = dma.vmem_to_hbm [thread:$0]  %s4289_s2, 16, %s4297_s14, [#allocation7 + $0x9] }
 0x2e5   :  { %3579 = dma.done.wait [#allocation6 + $0x2], 256 }
 0x2e6   :  { %3580 = vsyncadd [#allocation6 + $0x2], 4294967040 }
 0x2e7   :  { %3581 = dma.done.wait [#allocation6 + $0xa], 256 }
 0x2e8   :  { %3582 = vsyncadd [#allocation6 + $0xa], 4294967040  ;;  %s4319_s27 = sld [smem:[#allocation10 + $0x3]]  ;;  %s2244_s15 = scalar_lea.vmem [#allocation2], %s4285_s26 }
 0x2e9   :  { %s2245_s23 = scalar_lea.vmem %s2244_s15, 32 [#allocation2]  ;;  %2361 = vst [vmem:[%s2244_s15 + $0x1e] sm:$0x4] %v4237_v4  ;;  %s2246_s5 = scalar_lea.vmem [#allocation3], %s4285_s26 }
 0x2ea   :  { %2362 = vst [vmem:[%s2246_s5 + $0x1e] sm:$0x4] %v4235_v2  ;;  %s4325_s2 = sld [smem:[#allocation9 + $0x3]]  ;;  %s684_s18 = sshll.u32 %s2245_s23, 4  ;;  %s685_s18 = int_to_ptr.vmem [resolvable:$true] %s684_s18 }
 0x2eb   :  { %s2247_s30 = scalar_lea.vmem %s2246_s5, 32 [#allocation3]  ;;  %s2363_s14 = sshll.u32 %s4279_s10, 4 }
 0x2ec   :  { %s698_s21 = sshll.u32 %s2247_s30, 4  ;;  %s673_s20 = sadd.s32 %s2363_s14, %s4285_s26  ;;  %s4329_s21 = int_to_ptr.vmem [resolvable:$true] %s698_s21 }
 0x2ed   :  { %s2364_s24 = sshll.u32 %s673_s20, 4  ;;  %s3285_s15 = scalar_lea.vmem %s685_s18, 16 }
 0x2ee   :  { %s675_s0 = scalar_lea.hbm %s4969_s12, %s2364_s24  ;;  %s4337_s9 = scalar_lea.hbm %s4970_s13, %s2364_s24 }
 0x2ef   :  { %p3286_p5 = scmp.ne.s32.totalorder %s685_s18, %s3285_s15  ;;  %p3290_p6 = scmp.lt.s32.totalorder %s685_s18, %s3944_s17 }
 0x2f0   :  { %p3291_p7 = scmp.lt.s32.totalorder %s3975_s1, %s3285_s15 }
 0x2f2   :  { %p3292_p8 = por %p3291_p7, %p3290_p6 }
 0x2f4   :  { %p3293_p9 = pnand %p3292_p8, %p3286_p5 }
 0x2f6   :  { %3296 = shalt.err (!%p3293_p9)  }
 0x2f7   :  { %s3297_s10 = scalar_lea.hbm %s675_s0, 16  ;;  %p3300_p11 = scmp.lt.s32.totalorder %s675_s0, %s4969_s12 }
 0x2f8   :  { %p3298_p10 = scmp.ne.s32.totalorder %s675_s0, %s3297_s10  ;;  %p3301_p12 = scmp.lt.s32.totalorder %s3966_s29, %s3297_s10 }
 0x2fa   :  { %p3302_p13 = por %p3301_p12, %p3300_p11 }
 0x2fc   :  { %p3303_p0 = pnand %p3302_p13, %p3298_p10 }
 0x2fe   :  { %3306 = shalt.err (!%p3303_p0)  }
 0x2ff   :  { %687 = dma.vmem_to_hbm [thread:$0]  %s685_s18, 16, %s675_s0, [#allocation7 + $0x2] }
 0x300   :  { %s3307_s5 = scalar_lea.vmem %s4329_s21, 16  ;;  %p3312_p2 = scmp.lt.s32.totalorder %s4329_s21, %s3946_s19 }
 0x301   :  { %p3308_p1 = scmp.ne.s32.totalorder %s4329_s21, %s3307_s5  ;;  %p3313_p3 = scmp.lt.s32.totalorder %s3996_s25, %s3307_s5 }
 0x303   :  { %p3314_p4 = por %p3313_p3, %p3312_p2 }
 0x305   :  { %p3315_p5 = pnand %p3314_p4, %p3308_p1 }
 0x307   :  { %3318 = shalt.err (!%p3315_p5)  }
 0x308   :  { %s3319_s30 = scalar_lea.hbm %s4337_s9, 16  ;;  %p3322_p7 = scmp.lt.s32.totalorder %s4337_s9, %s4970_s13 }
 0x309   :  { %p3320_p6 = scmp.ne.s32.totalorder %s4337_s9, %s3319_s30  ;;  %p3323_p8 = scmp.lt.s32.totalorder %s3986_s22, %s3319_s30 }
 0x30b   :  { %p3324_p9 = por %p3323_p8, %p3322_p7 }
 0x30d   :  { %p3325_p10 = pnand %p3324_p9, %p3320_p6 }
 0x30f   :  { %3328 = shalt.err (!%p3325_p10)  }
 0x310   :  { %701 = dma.vmem_to_hbm [thread:$0]  %s4329_s21, 16, %s4337_s9, [#allocation7 + $0xa] }
 0x311   :  { %3583 = dma.done.wait [#allocation6 + $0x3], 256 }
 0x312   :  { %3584 = vsyncadd [#allocation6 + $0x3], 4294967040 }
 0x313   :  { %3585 = dma.done.wait [#allocation6 + $0xb], 256 }
 0x314   :  { %3586 = vsyncadd [#allocation6 + $0xb], 4294967040  ;;  %s4359_s20 = sld [smem:[#allocation10 + $0x4]]  ;;  %s2256_s24 = scalar_lea.vmem [#allocation2], %s4325_s2 }
 0x315   :  { %s2257_s4 = scalar_lea.vmem %s2256_s24, 48 [#allocation2]  ;;  %2368 = vst [vmem:[%s2256_s24 + $0x2d] sm:$0x8] %v4237_v4  ;;  %s2258_s3 = scalar_lea.vmem [#allocation3], %s4325_s2 }
 0x316   :  { %2369 = vst [vmem:[%s2258_s3 + $0x2d] sm:$0x8] %v4235_v2  ;;  %s4365_s21 = sld [smem:[#allocation9 + $0x4]]  ;;  %s725_s0 = sshll.u32 %s2257_s4, 4  ;;  %s726_s0 = int_to_ptr.vmem [resolvable:$true] %s725_s0 }
 0x317   :  { %s2259_s28 = scalar_lea.vmem %s2258_s3, 48 [#allocation3]  ;;  %s2370_s9 = sshll.u32 %s4319_s27, 4 }
 0x318   :  { %s739_s16 = sshll.u32 %s2259_s28, 4  ;;  %s714_s15 = sadd.s32 %s2370_s9, %s4325_s2  ;;  %s4369_s16 = int_to_ptr.vmem [resolvable:$true] %s739_s16 }
 0x319   :  { %s2371_s10 = sshll.u32 %s714_s15, 4  ;;  %s3329_s24 = scalar_lea.vmem %s726_s0, 16 }
 0x31a   :  { %s716_s5 = scalar_lea.hbm %s4969_s12, %s2371_s10  ;;  %s4377_s18 = scalar_lea.hbm %s4970_s13, %s2371_s10 }
 0x31b   :  { %p3330_p11 = scmp.ne.s32.totalorder %s726_s0, %s3329_s24  ;;  %p3334_p12 = scmp.lt.s32.totalorder %s726_s0, %s3944_s17 }
 0x31c   :  { %p3335_p13 = scmp.lt.s32.totalorder %s3975_s1, %s3329_s24 }
 0x31e   :  { %p3336_p0 = por %p3335_p13, %p3334_p12 }
 0x320   :  { %p3337_p1 = pnand %p3336_p0, %p3330_p11 }
 0x322   :  { %3340 = shalt.err (!%p3337_p1)  }
 0x323   :  { %s3341_s27 = scalar_lea.hbm %s716_s5, 16  ;;  %p3344_p3 = scmp.lt.s32.totalorder %s716_s5, %s4969_s12 }
 0x324   :  { %p3342_p2 = scmp.ne.s32.totalorder %s716_s5, %s3341_s27  ;;  %p3345_p4 = scmp.lt.s32.totalorder %s3966_s29, %s3341_s27 }
 0x326   :  { %p3346_p5 = por %p3345_p4, %p3344_p3 }
 0x328   :  { %p3347_p6 = pnand %p3346_p5, %p3342_p2 }
 0x32a   :  { %3350 = shalt.err (!%p3347_p6)  }
 0x32b   :  { %728 = dma.vmem_to_hbm [thread:$0]  %s726_s0, 16, %s716_s5, [#allocation7 + $0x3] }
 0x32c   :  { %s3351_s3 = scalar_lea.vmem %s4369_s16, 16  ;;  %p3356_p8 = scmp.lt.s32.totalorder %s4369_s16, %s3946_s19 }
 0x32d   :  { %p3352_p7 = scmp.ne.s32.totalorder %s4369_s16, %s3351_s3  ;;  %p3357_p9 = scmp.lt.s32.totalorder %s3996_s25, %s3351_s3 }
 0x32f   :  { %p3358_p10 = por %p3357_p9, %p3356_p8 }
 0x331   :  { %p3359_p11 = pnand %p3358_p10, %p3352_p7 }
 0x333   :  { %3362 = shalt.err (!%p3359_p11)  }
 0x334   :  { %s3363_s28 = scalar_lea.hbm %s4377_s18, 16  ;;  %p3366_p13 = scmp.lt.s32.totalorder %s4377_s18, %s4970_s13 }
 0x335   :  { %p3364_p12 = scmp.ne.s32.totalorder %s4377_s18, %s3363_s28  ;;  %p3367_p0 = scmp.lt.s32.totalorder %s3986_s22, %s3363_s28 }
 0x337   :  { %p3368_p1 = por %p3367_p0, %p3366_p13 }
 0x339   :  { %p3369_p2 = pnand %p3368_p1, %p3364_p12 }
 0x33b   :  { %3372 = shalt.err (!%p3369_p2)  }
 0x33c   :  { %742 = dma.vmem_to_hbm [thread:$0]  %s4369_s16, 16, %s4377_s18, [#allocation7 + $0xb] }
 0x33d   :  { %3587 = dma.done.wait [#allocation6 + $0x4], 256 }
 0x33e   :  { %3588 = vsyncadd [#allocation6 + $0x4], 4294967040 }
 0x33f   :  { %3589 = dma.done.wait [#allocation6 + $0xc], 256 }
 0x340   :  { %3590 = vsyncadd [#allocation6 + $0xc], 4294967040  ;;  %s4399_s15 = sld [smem:[#allocation10 + $0x5]]  ;;  %s2268_s10 = scalar_lea.vmem [#allocation2], %s4365_s21 }
 0x341   :  { %s2269_s26 = scalar_lea.vmem %s2268_s10, 64 [#allocation2]  ;;  %2375 = vst [vmem:[%s2268_s10 + $0x3c] sm:$0x10] %v4237_v4  ;;  %s2270_s23 = scalar_lea.vmem [#allocation3], %s4365_s21 }
 0x342   :  { %2376 = vst [vmem:[%s2270_s23 + $0x3c] sm:$0x10] %v4235_v2  ;;  %s4405_s16 = sld [smem:[#allocation9 + $0x5]]  ;;  %s766_s5 = sshll.u32 %s2269_s26, 4  ;;  %s767_s5 = int_to_ptr.vmem [resolvable:$true] %s766_s5 }
 0x343   :  { %s2271_s30 = scalar_lea.vmem %s2270_s23, 64 [#allocation3]  ;;  %s2377_s18 = sshll.u32 %s4359_s20, 4 }
 0x344   :  { %s780_s14 = sshll.u32 %s2271_s30, 4  ;;  %s755_s24 = sadd.s32 %s2377_s18, %s4365_s21  ;;  %s4409_s14 = int_to_ptr.vmem [resolvable:$true] %s780_s14 }
 0x345   :  { %s2378_s27 = sshll.u32 %s755_s24, 4  ;;  %s3373_s10 = scalar_lea.vmem %s767_s5, 16 }
 0x346   :  { %s757_s3 = scalar_lea.hbm %s4969_s12, %s2378_s27  ;;  %s4417_s0 = scalar_lea.hbm %s4970_s13, %s2378_s27 }
 0x347   :  { %p3374_p3 = scmp.ne.s32.totalorder %s767_s5, %s3373_s10  ;;  %p3378_p4 = scmp.lt.s32.totalorder %s767_s5, %s3944_s17 }
 0x348   :  { %p3379_p5 = scmp.lt.s32.totalorder %s3975_s1, %s3373_s10 }
 0x34a   :  { %p3380_p6 = por %p3379_p5, %p3378_p4 }
 0x34c   :  { %p3381_p7 = pnand %p3380_p6, %p3374_p3 }
 0x34e   :  { %3384 = shalt.err (!%p3381_p7)  }
 0x34f   :  { %s3385_s20 = scalar_lea.hbm %s757_s3, 16  ;;  %p3388_p9 = scmp.lt.s32.totalorder %s757_s3, %s4969_s12 }
 0x350   :  { %p3386_p8 = scmp.ne.s32.totalorder %s757_s3, %s3385_s20  ;;  %p3389_p10 = scmp.lt.s32.totalorder %s3966_s29, %s3385_s20 }
 0x352   :  { %p3390_p11 = por %p3389_p10, %p3388_p9 }
 0x354   :  { %p3391_p12 = pnand %p3390_p11, %p3386_p8 }
 0x356   :  { %3394 = shalt.err (!%p3391_p12)  }
 0x357   :  { %769 = dma.vmem_to_hbm [thread:$0]  %s767_s5, 16, %s757_s3, [#allocation7 + $0x4] }
 0x358   :  { %s3395_s23 = scalar_lea.vmem %s4409_s14, 16  ;;  %p3400_p0 = scmp.lt.s32.totalorder %s4409_s14, %s3946_s19 }
 0x359   :  { %p3396_p13 = scmp.ne.s32.totalorder %s4409_s14, %s3395_s23  ;;  %p3401_p1 = scmp.lt.s32.totalorder %s3996_s25, %s3395_s23 }
 0x35b   :  { %p3402_p2 = por %p3401_p1, %p3400_p0 }
 0x35d   :  { %p3403_p3 = pnand %p3402_p2, %p3396_p13 }
 0x35f   :  { %3406 = shalt.err (!%p3403_p3)  }
 0x360   :  { %s3407_s30 = scalar_lea.hbm %s4417_s0, 16  ;;  %p3410_p5 = scmp.lt.s32.totalorder %s4417_s0, %s4970_s13 }
 0x361   :  { %p3408_p4 = scmp.ne.s32.totalorder %s4417_s0, %s3407_s30  ;;  %p3411_p6 = scmp.lt.s32.totalorder %s3986_s22, %s3407_s30 }
 0x363   :  { %p3412_p7 = por %p3411_p6, %p3410_p5 }
 0x365   :  { %p3413_p8 = pnand %p3412_p7, %p3408_p4 }
 0x367   :  { %3416 = shalt.err (!%p3413_p8)  }
 0x368   :  { %783 = dma.vmem_to_hbm [thread:$0]  %s4409_s14, 16, %s4417_s0, [#allocation7 + $0xc] }
 0x369   :  { %3591 = dma.done.wait [#allocation6 + $0x5], 256 }
 0x36a   :  { %3592 = vsyncadd [#allocation6 + $0x5], 4294967040 }
 0x36b   :  { %3593 = dma.done.wait [#allocation6 + $0xd], 256 }
 0x36c   :  { %3594 = vsyncadd [#allocation6 + $0xd], 4294967040  ;;  %s4439_s24 = sld [smem:[#allocation10 + $0x6]]  ;;  %s2280_s27 = scalar_lea.vmem [#allocation2], %s4405_s16 }
 0x36d   :  { %s2281_s2 = scalar_lea.vmem %s2280_s27, 80 [#allocation2]  ;;  %2382 = vst [vmem:[%s2280_s27 + $0x4b] sm:$0x20] %v4237_v4  ;;  %s2282_s4 = scalar_lea.vmem [#allocation3], %s4405_s16 }
 0x36e   :  { %2383 = vst [vmem:[%s2282_s4 + $0x4b] sm:$0x20] %v4235_v2  ;;  %s4445_s14 = sld [smem:[#allocation9 + $0x6]]  ;;  %s807_s3 = sshll.u32 %s2281_s2, 4  ;;  %s808_s3 = int_to_ptr.vmem [resolvable:$true] %s807_s3 }
 0x36f   :  { %s2283_s28 = scalar_lea.vmem %s2282_s4, 80 [#allocation3]  ;;  %s2384_s0 = sshll.u32 %s4399_s15, 4 }
 0x370   :  { %s821_s9 = sshll.u32 %s2283_s28, 4  ;;  %s796_s10 = sadd.s32 %s2384_s0, %s4405_s16  ;;  %s4449_s9 = int_to_ptr.vmem [resolvable:$true] %s821_s9 }
 0x371   :  { %s2385_s20 = sshll.u32 %s796_s10, 4  ;;  %s3417_s27 = scalar_lea.vmem %s808_s3, 16 }
 0x372   :  { %s798_s23 = scalar_lea.hbm %s4969_s12, %s2385_s20  ;;  %s4457_s5 = scalar_lea.hbm %s4970_s13, %s2385_s20 }
 0x373   :  { %p3418_p9 = scmp.ne.s32.totalorder %s808_s3, %s3417_s27  ;;  %p3422_p10 = scmp.lt.s32.totalorder %s808_s3, %s3944_s17 }
 0x374   :  { %p3423_p11 = scmp.lt.s32.totalorder %s3975_s1, %s3417_s27 }
 0x376   :  { %p3424_p12 = por %p3423_p11, %p3422_p10 }
 0x378   :  { %p3425_p13 = pnand %p3424_p12, %p3418_p9 }
 0x37a   :  { %3428 = shalt.err (!%p3425_p13)  }
 0x37b   :  { %s3429_s15 = scalar_lea.hbm %s798_s23, 16  ;;  %p3432_p1 = scmp.lt.s32.totalorder %s798_s23, %s4969_s12 }
 0x37c   :  { %p3430_p0 = scmp.ne.s32.totalorder %s798_s23, %s3429_s15  ;;  %p3433_p2 = scmp.lt.s32.totalorder %s3966_s29, %s3429_s15 }
 0x37e   :  { %p3434_p3 = por %p3433_p2, %p3432_p1 }
 0x380   :  { %p3435_p4 = pnand %p3434_p3, %p3430_p0 }
 0x382   :  { %3438 = shalt.err (!%p3435_p4)  }
 0x383   :  { %810 = dma.vmem_to_hbm [thread:$0]  %s808_s3, 16, %s798_s23, [#allocation7 + $0x5] }
 0x384   :  { %s3439_s4 = scalar_lea.vmem %s4449_s9, 16  ;;  %p3444_p6 = scmp.lt.s32.totalorder %s4449_s9, %s3946_s19 }
 0x385   :  { %p3440_p5 = scmp.ne.s32.totalorder %s4449_s9, %s3439_s4  ;;  %p3445_p7 = scmp.lt.s32.totalorder %s3996_s25, %s3439_s4 }
 0x387   :  { %p3446_p8 = por %p3445_p7, %p3444_p6 }
 0x389   :  { %p3447_p9 = pnand %p3446_p8, %p3440_p5 }
 0x38b   :  { %3450 = shalt.err (!%p3447_p9)  }
 0x38c   :  { %s3451_s28 = scalar_lea.hbm %s4457_s5, 16  ;;  %p3454_p11 = scmp.lt.s32.totalorder %s4457_s5, %s4970_s13 }
 0x38d   :  { %p3452_p10 = scmp.ne.s32.totalorder %s4457_s5, %s3451_s28  ;;  %p3455_p12 = scmp.lt.s32.totalorder %s3986_s22, %s3451_s28 }
 0x38f   :  { %p3456_p13 = por %p3455_p12, %p3454_p11 }
 0x391   :  { %p3457_p0 = pnand %p3456_p13, %p3452_p10 }
 0x393   :  { %3460 = shalt.err (!%p3457_p0)  }
 0x394   :  { %824 = dma.vmem_to_hbm [thread:$0]  %s4449_s9, 16, %s4457_s5, [#allocation7 + $0xd] }
 0x395   :  { %3595 = dma.done.wait [#allocation6 + $0x6], 256 }
 0x396   :  { %3596 = vsyncadd [#allocation6 + $0x6], 4294967040 }
 0x397   :  { %3597 = dma.done.wait [#allocation6 + $0xe], 256 }
 0x398   :  { %3598 = vsyncadd [#allocation6 + $0xe], 4294967040  ;;  %s4479_s10 = sld [smem:[#allocation10 + $0x7]]  ;;  %s2292_s20 = scalar_lea.vmem [#allocation2], %s4445_s14 }
 0x399   :  { %s2293_s21 = scalar_lea.vmem %s2292_s20, 96 [#allocation2]  ;;  %2389 = vst [vmem:[%s2292_s20 + $0x5a] sm:$0x40] %v4237_v4  ;;  %s2294_s26 = scalar_lea.vmem [#allocation3], %s4445_s14 }
 0x39a   :  { %2390 = vst [vmem:[%s2294_s26 + $0x5a] sm:$0x40] %v4235_v2  ;;  %s4485_s9 = sld [smem:[#allocation9 + $0x7]]  ;;  %s848_s23 = sshll.u32 %s2293_s21, 4  ;;  %s849_s23 = int_to_ptr.vmem [resolvable:$true] %s848_s23 }
 0x39b   :  { %s2295_s30 = scalar_lea.vmem %s2294_s26, 96 [#allocation3]  ;;  %s2391_s5 = sshll.u32 %s4439_s24, 4 }
 0x39c   :  { %s862_s18 = sshll.u32 %s2295_s30, 4  ;;  %s837_s27 = sadd.s32 %s2391_s5, %s4445_s14  ;;  %s4489_s18 = int_to_ptr.vmem [resolvable:$true] %s862_s18 }
 0x39d   :  { %s2392_s15 = sshll.u32 %s837_s27, 4  ;;  %s3461_s20 = scalar_lea.vmem %s849_s23, 16 }
 0x39e   :  { %s839_s4 = scalar_lea.hbm %s4969_s12, %s2392_s15  ;;  %s4497_s3 = scalar_lea.hbm %s4970_s13, %s2392_s15 }
 0x39f   :  { %p3462_p1 = scmp.ne.s32.totalorder %s849_s23, %s3461_s20  ;;  %p3466_p2 = scmp.lt.s32.totalorder %s849_s23, %s3944_s17 }
 0x3a0   :  { %p3467_p3 = scmp.lt.s32.totalorder %s3975_s1, %s3461_s20 }
 0x3a2   :  { %p3468_p4 = por %p3467_p3, %p3466_p2 }
 0x3a4   :  { %p3469_p5 = pnand %p3468_p4, %p3462_p1 }
 0x3a6   :  { %3472 = shalt.err (!%p3469_p5)  }
 0x3a7   :  { %s3473_s24 = scalar_lea.hbm %s839_s4, 16  ;;  %p3476_p7 = scmp.lt.s32.totalorder %s839_s4, %s4969_s12 }
 0x3a8   :  { %p3474_p6 = scmp.ne.s32.totalorder %s839_s4, %s3473_s24  ;;  %p3477_p8 = scmp.lt.s32.totalorder %s3966_s29, %s3473_s24 }
 0x3aa   :  { %p3478_p9 = por %p3477_p8, %p3476_p7 }
 0x3ac   :  { %p3479_p10 = pnand %p3478_p9, %p3474_p6 }
 0x3ae   :  { %3482 = shalt.err (!%p3479_p10)  }
 0x3af   :  { %851 = dma.vmem_to_hbm [thread:$0]  %s849_s23, 16, %s839_s4, [#allocation7 + $0x6] }
 0x3b0   :  { %s3483_s26 = scalar_lea.vmem %s4489_s18, 16  ;;  %p3488_p12 = scmp.lt.s32.totalorder %s4489_s18, %s3946_s19 }
 0x3b1   :  { %p3484_p11 = scmp.ne.s32.totalorder %s4489_s18, %s3483_s26  ;;  %p3489_p13 = scmp.lt.s32.totalorder %s3996_s25, %s3483_s26 }
 0x3b3   :  { %p3490_p0 = por %p3489_p13, %p3488_p12 }
 0x3b5   :  { %p3491_p1 = pnand %p3490_p0, %p3484_p11 }
 0x3b7   :  { %3494 = shalt.err (!%p3491_p1)  }
 0x3b8   :  { %s3495_s30 = scalar_lea.hbm %s4497_s3, 16  ;;  %p3498_p3 = scmp.lt.s32.totalorder %s4497_s3, %s4970_s13 }
 0x3b9   :  { %p3496_p2 = scmp.ne.s32.totalorder %s4497_s3, %s3495_s30  ;;  %p3499_p4 = scmp.lt.s32.totalorder %s3986_s22, %s3495_s30 }
 0x3bb   :  { %p3500_p5 = por %p3499_p4, %p3498_p3 }
 0x3bd   :  { %p3501_p6 = pnand %p3500_p5, %p3496_p2 }
 0x3bf   :  { %3504 = shalt.err (!%p3501_p6)  }
 0x3c0   :  { %865 = dma.vmem_to_hbm [thread:$0]  %s4489_s18, 16, %s4497_s3, [#allocation7 + $0xe] }
 0x3c1   :  { %3599 = dma.done.wait [#allocation6 + $0x7], 256 }
 0x3c2   :  { %3600 = vsyncadd [#allocation6 + $0x7], 4294967040 }
 0x3c3   :  { %3601 = dma.done.wait [#allocation6 + $0xf], 256 }
 0x3c4   :  { %3602 = vsyncadd [#allocation6 + $0xf], 4294967040  ;;  %s2304_s27 = scalar_lea.vmem [#allocation2], %s4485_s9  ;;  %v3659_v6 = vmov 1966171168   ;;  %v4524_v8 = vshrl.u32 %v299_v42, 7  ;;  %v924_v37 = vcombine.high %v4233_v1, %v4233_v1 }
 0x3c5   :  { %2396 = vst [vmem:[%s2304_s27 + $0x69] sm:$0x80] %v4237_v4  ;;  %v926_v7 = vunpack.c.l.s4 %v3659_v6  ;;  %v1044_v11 = vld [vmem:[%s4964_s7 + $0x78] sm:$0xff]  ;;  %v1043_v12 = vld [vmem:[%s4964_s7 + $0x70] sm:$0xff]  ;;  %v1042_v15 = vld [vmem:[%s4964_s7 + $0x68] sm:$0xff]  ;;  %vm1571_vm3 = vcmask 1043456  }
 0x3c6   :  { %v4538_v14 = vsub.s32 0, %v4524_v8  ;;  %2619 = vmatprep.subr.mxu1 %v1044_v11  ;;  %v1041_v17 = vld [vmem:[%s4964_s7 + $0x60] sm:$0xff]  ;;  %v1040_v20 = vld [vmem:[%s4964_s7 + $0x58] sm:$0xff]  ;;  %v1039_v22 = vld [vmem:[%s4964_s7 + $0x50] sm:$0xff]  ;;  %s2306_s15 = scalar_lea.vmem [#allocation3], %s4485_s9  ;;  %s1193_s16 = sld [smem:[#allocation11]] }
 0x3c7   :  { %v927_v9 = vunpack.c.0.s8 %v926_v7  ;;  %2620 = vmatpush3.msra.mxu1 %v1044_v11  ;;  %v1038_v23 = vld [vmem:[%s4964_s7 + $0x48] sm:$0xff]  ;;  %v1037_v24 = vld [vmem:[%s4964_s7 + $0x40] sm:$0xff]  ;;  %v1036_v25 = vld [vmem:[%s4964_s7 + $0x38] sm:$0xff]  ;;  %2397 = vst [vmem:[%s2306_s15 + $0x69] sm:$0x80] %v4235_v2  ;;  %s2401_s2 = sld [smem:[#allocation11 + $0x1]] }
 0x3c8   :  { %2621 = vmatprep.subr.mxu1 %v1043_v12  ;;  %v1035_v26 = vld [vmem:[%s4964_s7 + $0x30] sm:$0xff]  ;;  %v1034_v27 = vld [vmem:[%s4964_s7 + $0x28] sm:$0xff]  ;;  %v1033_v29 = vld [vmem:[%s4964_s7 + $0x20] sm:$0xff]  ;;  %s2402_s4 = sld [smem:[#allocation11 + $0x2]]  ;;  %vm1203_vm6 = vcmask 31744  }
 0x3c9   :  { %v4527_v10 = vsub.s32 %v927_v9, %v4524_v8  ;;  %2622 = vmatpush3.msra.mxu1 %v1043_v12  ;;  %v1032_v30 = vld [vmem:[%s4964_s7 + $0x18] sm:$0xff]  ;;  %v1031_v32 = vld [vmem:[%s4964_s7 + $0x10] sm:$0xff]  ;;  %v1030_v33 = vld [vmem:[%s4964_s7 + $0x8] sm:$0xff]  ;;  %s4617_s28 = sld [smem:[#allocation11 + $0x4]] }
 0x3ca   :  { %2623 = vmatprep.subr.mxu1 %v1042_v15  ;;  %v1029_v39 = vld [vmem:[%s4964_s7] sm:$0xff]  ;;  %s4626_s0 = sld [smem:[#allocation11 + $0x5]] }
 0x3cb   :  { %v931_v13 = vrot.slane %v4233_v1, %v4527_v10  ;;  %2624 = vmatpush3.msra.mxu1 %v1042_v15  ;;  %v938_v45 = vrot.slane %v924_v37, %v4527_v10  ;;  %s4629_s3 = sld [smem:[#allocation11 + $0x6]] }
 0x3cc   :  { %v907_v19 = vld [vmem:[#allocation2] sm:$0xff]  ;;  %2625 = vmatprep.subr.mxu1 %v1041_v17  ;;  %v908_v35 = vld [vmem:[#allocation2 + $0x8] sm:$0xff]  ;;  %v909_v38 = vld [vmem:[#allocation2 + $0x10] sm:$0xff]  ;;  %s4650_s20 = sld [smem:[#allocation11 + $0x7]] }
 0x3cd   :  { %v947_v16 = vrot.slane %v931_v13, %v4527_v10  ;;  %2626 = vmatpush3.msra.mxu1 %v1041_v17  ;;  %v939_v28 = vcombine.high %v931_v13, %v931_v13  ;;  %v910_v42 = vld [vmem:[#allocation2 + $0x18] sm:$0xff]  ;;  %v911_v46 = vld [vmem:[#allocation2 + $0x20] sm:$0xff]  ;;  %v912_v49 = vld [vmem:[#allocation2 + $0x28] sm:$0xff]  ;;  %v954_v51 = vrot.slane %v938_v45, %v4527_v10  ;;  %v940_v52 = vcombine.high %v938_v45, %v938_v45 }
 0x3ce   :  { %2627 = vmatprep.subr.mxu1 %v1040_v20  ;;  %v913_v53 = vld [vmem:[#allocation2 + $0x30] sm:$0xff]  ;;  %v914_v56 = vld [vmem:[#allocation2 + $0x38] sm:$0xff]  ;;  %v915_v59 = vld [vmem:[#allocation2 + $0x40] sm:$0xff] }
 0x3cf   :  { %v976_v18 = vrot.slane %v947_v16, %v4538_v14  ;;  %2628 = vmatpush3.msra.mxu1 %v1040_v20  ;;  %v961_v31 = vrot.slane %v939_v28, %v4527_v10  ;;  %v969_v34 = vcombine.high %v947_v16, %v947_v16  ;;  %v992_v57 = vrot.slane %v954_v51, %v4538_v14  ;;  %v916_v62 = vld [vmem:[#allocation2 + $0x48] sm:$0xff]  ;;  %v917_v1 = vld [vmem:[#allocation2 + $0x50] sm:$0xff]  ;;  %v918_v6 = vld [vmem:[#allocation2 + $0x58] sm:$0xff] }
 0x3d0   :  { %2629 = vmatprep.subr.mxu1 %v1039_v22  ;;  %v968_v58 = vrot.slane %v940_v52, %v4527_v10  ;;  %v970_v0 = vcombine.high %v954_v51, %v954_v51  ;;  %v919_v11 = vld [vmem:[#allocation2 + $0x60] sm:$0xff]  ;;  %v920_v13 = vld [vmem:[#allocation2 + $0x68] sm:$0xff]  ;;  %v921_v16 = vld [vmem:[#allocation2 + $0x70] sm:$0xff] }
 0x3d1   :  { %v1013_v21 = vmul.f32 %v976_v18, %v907_v19  ;;  %2630 = vmatpush3.msra.mxu1 %v1039_v22  ;;  %v980_v36 = vrot.slane %v961_v31, %v4538_v14  ;;  %v1014_v40 = vmul.f32 %v976_v18, %v908_v35  ;;  %v984_v43 = vrot.slane %v969_v34, %v4538_v14  ;;  %v922_v19 = vld [vmem:[#allocation2 + $0x78] sm:$0xff] }
 0x3d2   :  { %2631 = vmatprep.subr.mxu1 %v1038_v23  ;;  %v971_v44 = vcombine.high %v961_v31, %v961_v31  ;;  %v1021_v61 = vmul.f32 %v992_v57, %v915_v59  ;;  %v996_v63 = vrot.slane %v968_v58, %v4538_v14  ;;  %v1022_v4 = vmul.f32 %v992_v57, %v916_v62 }
 0x3d3   :  { %2651 = vmatprep.mubr.f32.mxu1 %v1013_v21  ;;  %2632 = vmatpush3.msra.mxu1 %v1038_v23  ;;  %v1015_v41 = vmul.f32 %v980_v36, %v909_v38  ;;  %v1016_v47 = vmul.f32 %v980_v36, %v910_v42  ;;  %v1017_v48 = vmul.f32 %v984_v43, %v911_v46  ;;  %v1522_v21 = vld [vmem:[%s4965_s8] sm:$0xf]  ;;  %v1194_v22 = vstv %s1193_s16  ;;  %s4609_s8 = sld [smem:[#allocation11 + $0x3]] }
 0x3d4   :  { %2633 = vmatprep.subr.mxu1 %v1037_v24  ;;  %v988_v50 = vrot.slane %v971_v44, %v4538_v14  ;;  %v1018_v54 = vmul.f32 %v984_v43, %v912_v49  ;;  %v1023_v5 = vmul.f32 %v996_v63, %v917_v1  ;;  %v1000_v7 = vrot.slane %v970_v0, %v4538_v14 }
 0x3d5   :  { %2634 = vmatpush3.msra.mxu1 %v1037_v24  ;;  %v972_v9 = vcombine.high %v968_v58, %v968_v58  ;;  %v1024_v10 = vmul.f32 %v996_v63, %v918_v6  ;;  %2675 = vmatprep.subr.msk.mxu0 %vm1571_vm3, %v1522_v21  ;;  %v1234_v23 = vstv %s2401_s2  ;;  %vm1195_vm5 = vcmp.lt.s32.totalorder %v4524_v8, %v1194_v22 }
 0x3d6   :  { %2635 = vmatprep.subr.mxu1 %v1036_v25  ;;  %v1019_v55 = vmul.f32 %v988_v50, %v913_v53  ;;  %v1020_v60 = vmul.f32 %v988_v50, %v914_v56  ;;  %v1025_v12 = vmul.f32 %v1000_v7, %v919_v11  ;;  %v1026_v17 = vmul.f32 %v1000_v7, %v920_v13 }
 0x3d7   :  { %2636 = vmatpush3.msra.mxu1 %v1036_v25  ;;  %v1004_v15 = vrot.slane %v972_v9, %v4538_v14  ;;  %2676 = vmatpush3.msk.msra.mxu0 %vm1571_vm3, %v1522_v21  ;;  %v4606_v14 = vadd.s32 8, %v4524_v8  ;;  %vm1235_vm8 = vcmp.lt.s32.totalorder %v4524_v8, %v1234_v23  ;;  %v1390_v56 = vstv %s4626_s0 }
 0x3d8   :  { %2637 = vmatprep.subr.mxu1 %v1035_v26  ;;  %2701 = vmatprep.subr.mxu0 %v3641_v3  ;;  %v1429_v57 = vstv %s4629_s3  ;;  %vm4672_vm1 = vcmp.lt.s32.totalorder %v4524_v8, %v1390_v56  ;;  %s2305_s3 = scalar_lea.vmem %s2304_s27, 112 [#allocation2] }
 0x3d9   :  { %2638 = vmatpush3.msra.mxu1 %v1035_v26  ;;  %v1027_v18 = vmul.f32 %v1004_v15, %v921_v16  ;;  %v1028_v20 = vmul.f32 %v1004_v15, %v922_v19  ;;  %vm1196_vm4 = vcmp.lt.s32.totalorder %v4606_v14, %v1194_v22  ;;  %vm1236_vm7 = vcmp.lt.s32.totalorder %v4606_v14, %v1234_v23  ;;  %s889_s14 = sshll.u32 %s2305_s3, 4  ;;  %s890_s14 = int_to_ptr.vmem [resolvable:$true] %s889_s14 }
 0x3da   :  { %2639 = vmatprep.subr.mxu1 %v1034_v27  ;;  %v1312_v36 = vstv %s4609_s8  ;;  %vm4667_vm15 = vcmp.lt.s32.totalorder %v4606_v14, %v1390_v56  ;;  %vm4677_vm2 = vcmp.lt.s32.totalorder %v4606_v14, %v1429_v57  ;;  %vm4686_vm3 = vcmp.lt.s32.totalorder %v4524_v8, %v1429_v57  ;;  %s3505_s5 = scalar_lea.vmem %s890_s14, 16  ;;  %p3510_p8 = scmp.lt.s32.totalorder %s890_s14, %s3944_s17 }
 0x3db   :  { %2640 = vmatpush3.msra.mxu1 %v1034_v27  ;;  %v1273_v27 = vstv %s2402_s4  ;;  %vm1314_vm11 = vcmp.lt.s32.totalorder %v4606_v14, %v1312_v36  ;;  %vm1313_vm12 = vcmp.lt.s32.totalorder %v4524_v8, %v1312_v36  ;;  %v1468_v22 = vstv %s4650_s20  ;;  %p3506_p7 = scmp.ne.s32.totalorder %s890_s14, %s3505_s5  ;;  %p3511_p9 = scmp.lt.s32.totalorder %s3975_s1, %s3505_s5 }
 0x3dc   :  { %2641 = vmatprep.subr.mxu1 %v1033_v29  ;;  %vm1275_vm9 = vcmp.lt.s32.totalorder %v4606_v14, %v1273_v27  ;;  %vm1274_vm10 = vcmp.lt.s32.totalorder %v4524_v8, %v1273_v27 }
 0x3dd   :  { %2642 = vmatpush3.msra.mxu1 %v1033_v29  ;;  %p3512_p10 = por %p3511_p9, %p3510_p8 }
 0x3de   :  { %2643 = vmatprep.subr.mxu1 %v1032_v30 }
 0x3df   :  { %2644 = vmatpush3.msra.mxu1 %v1032_v30  ;;  %p3513_p11 = pnand %p3512_p10, %p3506_p7 }
 0x3e0   :  { %2645 = vmatprep.subr.mxu1 %v1031_v32 }
 0x3e1   :  { %2646 = vmatpush3.msra.mxu1 %v1031_v32 }
 0x3e2   :  { %2647 = vmatprep.subr.mxu1 %v1030_v33 }
 0x3e3   :  { %2648 = vmatpush3.msra.mxu1 %v1030_v33 }
 0x3e4   :  { %2649 = vmatprep.subr.mxu1 %v1029_v39 }
 0x3e5   :  { %2650 = vmatpush3.msra.mxu1 %v1029_v39 }
 0x3e6   :  { %2652 = vmatmul.mubr.f32.vlgmr.msra.gmra.mxu1 %v1014_v40 }
 0x3e7   :  { %2654 = vmatprep.mubr.f32.mxu1 %v1015_v41 }
 0x3ea   :  { %2655 = vmatmul.mubr.f32.gmra.mxu1 %v1016_v47  ;;  %v1351_v47 = vstv %s4617_s28 }
 0x3eb   :  { %2657 = vmatprep.mubr.f32.mxu1 %v1017_v48  ;;  %vm1353_vm13 = vcmp.lt.s32.totalorder %v4606_v14, %v1351_v47  ;;  %vm1352_vm14 = vcmp.lt.s32.totalorder %v4524_v8, %v1351_v47 }
 0x3ee   :  { %2658 = vmatmul.mubr.f32.gmra.mxu1 %v1018_v54 }
 0x3ef   :  { %2660 = vmatprep.mubr.f32.mxu1 %v1019_v55 }
 0x3f2   :  { %2661 = vmatmul.mubr.f32.gmra.mxu1 %v1020_v60 }
 0x3f3   :  { %2663 = vmatprep.mubr.f32.mxu1 %v1021_v61 }
 0x3f6   :  { %2664 = vmatmul.mubr.f32.gmra.mxu1 %v1022_v4 }
 0x3f7   :  { %2666 = vmatprep.mubr.f32.mxu1 %v1023_v5 }
 0x3fa   :  { %2667 = vmatmul.mubr.f32.gmra.mxu1 %v1024_v10 }
 0x3fb   :  { %2669 = vmatprep.mubr.f32.mxu1 %v1025_v12 }
 0x3fe   :  { %2670 = vmatmul.mubr.f32.gmra.mxu1 %v1026_v17 }
 0x3ff   :  { %2672 = vmatprep.mubr.f32.mxu1 %v1027_v18 }
 0x402   :  { %2673 = vmatmul.mubr.f32.gmra.mxu1 %v1028_v20 }
 0x4a6   :  { %v2653_v24 = vpop.f32.mrf.mxu1 }
 0x4a7   :  { %v4612_v25 = vsel %vm1196_vm4, %v2653_v24, -1e+30  ;;  %vm4702_vm4 = vcmp.lt.s32.totalorder %v4606_v14, %v1468_v22 }
 0x4a8   :  { %v1111_v26 = vpop.f32.mrf.mxu1  ;;  %v1205_v28 = vsel %vm1203_vm6, %v4612_v25, -inf }
 0x4a9   :  { %v4615_v2 = vsel %vm1195_vm5, %v1111_v26, -1e+30  ;;  %vm4721_vm5 = vcmp.lt.s32.totalorder %v4524_v8, %v1468_v22 }
 0x4aa   :  { %v1204_v29 = vsel %vm1203_vm6, %v4615_v2, -inf  ;;  %v2656_v30 = vpop.f32.mrf.mxu1 }
 0x4ab   :  { %v1206_v31 = vmax.f32 %v1204_v29, %v1205_v28  ;;  %v4624_v32 = vsel %vm1236_vm7, %v2656_v30, -1e+30 }
 0x4ac   :  { %v1121_v33 = vpop.f32.mrf.mxu1  ;;  %v1244_v37 = vsel %vm1203_vm6, %v4624_v32, -inf }
 0x4ad   :  { %v1207_v34 = vrot.slane %v1206_v31, 4  ;;  %v4631_v35 = vsel %vm1235_vm8, %v1121_v33, -1e+30 }
 0x4ae   :  { %v1243_v38 = vsel %vm1203_vm6, %v4631_v35, -inf  ;;  %v2659_v39 = vpop.f32.mrf.mxu1 }
 0x4af   :  { %v1208_v40 = vmax.f32 %v1206_v31, %v1207_v34  ;;  %v1245_v41 = vmax.f32 %v1243_v38, %v1244_v37  ;;  %v4639_v42 = vsel %vm1275_vm9, %v2659_v39, -1e+30 }
 0x4b0   :  { %v1131_v43 = vpop.f32.mrf.mxu1  ;;  %v1283_v48 = vsel %vm1203_vm6, %v4639_v42, -inf }
 0x4b1   :  { %v1209_v44 = vrot.slane %v1208_v40, 2  ;;  %v1246_v45 = vrot.slane %v1245_v41, 4  ;;  %v4642_v46 = vsel %vm1274_vm10, %v1131_v43, -1e+30 }
 0x4b2   :  { %v1282_v49 = vsel %vm1203_vm6, %v4642_v46, -inf  ;;  %v2662_v50 = vpop.f32.mrf.mxu1 }
 0x4b3   :  { %v1210_v51 = vmax.f32 %v1208_v40, %v1209_v44  ;;  %v1247_v52 = vmax.f32 %v1245_v41, %v1246_v45  ;;  %v1284_v53 = vmax.f32 %v1282_v49, %v1283_v48  ;;  %v4652_v54 = vsel %vm1314_vm11, %v2662_v50, -1e+30 }
 0x4b4   :  { %v1141_v55 = vpop.f32.mrf.mxu1  ;;  %v1322_v62 = vsel %vm1203_vm6, %v4652_v54, -inf }
 0x4b5   :  { %v1211_v58 = vrot.slane %v1210_v51, 1  ;;  %v1248_v59 = vrot.slane %v1247_v52, 2  ;;  %v1285_v60 = vrot.slane %v1284_v53, 4  ;;  %v4657_v61 = vsel %vm1313_vm12, %v1141_v55, -1e+30 }
 0x4b6   :  { %v1321_v63 = vsel %vm1203_vm6, %v4657_v61, -inf  ;;  %v2665_v0 = vpop.f32.mrf.mxu1 }
 0x4b7   :  { %v1212_v1 = vmax.f32 %v1210_v51, %v1211_v58  ;;  %v1249_v4 = vmax.f32 %v1247_v52, %v1248_v59  ;;  %v1286_v5 = vmax.f32 %v1284_v53, %v1285_v60  ;;  %v1323_v6 = vmax.f32 %v1321_v63, %v1322_v62 }
 0x4b8   :  { %v4664_v7 = vsel %vm1353_vm13, %v2665_v0, -1e+30  ;;  %v1151_v9 = vpop.f32.mrf.mxu1 }
 0x4b9   :  { %v1213_v13 = vsub.f32 %v4615_v2, %v1212_v1  ;;  %v1214_v15 = vsub.f32 %v4612_v25, %v1212_v1  ;;  %v1250_v16 = vrot.slane %v1249_v4, 1  ;;  %v1287_v17 = vrot.slane %v1286_v5, 2 }
 0x4ba   :  { %v1324_v18 = vrot.slane %v1323_v6, 4  ;;  %v4683_v19 = vsel %vm1352_vm14, %v1151_v9, -1e+30  ;;  %v2668_v20 = vpop.f32.mrf.mxu1  ;;  %v1361_v25 = vsel %vm1203_vm6, %v4664_v7, -inf }
 0x4bb   :  { %v1215_v23 = vmul.f32 1.442695, %v1213_v13  ;;  %v1217_v24 = vmul.f32 1.442695, %v1214_v15  ;;  %v1251_v26 = vmax.f32 %v1249_v4, %v1250_v16  ;;  %v1288_v27 = vmax.f32 %v1286_v5, %v1287_v17 }
 0x4bc   :  { %v1325_v28 = vmax.f32 %v1323_v6, %v1324_v18  ;;  %v1360_v2 = vsel %vm1203_vm6, %v4683_v19, -inf  ;;  %v4697_v29 = vsel %vm4667_vm15, %v2668_v20, -1e+30  ;;  %v1161_v30 = vpop.f32.mrf.mxu1 }
 0x4bd   :  { %2761 = vpow2.f32 %v1215_v23  ;;  %v1252_v31 = vsub.f32 %v4631_v35, %v1251_v26  ;;  %v1253_v33 = vsub.f32 %v4624_v32, %v1251_v26  ;;  %v1289_v34 = vrot.slane %v1288_v27, 1 }
 0x4be   :  { %2763 = vpow2.f32 %v1217_v24  ;;  %v1326_v36 = vrot.slane %v1325_v28, 2  ;;  %v1362_v37 = vmax.f32 %v1360_v2, %v1361_v25  ;;  %v2671_v38 = vpop.f32.mrf.mxu1  ;;  %v4708_v44 = vsel %vm4672_vm1, %v1161_v30, -1e+30 }
 0x4bf   :  { %v1254_v40 = vmul.f32 1.442695, %v1252_v31  ;;  %v1256_v41 = vmul.f32 1.442695, %v1253_v33  ;;  %v1290_v43 = vmax.f32 %v1288_v27, %v1289_v34  ;;  %v1400_v32 = vsel %vm1203_vm6, %v4697_v29, -inf }
 0x4c0   :  { %v1327_v35 = vmax.f32 %v1325_v28, %v1326_v36  ;;  %v1363_v45 = vrot.slane %v1362_v37, 4  ;;  %v1399_v47 = vsel %vm1203_vm6, %v4708_v44, -inf  ;;  %v1171_v48 = vpop.f32.mrf.mxu1  ;;  %v4718_v53 = vsel %vm4677_vm2, %v2671_v38, -1e+30 }
 0x4c1   :  { %2765 = vpow2.f32 %v1254_v40  ;;  %v1291_v14 = vsub.f32 %v4642_v46, %v1290_v43  ;;  %v1292_v49 = vsub.f32 %v4639_v42, %v1290_v43  ;;  %v1401_v50 = vmax.f32 %v1399_v47, %v1400_v32 }
 0x4c2   :  { %2767 = vpow2.f32 %v1256_v41  ;;  %v1328_v51 = vrot.slane %v1327_v35, 1  ;;  %v1364_v52 = vmax.f32 %v1362_v37, %v1363_v45  ;;  %v2674_v55 = vpop.f32.mrf.mxu1  ;;  %v4727_v42 = vsel %vm4686_vm3, %v1171_v48, -1e+30 }
 0x4c3   :  { %v1293_v56 = vmul.f32 1.442695, %v1291_v14  ;;  %v1295_v57 = vmul.f32 1.442695, %v1292_v49  ;;  %v1402_v58 = vrot.slane %v1401_v50, 4  ;;  %v1439_v1 = vsel %vm1203_vm6, %v4718_v53, -inf }
 0x4c4   :  { %v1329_v46 = vmax.f32 %v1327_v35, %v1328_v51  ;;  %v1365_v60 = vrot.slane %v1364_v52, 2  ;;  %v4731_v62 = vsel %vm4702_vm4, %v2674_v55, -1e+30  ;;  %v1181_v63 = vpop.f32.mrf.mxu1  ;;  %v1438_v8 = vsel %vm1203_vm6, %v4727_v42, -inf }
 0x4c5   :  { %2769 = vpow2.f32 %v1293_v56  ;;  %v1403_v0 = vmax.f32 %v1401_v50, %v1402_v58  ;;  %v1440_v11 = vmax.f32 %v1438_v8, %v1439_v1  ;;  %v1478_v10 = vsel %vm1203_vm6, %v4731_v62, -inf }
 0x4c6   :  { %2771 = vpow2.f32 %v1295_v57  ;;  %v1330_v4 = vsub.f32 %v4657_v61, %v1329_v46  ;;  %v1331_v5 = vsub.f32 %v4652_v54, %v1329_v46  ;;  %v1366_v6 = vmax.f32 %v1364_v52, %v1365_v60 }
 0x4c7   :  { %v1404_v9 = vrot.slane %v1403_v0, 2  ;;  %v4743_v12 = vsel %vm4721_vm5, %v1181_v63, -1e+30  ;;  %v1441_v61 = vrot.slane %v1440_v11, 4 }
 0x4c8   :  { %v1332_v13 = vmul.f32 1.442695, %v1330_v4  ;;  %v1334_v15 = vmul.f32 1.442695, %v1331_v5  ;;  %v1367_v16 = vrot.slane %v1366_v6, 1  ;;  %v1477_v17 = vsel %vm1203_vm6, %v4743_v12, -inf }
 0x4c9   :  { %v1405_v18 = vmax.f32 %v1403_v0, %v1404_v9  ;;  %v1479_v20 = vmax.f32 %v1477_v17, %v1478_v10  ;;  %v1442_v26 = vmax.f32 %v1440_v11, %v1441_v61 }
 0x4ca   :  { %v4747_v54 = vpop.eup %2761  ;;  %2773 = vpow2.f32 %v1332_v13  ;;  %v1368_v21 = vmax.f32 %v1366_v6, %v1367_v16 }
 0x4cb   :  { %v4749_v22 = vpop.eup %2763  ;;  %v1219_v23 = vsel %vm1203_vm6, %v4747_v54, 0.0  ;;  %2775 = vpow2.f32 %v1334_v15  ;;  %v1406_v24 = vrot.slane %v1405_v18, 1  ;;  %v1480_v2 = vrot.slane %v1479_v20, 4 }
 0x4cc   :  { %v1220_v27 = vsel %vm1203_vm6, %v4749_v22, 0.0  ;;  %v1369_v28 = vsub.f32 %v4683_v19, %v1368_v21  ;;  %v1370_v25 = vsub.f32 %v4664_v7, %v1368_v21  ;;  %v1443_v33 = vrot.slane %v1442_v26, 2 }
 0x4cd   :  { %v1221_v30 = vadd.f32 %v1220_v27, %v1219_v23  ;;  %v1407_v31 = vmax.f32 %v1405_v18, %v1406_v24  ;;  %v1481_v38 = vmax.f32 %v1479_v20, %v1480_v2 }
 0x4ce   :  { %v4757_v34 = vpop.eup %2765  ;;  %v1371_v36 = vmul.f32 1.442695, %v1369_v28  ;;  %v1373_v37 = vmul.f32 1.442695, %v1370_v25  ;;  %v1444_v35 = vmax.f32 %v1442_v26, %v1443_v33 }
 0x4cf   :  { %v4759_v39 = vpop.eup %2767  ;;  %v1222_v40 = vrot.slane %v1221_v30, 4  ;;  %v1258_v41 = vsel %vm1203_vm6, %v4757_v34, 0.0  ;;  %v1408_v43 = vsub.f32 %v4708_v44, %v1407_v31  ;;  %v1409_v19 = vsub.f32 %v4697_v29, %v1407_v31 }
 0x4d0   :  { %v1259_v7 = vsel %vm1203_vm6, %v4759_v39, 0.0  ;;  %2777 = vpow2.f32 %v1371_v36  ;;  %v1482_v45 = vrot.slane %v1481_v38, 2  ;;  %v1445_v50 = vrot.slane %v1444_v35, 1 }
 0x4d1   :  { %v1223_v32 = vadd.f32 %v1222_v40, %v1221_v30  ;;  %v1260_v47 = vadd.f32 %v1259_v7, %v1258_v41  ;;  %2779 = vpow2.f32 %v1373_v37  ;;  %v1410_v48 = vmul.f32 1.442695, %v1408_v43 }
 0x4d2   :  { %v4767_v14 = vpop.eup %2769  ;;  %v1412_v49 = vmul.f32 1.442695, %v1409_v19  ;;  %v1483_v51 = vmax.f32 %v1481_v38, %v1482_v45  ;;  %v1446_v57 = vmax.f32 %v1444_v35, %v1445_v50 }
 0x4d3   :  { %v4769_v52 = vpop.eup %2771  ;;  %v1224_v44 = vrot.slane %v1223_v32, 2  ;;  %v1261_v55 = vrot.slane %v1260_v47, 4  ;;  %v1297_v29 = vsel %vm1203_vm6, %v4767_v14, 0.0  ;;  %2781 = vpow2.f32 %v1410_v48 }
 0x4d4   :  { %v1298_v56 = vsel %vm1203_vm6, %v4769_v52, 0.0  ;;  %2783 = vpow2.f32 %v1412_v49  ;;  %v1484_v58 = vrot.slane %v1483_v51, 1  ;;  %v1447_v63 = vsub.f32 %v4727_v42, %v1446_v57 }
 0x4d5   :  { %v1225_v59 = vadd.f32 %v1224_v44, %v1223_v32  ;;  %v1262_v46 = vadd.f32 %v1261_v55, %v1260_v47  ;;  %v1299_v60 = vadd.f32 %v1298_v56, %v1297_v29  ;;  %v1448_v0 = vsub.f32 %v4718_v53, %v1446_v57 }
 0x4d6   :  { %v1485_v1 = vmax.f32 %v1483_v51, %v1484_v58  ;;  %v1449_v10 = vmul.f32 1.442695, %v1447_v63 }
 0x4d7   :  { %v4777_v8 = vpop.eup %2773  ;;  %v1226_v4 = vrot.slane %v1225_v59, 1  ;;  %v1263_v5 = vrot.slane %v1262_v46, 2  ;;  %v1300_v6 = vrot.slane %v1299_v60, 4  ;;  %v1451_v13 = vmul.f32 1.442695, %v1448_v0 }
 0x4d8   :  { %v4779_v9 = vpop.eup %2775  ;;  %v1336_v11 = vsel %vm1203_vm6, %v4777_v8, 0.0  ;;  %v1486_v15 = vsub.f32 %v4743_v12, %v1485_v1  ;;  %2785 = vpow2.f32 %v1449_v10  ;;  %v1487_v61 = vsub.f32 %v4731_v62, %v1485_v1 }
 0x4d9   :  { %v1227_v16 = vadd.f32 %v1226_v4, %v1225_v59  ;;  %v1264_v17 = vadd.f32 %v1263_v5, %v1262_v46  ;;  %v1301_v42 = vadd.f32 %v1300_v6, %v1299_v60  ;;  %v1337_v53 = vsel %vm1203_vm6, %v4779_v9, 0.0 }
 0x4da   :  { %v1338_v18 = vadd.f32 %v1337_v53, %v1336_v11  ;;  %v1488_v20 = vmul.f32 1.442695, %v1486_v15  ;;  %v1490_v26 = vmul.f32 1.442695, %v1487_v61 }
 0x4db   :  { %2787 = vrcp.f32 %v1227_v16  ;;  %v1265_v21 = vrot.slane %v1264_v17, 1  ;;  %v1302_v23 = vrot.slane %v1301_v42, 2 }
 0x4dc   :  { %v1339_v24 = vrot.slane %v1338_v18, 4  ;;  %2789 = vpow2.f32 %v1451_v13 }
 0x4dd   :  { %v4787_v27 = vpop.eup %2777  ;;  %v1266_v12 = vadd.f32 %v1265_v21, %v1264_v17  ;;  %v1303_v28 = vadd.f32 %v1302_v23, %v1301_v42  ;;  %2791 = vpow2.f32 %v1488_v20 }
 0x4de   :  { %v4789_v25 = vpop.eup %2779  ;;  %v1340_v2 = vadd.f32 %v1339_v24, %v1338_v18  ;;  %v1375_v30 = vsel %vm1203_vm6, %v4787_v27, 0.0  ;;  %2793 = vpow2.f32 %v1490_v26 }
 0x4df   :  { %2795 = vrcp.f32 %v1266_v12  ;;  %v1304_v62 = vrot.slane %v1303_v28, 1  ;;  %v1376_v31 = vsel %vm1203_vm6, %v4789_v25, 0.0 }
 0x4e0   :  { %v4795_v33 = vpop.eup %2781  ;;  %v1341_v36 = vrot.slane %v1340_v2, 2  ;;  %v1377_v37 = vadd.f32 %v1376_v31, %v1375_v30 }
 0x4e1   :  { %v4797_v38 = vpop.eup %2783  ;;  %v1305_v40 = vadd.f32 %v1304_v62, %v1303_v28  ;;  %v1414_v41 = vsel %vm1203_vm6, %v4795_v33, 0.0 }
 0x4e2   :  { %v1342_v43 = vadd.f32 %v1341_v36, %v1340_v2  ;;  %v1378_v19 = vrot.slane %v1377_v37, 4  ;;  %v1415_v7 = vsel %vm1203_vm6, %v4797_v38, 0.0 }
 0x4e3   :  { %2797 = vrcp.f32 %v1305_v40  ;;  %v1416_v35 = vadd.f32 %v1415_v7, %v1414_v41 }
 0x4e4   :  { %v1343_v45 = vrot.slane %v1342_v43, 1  ;;  %v1379_v32 = vadd.f32 %v1378_v19, %v1377_v37 }
 0x4e5   :  { %v1417_v47 = vrot.slane %v1416_v35, 4  ;;  %v4803_v50 = vpop.eup %2785 }
 0x4e6   :  { %v1344_v48 = vadd.f32 %v1343_v45, %v1342_v43  ;;  %v1380_v49 = vrot.slane %v1379_v32, 2  ;;  %v1453_v29 = vsel %vm1203_vm6, %v4803_v50, 0.0 }
 0x4e7   :  { %v1418_v51 = vadd.f32 %v1417_v47, %v1416_v35 }
 0x4e8   :  { %v2788_v44 = vpop.eup %2787  ;;  %2799 = vrcp.f32 %v1344_v48  ;;  %v1381_v55 = vadd.f32 %v1380_v49, %v1379_v32 }
 0x4e9   :  { %v4807_v56 = vpop.eup %2789  ;;  %v1229_v57 = vmul.f32 %v2788_v44, %v4747_v54  ;;  %v1230_v58 = vmul.f32 %v2788_v44, %v4749_v22  ;;  %v1419_v59 = vrot.slane %v1418_v51, 2 }
 0x4ea   :  { %v4811_v46 = vpop.eup %2791  ;;  %v1382_v60 = vrot.slane %v1381_v55, 1  ;;  %v1454_v63 = vsel %vm1203_vm6, %v4807_v56, 0.0 }
 0x4eb   :  { %v4815_v0 = vpop.eup %2793  ;;  %1231 = vst.msk [vmem:[#allocation4] sm:$0xff] %vm1203_vm6, %v1229_v57  ;;  %1232 = vst.msk [vmem:[#allocation4 + $0x8] sm:$0xff] %vm1203_vm6, %v1230_v58  ;;  %v1420_v1 = vadd.f32 %v1419_v59, %v1418_v51  ;;  %v1455_v4 = vadd.f32 %v1454_v63, %v1453_v29  ;;  %v1492_v54 = vsel %vm1203_vm6, %v4811_v46, 0.0  ;;  %v1832_v58 = vld [vmem:[%s4963_s6 + $0x78] sm:$0xff]  ;;  %v1831_v59 = vld [vmem:[%s4963_s6 + $0x70] sm:$0xff] }
 0x4ec   :  { %v2796_v5 = vpop.eup %2795  ;;  %v1383_v22 = vadd.f32 %v1382_v60, %v1381_v55  ;;  %v1493_v6 = vsel %vm1203_vm6, %v4815_v0, 0.0  ;;  %v1829_v60 = vld [vmem:[%s4963_s6 + $0x60] sm:$0xff]  ;;  %v1828_v63 = vld [vmem:[%s4963_s6 + $0x58] sm:$0xff] }
 0x4ed   :  { %v1268_v11 = vmul.f32 %v2796_v5, %v4757_v34  ;;  %v1269_v10 = vmul.f32 %v2796_v5, %v4759_v39  ;;  %v1421_v13 = vrot.slane %v1420_v1, 1  ;;  %v1456_v15 = vrot.slane %v1455_v4, 4  ;;  %v1823_v5 = vld [vmem:[%s4963_s6 + $0x30] sm:$0xff] }
 0x4ee   :  { %2801 = vrcp.f32 %v1383_v22  ;;  %v1494_v16 = vadd.f32 %v1493_v6, %v1492_v54  ;;  %v1824_v54 = vld [vmem:[%s4963_s6 + $0x38] sm:$0xff]  ;;  %v1822_v22 = vld [vmem:[%s4963_s6 + $0x28] sm:$0xff]  ;;  %v1821_v6 = vld [vmem:[%s4963_s6 + $0x20] sm:$0xff] }
 0x4ef   :  { %1270 = vst.msk [vmem:[#allocation4 + $0x10] sm:$0xff] %vm1203_vm6, %v1268_v11  ;;  %1271 = vst.msk [vmem:[#allocation4 + $0x18] sm:$0xff] %vm1203_vm6, %v1269_v10  ;;  %v1422_v17 = vadd.f32 %v1421_v13, %v1420_v1  ;;  %v1457_v42 = vadd.f32 %v1456_v15, %v1455_v4  ;;  %v1826_v1 = vld [vmem:[%s4963_s6 + $0x48] sm:$0xff]  ;;  %v1825_v4 = vld [vmem:[%s4963_s6 + $0x40] sm:$0xff] }
 0x4f0   :  { %v2798_v53 = vpop.eup %2797  ;;  %v1495_v18 = vrot.slane %v1494_v16, 4  ;;  %v1820_v11 = vld [vmem:[%s4963_s6 + $0x18] sm:$0xff]  ;;  %v1819_v10 = vld [vmem:[%s4963_s6 + $0x10] sm:$0xff]  ;;  %v1818_v13 = vld [vmem:[%s4963_s6 + $0x8] sm:$0xff] }
 0x4f1   :  { %v1307_v61 = vmul.f32 %v2798_v53, %v4767_v14  ;;  %v1308_v20 = vmul.f32 %v2798_v53, %v4769_v52  ;;  %2803 = vrcp.f32 %v1422_v17  ;;  %v1458_v34 = vrot.slane %v1457_v42, 2  ;;  %v1817_v15 = vld [vmem:[%s4963_s6] sm:$0xff]  ;;  %v1721_v17 = vld [vmem:[#allocation3 + $0x8] sm:$0xff] }
 0x4f2   :  { %v1496_v21 = vadd.f32 %v1495_v18, %v1494_v16  ;;  %v1506_v39 = vld [vmem:[#allocation4] sm:$0xff]  ;;  %v1507_v23 = vld [vmem:[#allocation4 + $0x8] sm:$0xff] }
 0x4f3   :  { %1309 = vst.msk [vmem:[#allocation4 + $0x20] sm:$0xff] %vm1203_vm6, %v1307_v61  ;;  %1310 = vst.msk [vmem:[#allocation4 + $0x28] sm:$0xff] %vm1203_vm6, %v1308_v20  ;;  %v1459_v24 = vadd.f32 %v1458_v34, %v1457_v42  ;;  %2677 = vmatprep.mubr.msk.f32.mxu0 %vm1203_vm6, %v1506_v39  ;;  %v1720_v42 = vld [vmem:[#allocation3] sm:$0xff]  ;;  %v1733_v34 = vld [vmem:[#allocation3 + $0x18] sm:$0xff] }
 0x4f4   :  { %v1497_v26 = vrot.slane %v1496_v21, 2  ;;  %2678 = vmatmul.mubr.msk.f32.vlgmr.msra.gmra.mxu0 %vm1203_vm6, %v1507_v23 }
 0x4f5   :  { %v2800_v12 = vpop.eup %2799  ;;  %v1460_v28 = vrot.slane %v1459_v24, 1  ;;  %2702 = vmatpush3.msra.mxu0 %v1832_v58 }
 0x4f6   :  { %v1346_v14 = vmul.f32 %v2800_v12, %v4777_v8  ;;  %v1347_v52 = vmul.f32 %v2800_v12, %v4779_v9  ;;  %v1498_v2 = vadd.f32 %v1497_v26, %v1496_v21  ;;  %v1508_v30 = vld [vmem:[#allocation4 + $0x10] sm:$0xff]  ;;  %v1509_v62 = vld [vmem:[#allocation4 + $0x18] sm:$0xff]  ;;  %2703 = vmatprep.subr.mxu0 %v3641_v3 }
 0x4f7   :  { %v1461_v31 = vadd.f32 %v1460_v28, %v1459_v24  ;;  %2680 = vmatprep.mubr.msk.f32.mxu0 %vm1203_vm6, %v1508_v30  ;;  %2704 = vmatpush3.msra.mxu0 %v1831_v59  ;;  %v1732_v21 = vld [vmem:[#allocation3 + $0x10] sm:$0xff] }
 0x4f8   :  { %1348 = vst.msk [vmem:[#allocation4 + $0x30] sm:$0xff] %vm1203_vm6, %v1346_v14  ;;  %1349 = vst.msk [vmem:[#allocation4 + $0x38] sm:$0xff] %vm1203_vm6, %v1347_v52  ;;  %v1499_v36 = vrot.slane %v1498_v2, 1  ;;  %2681 = vmatmul.mubr.msk.f32.gmra.mxu0 %vm1203_vm6, %v1509_v62  ;;  %2705 = vmatprep.subr.mxu0 %v3641_v3  ;;  %v1745_v14 = vld [vmem:[#allocation3 + $0x28] sm:$0xff]  ;;  %v1744_v52 = vld [vmem:[#allocation3 + $0x20] sm:$0xff] }
 0x4f9   :  { %2805 = vrcp.f32 %v1461_v31 }
 0x4fa   :  { %v1500_v37 = vadd.f32 %v1499_v36, %v1498_v2  ;;  %v1510_v40 = vld [vmem:[#allocation4 + $0x20] sm:$0xff]  ;;  %v1511_v41 = vld [vmem:[#allocation4 + $0x28] sm:$0xff] }
 0x4fb   :  { %v2802_v8 = vpop.eup %2801  ;;  %2683 = vmatprep.mubr.msk.f32.mxu0 %vm1203_vm6, %v1510_v40 }
 0x4fc   :  { %v1385_v9 = vmul.f32 %v2802_v8, %v4787_v27  ;;  %v1386_v43 = vmul.f32 %v2802_v8, %v4789_v25  ;;  %2807 = vrcp.f32 %v1500_v37  ;;  %2684 = vmatmul.mubr.msk.f32.gmra.mxu0 %vm1203_vm6, %v1511_v41 }
 0x4fe   :  { %v2804_v19 = vpop.eup %2803  ;;  %1387 = vst.msk [vmem:[#allocation4 + $0x40] sm:$0xff] %vm1203_vm6, %v1385_v9  ;;  %1388 = vst.msk [vmem:[#allocation4 + $0x48] sm:$0xff] %vm1203_vm6, %v1386_v43  ;;  %v1757_v43 = vld [vmem:[#allocation3 + $0x38] sm:$0xff] }
 0x4ff   :  { %v1424_v7 = vmul.f32 %v2804_v19, %v4795_v33  ;;  %v1425_v35 = vmul.f32 %v2804_v19, %v4797_v38  ;;  %v1512_v45 = vld [vmem:[#allocation4 + $0x30] sm:$0xff]  ;;  %v1513_v32 = vld [vmem:[#allocation4 + $0x38] sm:$0xff] }
 0x500   :  { %2686 = vmatprep.mubr.msk.f32.mxu0 %vm1203_vm6, %v1512_v45  ;;  %v1756_v19 = vld [vmem:[#allocation3 + $0x30] sm:$0xff] }
 0x501   :  { %1426 = vst.msk [vmem:[#allocation4 + $0x50] sm:$0xff] %vm1203_vm6, %v1424_v7  ;;  %1427 = vst.msk [vmem:[#allocation4 + $0x58] sm:$0xff] %vm1203_vm6, %v1425_v35  ;;  %2687 = vmatmul.mubr.msk.f32.gmra.mxu0 %vm1203_vm6, %v1513_v32 }
 0x505   :  { %v1514_v27 = vld [vmem:[#allocation4 + $0x40] sm:$0xff]  ;;  %v1515_v25 = vld [vmem:[#allocation4 + $0x48] sm:$0xff] }
 0x506   :  { %v2806_v47 = vpop.eup %2805  ;;  %2689 = vmatprep.mubr.msk.f32.mxu0 %vm1203_vm6, %v1514_v27 }
 0x507   :  { %v1463_v48 = vmul.f32 %v2806_v47, %v4803_v50  ;;  %v1464_v33 = vmul.f32 %v2806_v47, %v4807_v56  ;;  %2690 = vmatmul.mubr.msk.f32.gmra.mxu0 %vm1203_vm6, %v1515_v25 }
 0x508   :  { %v1516_v38 = vld [vmem:[#allocation4 + $0x50] sm:$0xff]  ;;  %v1517_v49 = vld [vmem:[#allocation4 + $0x58] sm:$0xff] }
 0x509   :  { %v2808_v51 = vpop.eup %2807  ;;  %1465 = vst.msk [vmem:[#allocation4 + $0x60] sm:$0xff] %vm1203_vm6, %v1463_v48  ;;  %1466 = vst.msk [vmem:[#allocation4 + $0x68] sm:$0xff] %vm1203_vm6, %v1464_v33  ;;  %2692 = vmatprep.mubr.msk.f32.mxu0 %vm1203_vm6, %v1516_v38 }
 0x50a   :  { %v1502_v44 = vmul.f32 %v2808_v51, %v4811_v46  ;;  %v1503_v55 = vmul.f32 %v2808_v51, %v4815_v0  ;;  %v1830_v46 = vld [vmem:[%s4963_s6 + $0x68] sm:$0xff]  ;;  %v1827_v0 = vld [vmem:[%s4963_s6 + $0x50] sm:$0xff]  ;;  %s2398_s6 = sshll.u32 %s4479_s10, 4 }
 0x50b   :  { %2693 = vmatmul.mubr.msk.f32.gmra.mxu0 %vm1203_vm6, %v1517_v49  ;;  %s878_s20 = sadd.s32 %s2398_s6, %s4485_s9 }
 0x50c   :  { %1504 = vst.msk [vmem:[#allocation4 + $0x70] sm:$0xff] %vm1203_vm6, %v1502_v44  ;;  %1505 = vst.msk [vmem:[#allocation4 + $0x78] sm:$0xff] %vm1203_vm6, %v1503_v55  ;;  %2706 = vmatpush3.msra.mxu0 %v1830_v46  ;;  %v1769_v55 = vld [vmem:[#allocation3 + $0x48] sm:$0xff]  ;;  %s2399_s24 = sshll.u32 %s878_s20, 4 }
 0x50d   :  { %2707 = vmatprep.subr.mxu0 %v3641_v3  ;;  %s880_s30 = scalar_lea.hbm %s4969_s12, %s2399_s24 }
 0x50e   :  { %2708 = vmatpush3.msra.mxu0 %v1829_v60 }
 0x50f   :  { %2709 = vmatprep.subr.mxu0 %v3641_v3 }
 0x510   :  { %v1518_v50 = vld [vmem:[#allocation4 + $0x60] sm:$0xff]  ;;  %v1519_v29 = vld [vmem:[#allocation4 + $0x68] sm:$0xff]  ;;  %2710 = vmatpush3.msra.mxu0 %v1828_v63 }
 0x511   :  { %2695 = vmatprep.mubr.msk.f32.mxu0 %vm1203_vm6, %v1518_v50  ;;  %2711 = vmatprep.subr.mxu0 %v3641_v3  ;;  %v1768_v50 = vld [vmem:[#allocation3 + $0x40] sm:$0xff] }
 0x512   :  { %2696 = vmatmul.mubr.msk.f32.gmra.mxu0 %vm1203_vm6, %v1519_v29 }
 0x513   :  { %v1520_v56 = vld [vmem:[#allocation4 + $0x70] sm:$0xff]  ;;  %v1521_v57 = vld [vmem:[#allocation4 + $0x78] sm:$0xff]  ;;  %2712 = vmatpush3.msra.mxu0 %v1827_v0 }
 0x514   :  { %2698 = vmatprep.mubr.msk.f32.mxu0 %vm1203_vm6, %v1520_v56  ;;  %2713 = vmatprep.subr.mxu0 %v3641_v3 }
 0x515   :  { %2714 = vmatpush3.msra.mxu0 %v1826_v1  ;;  %v1781_v1 = vld [vmem:[#allocation3 + $0x58] sm:$0xff] }
 0x516   :  { %2699 = vmatmul.mubr.msk.f32.gmra.mxu0 %vm1203_vm6, %v1521_v57  ;;  %2715 = vmatprep.subr.mxu0 %v3641_v3 }
 0x517   :  { %2733 = vmatprep.mubr.msk.f32.mxu0 %vm3642_vm0, %v3641_v3  ;;  %2716 = vmatpush3.msra.mxu0 %v1825_v4  ;;  %v1780_v4 = vld [vmem:[#allocation3 + $0x50] sm:$0xff] }
 0x518   :  { %2717 = vmatprep.subr.mxu0 %v3641_v3 }
 0x519   :  { %2718 = vmatpush3.msra.mxu0 %v1824_v54 }
 0x51a   :  { %2719 = vmatprep.subr.mxu0 %v3641_v3 }
 0x51b   :  { %2720 = vmatpush3.msra.mxu0 %v1823_v5 }
 0x51c   :  { %2721 = vmatprep.subr.mxu0 %v3641_v3 }
 0x51d   :  { %2722 = vmatpush3.msra.mxu0 %v1822_v22 }
 0x51e   :  { %2723 = vmatprep.subr.mxu0 %v3641_v3 }
 0x51f   :  { %2724 = vmatpush3.msra.mxu0 %v1821_v6 }
 0x520   :  { %2725 = vmatprep.subr.mxu0 %v3641_v3 }
 0x521   :  { %2726 = vmatpush3.msra.mxu0 %v1820_v11 }
 0x522   :  { %2727 = vmatprep.subr.mxu0 %v3641_v3 }
 0x523   :  { %2728 = vmatpush3.msra.mxu0 %v1819_v10 }
 0x524   :  { %2729 = vmatprep.subr.mxu0 %v3641_v3 }
 0x525   :  { %2730 = vmatpush3.msra.mxu0 %v1818_v13 }
 0x526   :  { %2731 = vmatprep.subr.mxu0 %v3641_v3 }
 0x527   :  { %2732 = vmatpush3.msra.mxu0 %v1817_v15 }
 0x5b4   :  { %v2679_v16 = vpop.f32.mrf.mxu0 }
 0x5b5   :  { %v1723_v18 = vmul.f32 %v2679_v16, %v1721_v17 }
 0x5b6   :  { %v1641_v53 = vpop.f32.mrf.mxu0 }
 0x5b7   :  { %v1722_v61 = vmul.f32 %v1720_v42, %v1641_v53 }
 0x5b8   :  { %v2682_v20 = vpop.f32.mrf.mxu0 }
 0x5b9   :  { %v1724_v39 = vadd.f32 %v1723_v18, %v1722_v61  ;;  %v1735_v26 = vmul.f32 %v2682_v20, %v1733_v34  ;;  %v1793_v34 = vld [vmem:[#allocation3 + $0x68] sm:$0xff] }
 0x5ba   :  { %v1651_v23 = vpop.f32.mrf.mxu0 }
 0x5bb   :  { %v1725_v24 = vrot.slane %v1724_v39, 4  ;;  %v1734_v12 = vmul.f32 %v1732_v21, %v1651_v23  ;;  %v1792_v21 = vld [vmem:[#allocation3 + $0x60] sm:$0xff] }
 0x5bc   :  { %v2685_v28 = vpop.f32.mrf.mxu0 }
 0x5bd   :  { %v1726_v2 = vadd.f32 %v1725_v24, %v1724_v39  ;;  %v1736_v3 = vadd.f32 %v1735_v26, %v1734_v12  ;;  %v1747_v36 = vmul.f32 %v2685_v28, %v1745_v14 }
 0x5be   :  { %v1661_v30 = vpop.f32.mrf.mxu0 }
 0x5bf   :  { %v1727_v62 = vrot.slane %v1726_v2, 2  ;;  %v1737_v31 = vrot.slane %v1736_v3, 4  ;;  %v1746_v37 = vmul.f32 %v1744_v52, %v1661_v30 }
 0x5c1   :  { %v1728_v40 = vadd.f32 %v1727_v62, %v1726_v2  ;;  %v1738_v41 = vadd.f32 %v1737_v31, %v1736_v3  ;;  %v1748_v8 = vadd.f32 %v1747_v36, %v1746_v37  ;;  %v2688_v9 = vpop.f32.mrf.mxu0  ;;  %v1805_v2 = vld [vmem:[#allocation3 + $0x78] sm:$0xff]  ;;  %v1804_v3 = vld [vmem:[#allocation3 + $0x70] sm:$0xff] }
 0x5c2   :  { %v1759_v27 = vmul.f32 %v2688_v9, %v1757_v43 }
 0x5c3   :  { %v1729_v7 = vrot.slane %v1728_v40, 1  ;;  %v1739_v35 = vrot.slane %v1738_v41, 2  ;;  %v1749_v45 = vrot.slane %v1748_v8, 4  ;;  %v1671_v32 = vpop.f32.mrf.mxu0 }
 0x5c4   :  { %v1758_v25 = vmul.f32 %v1756_v19, %v1671_v32 }
 0x5c5   :  { %v1730_v47 = vadd.f32 %v1729_v7, %v1728_v40  ;;  %v1740_v48 = vadd.f32 %v1739_v35, %v1738_v41  ;;  %v1750_v33 = vadd.f32 %v1749_v45, %v1748_v8 }
 0x5c6   :  { %v1760_v38 = vadd.f32 %v1759_v27, %v1758_v25 }
 0x5c7   :  { %1731 = vst [vmem:[#allocation5] sm:$0x1] %v1730_v47  ;;  %v1741_v49 = vrot.slane %v1740_v48, 1  ;;  %v1751_v51 = vrot.slane %v1750_v33, 2  ;;  %v2691_v44 = vpop.f32.mrf.mxu0 }
 0x5c8   :  { %v1761_v29 = vrot.slane %v1760_v38, 4  ;;  %v1771_v46 = vmul.f32 %v2691_v44, %v1769_v55 }
 0x5c9   :  { %v1742_v56 = vadd.f32 %v1741_v49, %v1740_v48  ;;  %v1752_v57 = vadd.f32 %v1751_v51, %v1750_v33  ;;  %v1681_v58 = vpop.f32.mrf.mxu0 }
 0x5ca   :  { %v1762_v59 = vadd.f32 %v1761_v29, %v1760_v38  ;;  %v1770_v60 = vmul.f32 %v1768_v50, %v1681_v58 }
 0x5cb   :  { %1743 = vst [vmem:[#allocation5 + $0x1] sm:$0x1] %v1742_v56  ;;  %v1753_v63 = vrot.slane %v1752_v57, 1  ;;  %v2694_v0 = vpop.f32.mrf.mxu0 }
 0x5cc   :  { %v1763_v54 = vrot.slane %v1762_v59, 2  ;;  %v1772_v5 = vadd.f32 %v1771_v46, %v1770_v60  ;;  %v1783_v13 = vmul.f32 %v2694_v0, %v1781_v1 }
 0x5cd   :  { %v1754_v22 = vadd.f32 %v1753_v63, %v1752_v57  ;;  %v1691_v6 = vpop.f32.mrf.mxu0 }
 0x5ce   :  { %v1764_v11 = vadd.f32 %v1763_v54, %v1762_v59  ;;  %v1773_v10 = vrot.slane %v1772_v5, 4  ;;  %v1782_v15 = vmul.f32 %v1780_v4, %v1691_v6 }
 0x5cf   :  { %1755 = vst [vmem:[#allocation5 + $0x2] sm:$0x1] %v1754_v22 }
 0x5d0   :  { %v1765_v16 = vrot.slane %v1764_v11, 1  ;;  %v1774_v17 = vadd.f32 %v1773_v10, %v1772_v5  ;;  %v1784_v42 = vadd.f32 %v1783_v13, %v1782_v15 }
 0x5d2   :  { %v1766_v53 = vadd.f32 %v1765_v16, %v1764_v11  ;;  %v1775_v18 = vrot.slane %v1774_v17, 2  ;;  %v1785_v61 = vrot.slane %v1784_v42, 4  ;;  %v2697_v20 = vpop.f32.mrf.mxu0 }
 0x5d3   :  { %v1795_v26 = vmul.f32 %v2697_v20, %v1793_v34 }
 0x5d4   :  { %1767 = vst [vmem:[#allocation5 + $0x3] sm:$0x1] %v1766_v53  ;;  %v1776_v39 = vadd.f32 %v1775_v18, %v1774_v17  ;;  %v1786_v23 = vadd.f32 %v1785_v61, %v1784_v42  ;;  %v1701_v24 = vpop.f32.mrf.mxu0 }
 0x5d5   :  { %v1794_v12 = vmul.f32 %v1792_v21, %v1701_v24 }
 0x5d6   :  { %v1777_v28 = vrot.slane %v1776_v39, 1  ;;  %v1787_v14 = vrot.slane %v1786_v23, 2  ;;  %v2700_v52 = vpop.f32.mrf.mxu0 }
 0x5d7   :  { %v1796_v30 = vadd.f32 %v1795_v26, %v1794_v12  ;;  %v1807_v40 = vmul.f32 %v2700_v52, %v1805_v2 }
 0x5d8   :  { %v1778_v62 = vadd.f32 %v1777_v28, %v1776_v39  ;;  %v1788_v31 = vadd.f32 %v1787_v14, %v1786_v23  ;;  %v1711_v36 = vpop.f32.mrf.mxu0 }
 0x5d9   :  { %v1797_v37 = vrot.slane %v1796_v30, 4  ;;  %v1806_v41 = vmul.f32 %v1804_v3, %v1711_v36 }
 0x5da   :  { %1779 = vst [vmem:[#allocation5 + $0x4] sm:$0x1] %v1778_v62  ;;  %v1789_v8 = vrot.slane %v1788_v31, 1 }
 0x5db   :  { %v1798_v9 = vadd.f32 %v1797_v37, %v1796_v30  ;;  %v1808_v43 = vadd.f32 %v1807_v40, %v1806_v41 }
 0x5dc   :  { %v1790_v19 = vadd.f32 %v1789_v8, %v1788_v31 }
 0x5dd   :  { %v1799_v7 = vrot.slane %v1798_v9, 2  ;;  %v1809_v35 = vrot.slane %v1808_v43, 4 }
 0x5de   :  { %1791 = vst [vmem:[#allocation5 + $0x5] sm:$0x1] %v1790_v19 }
 0x5df   :  { %v1800_v45 = vadd.f32 %v1799_v7, %v1798_v9  ;;  %v1810_v32 = vadd.f32 %v1809_v35, %v1808_v43 }
 0x5e1   :  { %v1801_v27 = vrot.slane %v1800_v45, 1  ;;  %v1811_v25 = vrot.slane %v1810_v32, 2 }
 0x5e3   :  { %v1802_v47 = vadd.f32 %v1801_v27, %v1800_v45  ;;  %v1812_v48 = vadd.f32 %v1811_v25, %v1810_v32 }
 0x5e5   :  { %1803 = vst [vmem:[#allocation5 + $0x6] sm:$0x1] %v1802_v47  ;;  %v1813_v33 = vrot.slane %v1812_v48, 1 }
 0x5e7   :  { %v1814_v38 = vadd.f32 %v1813_v33, %v1812_v48 }
 0x5e9   :  { %1815 = vst [vmem:[#allocation5 + $0x7] sm:$0x1] %v1814_v38 }
 0x5f0   :  { %v1816_v49 = vld [vmem:[#allocation5] sm:$0xff] }
 0x5f1   :  { %2734 = vmatmul.mubr.f32.vlgmr.msra.gmra.mxu0 %v1816_v49 }
 0x5f2   :  { %3516 = shalt.err (!%p3513_p11)  }
 0x5f3   :  { %s3517_s23 = scalar_lea.hbm %s880_s30, 16  ;;  %p3520_p13 = scmp.lt.s32.totalorder %s880_s30, %s4969_s12 }
 0x5f4   :  { %p3518_p12 = scmp.ne.s32.totalorder %s880_s30, %s3517_s23  ;;  %p3521_p0 = scmp.lt.s32.totalorder %s3966_s29, %s3517_s23 }
 0x5f6   :  { %p3522_p1 = por %p3521_p0, %p3520_p13 }
 0x5f8   :  { %p3523_p2 = pnand %p3522_p1, %p3518_p12 }
 0x5fa   :  { %3526 = shalt.err (!%p3523_p2)  }
 0x5fb   :  { %892 = dma.vmem_to_hbm [thread:$0]  %s890_s14, 16, %s880_s30, [#allocation7 + $0x7] }
 0x5fc   :  { %s894_s17 = scalar_lea.hbm %s4970_s13, %s2399_s24  ;;  %s2307_s1 = scalar_lea.vmem %s2306_s15, 112 [#allocation3] }
 0x5fd   :  { %s903_s16 = sshll.u32 %s2307_s1, 4  ;;  %s904_s16 = int_to_ptr.vmem [resolvable:$true] %s903_s16 }
 0x5fe   :  { %s3527_s2 = scalar_lea.vmem %s904_s16, 16  ;;  %p3532_p4 = scmp.lt.s32.totalorder %s904_s16, %s3946_s19 }
 0x5ff   :  { %p3528_p3 = scmp.ne.s32.totalorder %s904_s16, %s3527_s2  ;;  %p3533_p5 = scmp.lt.s32.totalorder %s3996_s25, %s3527_s2 }
 0x601   :  { %p3534_p6 = por %p3533_p5, %p3532_p4 }
 0x603   :  { %p3535_p7 = pnand %p3534_p6, %p3528_p3 }
 0x605   :  { %3538 = shalt.err (!%p3535_p7)  }
 0x606   :  { %s3539_s12 = scalar_lea.hbm %s894_s17, 16  ;;  %p3542_p9 = scmp.lt.s32.totalorder %s894_s17, %s4970_s13 }
 0x607   :  { %p3540_p8 = scmp.ne.s32.totalorder %s894_s17, %s3539_s12  ;;  %p3543_p10 = scmp.lt.s32.totalorder %s3986_s22, %s3539_s12 }
 0x609   :  { %p3544_p11 = por %p3543_p10, %p3542_p9 }
 0x60b   :  { %p3545_p12 = pnand %p3544_p11, %p3540_p8 }
 0x60d   :  { %3548 = shalt.err (!%p3545_p12)  }
 0x60e   :  { %906 = dma.vmem_to_hbm [thread:$0]  %s904_s16, 16, %s894_s17, [#allocation7 + $0xf] }
 0x6b1   :  { %v1899_v51 = vpop.f32.mrf.mxu0 }
 0x6b2   :  { %1903 = vst [vmem:[#allocation12] sm:$0xff] %v1899_v51 }
 0x6b3   :  { %v2735_v44 = vpop.f32.mrf.mxu0 }
 0x6b4   :  { %3603 = dma.done.wait [#allocation7], 16 }
 0x6b5   :  { %3604 = vsyncadd [#allocation7], 4294967280 }
 0x6b6   :  { %3605 = dma.done.wait [#allocation7 + $0x8], 16 }
 0x6b7   :  { %3606 = vsyncadd [#allocation7 + $0x8], 4294967280 }
 0x6b8   :  { %3607 = dma.done.wait [#allocation7 + $0x1], 16 }
 0x6b9   :  { %3608 = vsyncadd [#allocation7 + $0x1], 4294967280 }
 0x6ba   :  { %3609 = dma.done.wait [#allocation7 + $0x9], 16 }
 0x6bb   :  { %3610 = vsyncadd [#allocation7 + $0x9], 4294967280 }
 0x6bc   :  { %3611 = dma.done.wait [#allocation7 + $0x2], 16 }
 0x6bd   :  { %3612 = vsyncadd [#allocation7 + $0x2], 4294967280 }
 0x6be   :  { %3613 = dma.done.wait [#allocation7 + $0xa], 16 }
 0x6bf   :  { %3614 = vsyncadd [#allocation7 + $0xa], 4294967280 }
 0x6c0   :  { %3615 = dma.done.wait [#allocation7 + $0x3], 16 }
 0x6c1   :  { %3616 = vsyncadd [#allocation7 + $0x3], 4294967280 }
 0x6c2   :  { %3617 = dma.done.wait [#allocation7 + $0xb], 16 }
 0x6c3   :  { %3618 = vsyncadd [#allocation7 + $0xb], 4294967280 }
 0x6c4   :  { %3619 = dma.done.wait [#allocation7 + $0x4], 16 }
 0x6c5   :  { %3620 = vsyncadd [#allocation7 + $0x4], 4294967280 }
 0x6c6   :  { %3621 = dma.done.wait [#allocation7 + $0xc], 16 }
 0x6c7   :  { %3622 = vsyncadd [#allocation7 + $0xc], 4294967280 }
 0x6c8   :  { %3623 = dma.done.wait [#allocation7 + $0x5], 16 }
 0x6c9   :  { %3624 = vsyncadd [#allocation7 + $0x5], 4294967280 }
 0x6ca   :  { %3625 = dma.done.wait [#allocation7 + $0xd], 16 }
 0x6cb   :  { %3626 = vsyncadd [#allocation7 + $0xd], 4294967280 }
 0x6cc   :  { %3627 = dma.done.wait [#allocation7 + $0x6], 16 }
 0x6cd   :  { %3628 = vsyncadd [#allocation7 + $0x6], 4294967280 }
 0x6ce   :  { %3629 = dma.done.wait [#allocation7 + $0xe], 16 }
 0x6cf   :  { %3630 = vsyncadd [#allocation7 + $0xe], 4294967280 }
 0x6d0   :  { %3631 = dma.done.wait [#allocation7 + $0x7], 16 }
 0x6d1   :  { %3632 = vsyncadd [#allocation7 + $0x7], 4294967280 }
 0x6d2   :  { %3633 = dma.done.wait [#allocation7 + $0xf], 16 }
 0x6d3   :  { %3634 = vsyncadd [#allocation7 + $0xf], 4294967280  ;;  %s3660_s13 = smov [#allocation12]  }
 0x6d4   :  { %s1960_s19 = sshll.u32 %s3660_s13, 4  ;;  %s1961_s19 = int_to_ptr.vmem [resolvable:$true] %s1960_s19 }
 0x6d5   :  { %s3549_s22 = scalar_lea.vmem %s1961_s19, 128  ;;  %p3554_p0 = scmp.lt.s32.totalorder %s1961_s19, %s1961_s19 }
 0x6d6   :  { %p3550_p13 = scmp.ne.s32.totalorder %s1961_s19, %s3549_s22  ;;  %p3555_p1 = scmp.lt.s32.totalorder %s3549_s22, %s3549_s22 }
 0x6d8   :  { %p3556_p2 = por %p3555_p1, %p3554_p0 }
 0x6da   :  { %p3557_p3 = pnand %p3556_p2, %p3550_p13 }
 0x6dc   :  { %3560 = shalt.err (!%p3557_p3)
}
 0x6dd   :  { %1963 = dma.vmem_to_hbm [thread:$0]  %s1961_s19, 128, %s4968_s11, [#allocation13]  }
 0x6de   :  { %3635 = dma.done.wait [#allocation13], 128  }
 0x6df   :  { %3636 = vsyncadd [#allocation13], 4294967168 }
 0x6e0   :  { %1967 = vsyncpa [#allocation13], 1 }
 0x6e1   :  { %1968 = vsyncmov [#allocation6] }
 0x6e4   :  { %s1969_s15 = vpop.sfrf %1968 }
 0x6e5   :  { %p2425_p4 = scmp.ne.s32.totalorder %s1969_s15, 0 }
 0x6e7   :  { %1973 = shalt.err (%p2425_p4)  }
 0x6e8   :  { %1975 = vsyncmov [#allocation6 + $0x1] }
 0x6eb   :  { %s1976_s8 = vpop.sfrf %1975 }
 0x6ec   :  { %p2426_p5 = scmp.ne.s32.totalorder %s1976_s8, 0 }
 0x6ee   :  { %1980 = shalt.err (%p2426_p5)  }
 0x6ef   :  { %1982 = vsyncmov [#allocation6 + $0x2] }
 0x6f2   :  { %s1983_s28 = vpop.sfrf %1982 }
 0x6f3   :  { %p2427_p6 = scmp.ne.s32.totalorder %s1983_s28, 0 }
 0x6f5   :  { %1987 = shalt.err (%p2427_p6)  }
 0x6f6   :  { %1989 = vsyncmov [#allocation6 + $0x3] }
 0x6f9   :  { %s1990_s0 = vpop.sfrf %1989 }
 0x6fa   :  { %p2428_p7 = scmp.ne.s32.totalorder %s1990_s0, 0 }
 0x6fc   :  { %1994 = shalt.err (%p2428_p7)  }
 0x6fd   :  { %1996 = vsyncmov [#allocation6 + $0x4] }
 0x700   :  { %s1997_s11 = vpop.sfrf %1996 }
 0x701   :  { %p2429_p8 = scmp.ne.s32.totalorder %s1997_s11, 0 }
 0x703   :  { %2001 = shalt.err (%p2429_p8)  }
 0x704   :  { %2003 = vsyncmov [#allocation6 + $0x5] }
 0x707   :  { %s2004_s6 = vpop.sfrf %2003 }
 0x708   :  { %p2430_p9 = scmp.ne.s32.totalorder %s2004_s6, 0 }
 0x70a   :  { %2008 = shalt.err (%p2430_p9)  }
 0x70b   :  { %2010 = vsyncmov [#allocation6 + $0x6] }
 0x70e   :  { %s2011_s3 = vpop.sfrf %2010 }
 0x70f   :  { %p2431_p10 = scmp.ne.s32.totalorder %s2011_s3, 0 }
 0x711   :  { %2015 = shalt.err (%p2431_p10)  }
 0x712   :  { %2017 = vsyncmov [#allocation6 + $0x7] }
 0x715   :  { %s2018_s20 = vpop.sfrf %2017 }
 0x716   :  { %p2432_p11 = scmp.ne.s32.totalorder %s2018_s20, 0 }
 0x718   :  { %2022 = shalt.err (%p2432_p11)  }
 0x719   :  { %2024 = vsyncmov [#allocation6 + $0x8] }
 0x71c   :  { %s2025_s24 = vpop.sfrf %2024 }
 0x71d   :  { %p2433_p12 = scmp.ne.s32.totalorder %s2025_s24, 0 }
 0x71f   :  { %2029 = shalt.err (%p2433_p12)  }
 0x720   :  { %2031 = vsyncmov [#allocation6 + $0x9] }
 0x723   :  { %s2032_s14 = vpop.sfrf %2031 }
 0x724   :  { %p2434_p13 = scmp.ne.s32.totalorder %s2032_s14, 0 }
 0x726   :  { %2036 = shalt.err (%p2434_p13)  }
 0x727   :  { %2038 = vsyncmov [#allocation6 + $0xa] }
 0x72a   :  { %s2039_s21 = vpop.sfrf %2038 }
 0x72b   :  { %p2435_p0 = scmp.ne.s32.totalorder %s2039_s21, 0 }
 0x72d   :  { %2043 = shalt.err (%p2435_p0)  }
 0x72e   :  { %2045 = vsyncmov [#allocation6 + $0xb] }
 0x731   :  { %s2046_s26 = vpop.sfrf %2045 }
 0x732   :  { %p2436_p1 = scmp.ne.s32.totalorder %s2046_s26, 0 }
 0x734   :  { %2050 = shalt.err (%p2436_p1)  }
 0x735   :  { %2052 = vsyncmov [#allocation6 + $0xc] }
 0x738   :  { %s2053_s30 = vpop.sfrf %2052 }
 0x739   :  { %p2437_p2 = scmp.ne.s32.totalorder %s2053_s30, 0 }
 0x73b   :  { %2057 = shalt.err (%p2437_p2)  }
 0x73c   :  { %2059 = vsyncmov [#allocation6 + $0xd] }
 0x73f   :  { %s2060_s5 = vpop.sfrf %2059 }
 0x740   :  { %p2438_p3 = scmp.ne.s32.totalorder %s2060_s5, 0 }
 0x742   :  { %2064 = shalt.err (%p2438_p3)  }
 0x743   :  { %2066 = vsyncmov [#allocation6 + $0xe] }
 0x746   :  { %s2067_s23 = vpop.sfrf %2066 }
 0x747   :  { %p2439_p4 = scmp.ne.s32.totalorder %s2067_s23, 0 }
 0x749   :  { %2071 = shalt.err (%p2439_p4)  }
 0x74a   :  { %2073 = vsyncmov [#allocation6 + $0xf] }
 0x74d   :  { %s2074_s10 = vpop.sfrf %2073 }
 0x74e   :  { %p2440_p5 = scmp.ne.s32.totalorder %s2074_s10, 0 }
 0x750   :  { %2078 = shalt.err (%p2440_p5)  }
 0x751   :  { %2079 = vsyncmov [#allocation7] }
 0x754   :  { %s2080_s27 = vpop.sfrf %2079 }
 0x755   :  { %p2441_p6 = scmp.ne.s32.totalorder %s2080_s27, 0 }
 0x757   :  { %2084 = shalt.err (%p2441_p6)  }
 0x758   :  { %2086 = vsyncmov [#allocation7 + $0x1] }
 0x75b   :  { %s2087_s7 = vpop.sfrf %2086 }
 0x75c   :  { %p2442_p7 = scmp.ne.s32.totalorder %s2087_s7, 0 }
 0x75e   :  { %2091 = shalt.err (%p2442_p7)  }
 0x75f   :  { %2093 = vsyncmov [#allocation7 + $0x2] }
 0x762   :  { %s2094_s18 = vpop.sfrf %2093 }
 0x763   :  { %p2443_p8 = scmp.ne.s32.totalorder %s2094_s18, 0 }
 0x765   :  { %2098 = shalt.err (%p2443_p8)  }
 0x766   :  { %2100 = vsyncmov [#allocation7 + $0x3] }
 0x769   :  { %s2101_s17 = vpop.sfrf %2100 }
 0x76a   :  { %p2444_p9 = scmp.ne.s32.totalorder %s2101_s17, 0 }
 0x76c   :  { %2105 = shalt.err (%p2444_p9)  }
 0x76d   :  { %2107 = vsyncmov [#allocation7 + $0x4] }
 0x770   :  { %s2108_s1 = vpop.sfrf %2107 }
 0x771   :  { %p2445_p10 = scmp.ne.s32.totalorder %s2108_s1, 0 }
 0x773   :  { %2112 = shalt.err (%p2445_p10)  }
 0x774   :  { %2114 = vsyncmov [#allocation7 + $0x5] }
 0x777   :  { %s2115_s16 = vpop.sfrf %2114 }
 0x778   :  { %p2446_p11 = scmp.ne.s32.totalorder %s2115_s16, 0 }
 0x77a   :  { %2119 = shalt.err (%p2446_p11)  }
 0x77b   :  { %2121 = vsyncmov [#allocation7 + $0x6] }
 0x77e   :  { %s2122_s2 = vpop.sfrf %2121 }
 0x77f   :  { %p2447_p12 = scmp.ne.s32.totalorder %s2122_s2, 0 }
 0x781   :  { %2126 = shalt.err (%p2447_p12)  }
 0x782   :  { %2128 = vsyncmov [#allocation7 + $0x7] }
 0x785   :  { %s2129_s12 = vpop.sfrf %2128 }
 0x786   :  { %p2448_p13 = scmp.ne.s32.totalorder %s2129_s12, 0 }
 0x788   :  { %2133 = shalt.err (%p2448_p13)  }
 0x789   :  { %2135 = vsyncmov [#allocation7 + $0x8] }
 0x78c   :  { %s2136_s29 = vpop.sfrf %2135 }
 0x78d   :  { %p2449_p0 = scmp.ne.s32.totalorder %s2136_s29, 0 }
 0x78f   :  { %2140 = shalt.err (%p2449_p0)  }
 0x790   :  { %2142 = vsyncmov [#allocation7 + $0x9] }
 0x793   :  { %s2143_s4 = vpop.sfrf %2142 }
 0x794   :  { %p2450_p1 = scmp.ne.s32.totalorder %s2143_s4, 0 }
 0x796   :  { %2147 = shalt.err (%p2450_p1)  }
 0x797   :  { %2149 = vsyncmov [#allocation7 + $0xa] }
 0x79a   :  { %s2150_s13 = vpop.sfrf %2149 }
 0x79b   :  { %p2451_p2 = scmp.ne.s32.totalorder %s2150_s13, 0 }
 0x79d   :  { %2154 = shalt.err (%p2451_p2)  }
 0x79e   :  { %2156 = vsyncmov [#allocation7 + $0xb] }
 0x7a1   :  { %s2157_s19 = vpop.sfrf %2156 }
 0x7a2   :  { %p2452_p3 = scmp.ne.s32.totalorder %s2157_s19, 0 }
 0x7a4   :  { %2161 = shalt.err (%p2452_p3)  }
 0x7a5   :  { %2163 = vsyncmov [#allocation7 + $0xc] }
 0x7a8   :  { %s2164_s22 = vpop.sfrf %2163 }
 0x7a9   :  { %p2453_p4 = scmp.ne.s32.totalorder %s2164_s22, 0 }
 0x7ab   :  { %2168 = shalt.err (%p2453_p4)  }
 0x7ac   :  { %2170 = vsyncmov [#allocation7 + $0xd] }
 0x7af   :  { %s2171_s25 = vpop.sfrf %2170 }
 0x7b0   :  { %p2454_p5 = scmp.ne.s32.totalorder %s2171_s25, 0 }
 0x7b2   :  { %2175 = shalt.err (%p2454_p5)  }
 0x7b3   :  { %2177 = vsyncmov [#allocation7 + $0xe] }
 0x7b6   :  { %s2178_s9 = vpop.sfrf %2177 }
 0x7b7   :  { %p2455_p6 = scmp.ne.s32.totalorder %s2178_s9, 0 }
 0x7b9   :  { %2182 = shalt.err (%p2455_p6)  }
 0x7ba   :  { %2184 = vsyncmov [#allocation7 + $0xf] }
 0x7bd   :  { %s2185_s15 = vpop.sfrf %2184 }
 0x7be   :  { %p2456_p7 = scmp.ne.s32.totalorder %s2185_s15, 0 }
 0x7c0   :  { %2189 = shalt.err (%p2456_p7)  }

</bundles_post_ra>
